<compile_context>
chip_gen: v7x
topology: tpu7x:2x2x1
jax: 0.10.0
libtpu: 0.0.40
codegen_flags: <defaults>
</compile_context>

<pallas_src>
import jax
import jax.numpy as jnp
from jax import lax
from jax.experimental import pallas as pl
from jax.experimental.pallas import tpu as pltpu

B = 2
CIN, COUT = 6, 32
CIN_PAD = 8                      # pad 6 -> 8 input channels (aligned contraction)
H = W = 8
KH = KW = 3
NTAP = KH * KW
KDIM = NTAP * CIN_PAD            # 72: im2col contraction depth
HW = H * W
FEAT = HW * COUT                 # 2048 (NHWC-flat feature width)
HID = 128
NUM_CLASSES = 64


# ---------------------------------------------------------------- kernel -----
def cnn_fused_kernel(p_ref, wc_ref, bc_ref, w1_ref, b1_ref, w2_ref, b2_ref,
                     o_ref, conv_ref, feat_ref):
    # p:  (B*HW, KDIM)  im2col patches (rows = (b, h, w), cols = tap*8 + cin)
    # wc: (KDIM, COUT)  conv weights, bc: (1, COUT)
    # w1: (FEAT, HID)   linear1 weights, input dim already in NHWC-flat order
    # b1: (1, HID), w2: (HID, NUM_CLASSES), b2: (1, NUM_CLASSES)
    # scratch: conv_ref (B, HW, COUT) f32, feat_ref (B, FEAT) f32

    # ---- conv 3x3 'same' + ReLU: one K=72 MXU matmul ----
    conv = jnp.dot(p_ref[...], wc_ref[...], preferred_element_type=jnp.float32)
    conv = jnp.maximum(conv + bc_ref[...], 0.0)               # (B*HW, COUT)
    conv_ref[...] = conv.reshape(B, HW, COUT)                 # leading-dim split only

    # ---- flatten to (B, FEAT): feat[b, hw*COUT + c] = conv[b, hw, c] ----
    # (w1 was pre-permuted to this NHWC-flat ordering, so no transpose needed)
    for p in range(HW):
        feat_ref[:, p * COUT:(p + 1) * COUT] = conv_ref[:, p, :]

    # ---- Linear(2048,128) + ReLU -> Linear(128,64) -> Softmax ----
    h1 = jnp.dot(feat_ref[...], w1_ref[...], preferred_element_type=jnp.float32)
    h1 = jnp.maximum(h1 + b1_ref[...], 0.0)
    logits = jnp.dot(h1, w2_ref[...], preferred_element_type=jnp.float32)
    logits = logits + b2_ref[...]
    m = jnp.max(logits, axis=-1, keepdims=True)
    e = jnp.exp(logits - m)
    o_ref[...] = e * pl.reciprocal(jnp.sum(e, axis=-1, keepdims=True))


# ---------------------------------------------------------- pallas wrapper ---
def _full_spec(shape):
    # whole-array block, single kernel invocation (no grid)
    return pl.BlockSpec(shape, lambda *_: (0,) * len(shape))


def cnn_fused(patches, wc, bc, w1p, b1, w2t, b2):
    cost = pl.CostEstimate(
        flops=2 * (B * HW * KDIM * COUT + B * FEAT * HID + B * HID * NUM_CLASSES),
        transcendentals=B * NUM_CLASSES,
        bytes_accessed=4 * (B * HW * KDIM + KDIM * COUT + COUT + FEAT * HID
                            + HID + HID * NUM_CLASSES + NUM_CLASSES
                            + B * NUM_CLASSES),
    )
    return pl.pallas_call(
        cnn_fused_kernel,
        out_shape=jax.ShapeDtypeStruct((B, NUM_CLASSES), jnp.float32),
        in_specs=[_full_spec(patches.shape), _full_spec(wc.shape),
                  _full_spec(bc.shape), _full_spec(w1p.shape),
                  _full_spec(b1.shape), _full_spec(w2t.shape),
                  _full_spec(b2.shape)],
        out_specs=_full_spec((B, NUM_CLASSES)),
        scratch_shapes=[pltpu.VMEM((B, HW, COUT), jnp.float32),
                        pltpu.VMEM((B, FEAT), jnp.float32)],
        cost_estimate=cost,
    )(patches, wc, bc, w1p, b1, w2t, b2)


# ------------------------------------------------------------ param prep -----
def prepare_params(params):
    """One-time repack of PyTorch-layout params into kernel-friendly operands."""
    w_conv, b_conv, w1, b1, w2, b2 = params
    # torch conv weight (COUT, CIN, KH, KW) -> (KH, KW, CIN_PAD, COUT) -> (72, 32)
    wtap = jnp.transpose(w_conv, (2, 3, 1, 0))
    wtap = jnp.pad(wtap, ((0, 0), (0, 0), (0, CIN_PAD - CIN), (0, 0)))
    wc = wtap.reshape(KDIM, COUT)                       # k = tap*8 + cin
    # Permute linear1 input dim so the NHWC-flat conv output can be used directly
    # (replaces the runtime NCHW-flatten transpose): w1p[hw*COUT + c, j] = w1[j, c*HW + hw]
    w1p = jnp.transpose(w1.reshape(HID, COUT, HW), (2, 1, 0)).reshape(FEAT, HID)
    return (wc, b_conv.reshape(1, COUT), w1p, b1.reshape(1, HID),
            w2.T, b2.reshape(1, NUM_CLASSES))


# ---------------------------------------------------------------- forward ----
def cnn_forward(x_nchw, prepared):
    wc, bc, w1p, b1, w2t, b2 = prepared
    # NCHW -> NHWC, pad spatial by 1 ('same' 3x3) and channels 6 -> 8 (zeros)
    x = jnp.transpose(x_nchw, (0, 2, 3, 1))                           # (B, 8, 8, 6)
    xp = jnp.pad(x, ((0, 0), (1, 1), (1, 1), (0, CIN_PAD - CIN)))     # (B, 10, 10, 8)
    # host-side im2col (XLA fuses with the transpose/pad): 36 KB patch matrix,
    # columns ordered tap-major / channel-minor to match wc above.
    taps = [xp[:, dy:dy + H, dx:dx + W, :]
            for dy in range(KH) for dx in range(KW)]                  # 9 x (B,8,8,8)
    patches = jnp.concatenate(taps, axis=-1).reshape(B * HW, KDIM)    # (128, 72)
    return cnn_fused(patches, wc, bc, w1p, b1, w2t, b2)


# --------------------------------------------------------------- reference ---
def cnn_reference(x_nchw, params):
    w_conv, b_conv, w1, b1, w2, b2 = params
    y = lax.conv_general_dilated(
        x_nchw, w_conv, window_strides=(1, 1), padding="SAME",
        dimension_numbers=("NCHW", "OIHW", "NCHW"))
    y = jnp.maximum(y + b_conv[None, :, None, None], 0.0)
    y = y.reshape(-1, COUT * H * W)
    y = jnp.maximum(y @ w1.T + b1, 0.0)
    y = y @ w2.T + b2
    return jax.nn.softmax(y, axis=-1)


# ------------------------------------------------------------------- main ----
def make_params():
    # matches CNN.initialize_weights(); linear2 keeps deterministic default-style init
    k = jax.random.PRNGKey(42)
    k_conv, k_w2, k_b2 = jax.random.split(k, 3)
    w_conv = jax.random.normal(k_conv, (COUT, CIN, KH, KW), jnp.float32) * 1e-7
    b_conv = jnp.zeros((COUT,), jnp.float32)
    w1 = jnp.full((HID, COUT * H * W), 1e-7, jnp.float32)
    b1 = jnp.zeros((HID,), jnp.float32)
    bound = 1.0 / jnp.sqrt(jnp.float32(HID))
    w2 = jax.random.uniform(k_w2, (NUM_CLASSES, HID), jnp.float32, -bound, bound)
    b2 = jax.random.uniform(k_b2, (NUM_CLASSES,), jnp.float32, -bound, bound)
    return (w_conv, b_conv, w1, b1, w2, b2)


if __name__ == "__main__":
    params = make_params()
    prepared = prepare_params(params)          # one-time, outside the hot path
    x = jax.random.normal(jax.random.PRNGKey(0), (B, CIN, H, W), jnp.float32)

    fwd = jax.jit(cnn_forward)
    out = jax.block_until_ready(fwd(x, prepared))

    ref = cnn_reference(x, params)
    assert out.shape == (B, NUM_CLASSES), out.shape
    assert jnp.allclose(jnp.sum(out, axis=-1), 1.0, atol=1e-5)
    assert jnp.allclose(out, ref, rtol=1e-5, atol=1e-6)

    print("KERNEL_OK")
</pallas_src>

<mosaic_0001>
module attributes {stable_mosaic.version = 11 : i64} {
  func.func @cnn_fused_kernel(%arg0: memref<128x72xf32, #tpu.memory_space<vmem>>, %arg1: memref<72x32xf32, #tpu.memory_space<vmem>>, %arg2: memref<1x32xf32, #tpu.memory_space<vmem>>, %arg3: memref<2048x128xf32, #tpu.memory_space<vmem>>, %arg4: memref<1x128xf32, #tpu.memory_space<vmem>>, %arg5: memref<128x64xf32, #tpu.memory_space<vmem>>, %arg6: memref<1x64xf32, #tpu.memory_space<vmem>>, %arg7: memref<2x64xf32, #tpu.memory_space<vmem>>, %arg8: memref<2x64x32xf32, #tpu.memory_space<vmem>>, %arg9: memref<2x2048xf32, #tpu.memory_space<vmem>>) attributes {dimension_semantics = [], scalar_prefetch = 0 : i64, scratch_operands = 2 : i64, tpu.core_type = #tpu.core_type<tc>} {
    %c0 = arith.constant 0 : index
    %c0_0 = arith.constant 0 : index
    %0 = vector.load %arg0[%c0, %c0_0] : memref<128x72xf32, #tpu.memory_space<vmem>>, vector<128x72xf32>
    %c0_1 = arith.constant 0 : index
    %c0_2 = arith.constant 0 : index
    %1 = vector.load %arg1[%c0_1, %c0_2] : memref<72x32xf32, #tpu.memory_space<vmem>>, vector<72x32xf32>
    %cst = arith.constant dense<0.000000e+00> : vector<128x32xf32>
    %2 = tpu.matmul %0, %1, %cst {dimension_numbers = #tpu.dot_dimension_numbers<[1], [0], [0], [1], [0, 0, 1, 1], [], []>} : vector<128x72xf32>, vector<72x32xf32>, vector<128x32xf32> -> vector<128x32xf32>
    %c0_3 = arith.constant 0 : index
    %c0_4 = arith.constant 0 : index
    %3 = vector.load %arg2[%c0_3, %c0_4] : memref<1x32xf32, #tpu.memory_space<vmem>>, vector<1x32xf32>
    %4 = vector.broadcast %3 : vector<1x32xf32> to vector<128x32xf32>
    %5 = arith.addf %2, %4 : vector<128x32xf32>
    %cst_5 = arith.constant 0.000000e+00 : f32
    %6 = vector.broadcast %cst_5 : f32 to vector<128x32xf32>
    %7 = arith.maximumf %5, %6 : vector<128x32xf32>
    %8 = vector.shape_cast %7 : vector<128x32xf32> to vector<2x64x32xf32>
    %c0_6 = arith.constant 0 : index
    %c0_7 = arith.constant 0 : index
    %c0_8 = arith.constant 0 : index
    %9 = vector.load %arg8[%c0_6, %c0_7, %c0_8] : memref<2x64x32xf32, #tpu.memory_space<vmem>>, vector<2x64x32xf32>
    tpu.vector_store %arg8[%c0_6, %c0_7, %c0_8], %8 {strides = array<i32>} : memref<2x64x32xf32, #tpu.memory_space<vmem>>, vector<2x64x32xf32>,
    %c0_9 = arith.constant 0 : index
    %c0_10 = arith.constant 0 : index
    %c0_11 = arith.constant 0 : index
    %10 = vector.load %arg8[%c0_9, %c0_10, %c0_11] : memref<2x64x32xf32, #tpu.memory_space<vmem>>, vector<2x1x32xf32>
    %11 = vector.shape_cast %10 : vector<2x1x32xf32> to vector<2x32xf32>
    %c0_12 = arith.constant 0 : index
    %c0_13 = arith.constant 0 : index
    %12 = vector.load %arg9[%c0_12, %c0_13] : memref<2x2048xf32, #tpu.memory_space<vmem>>, vector<2x32xf32>
    tpu.vector_store %arg9[%c0_12, %c0_13], %11 {strides = array<i32>} : memref<2x2048xf32, #tpu.memory_space<vmem>>, vector<2x32xf32>,
    %c0_14 = arith.constant 0 : index
    %c1 = arith.constant 1 : index
    %c0_15 = arith.constant 0 : index
    %13 = vector.load %arg8[%c0_14, %c1, %c0_15] : memref<2x64x32xf32, #tpu.memory_space<vmem>>, vector<2x1x32xf32>
    %14 = vector.shape_cast %13 : vector<2x1x32xf32> to vector<2x32xf32>
    %c0_16 = arith.constant 0 : index
    %c32 = arith.constant 32 : index
    %15 = vector.load %arg9[%c0_16, %c32] : memref<2x2048xf32, #tpu.memory_space<vmem>>, vector<2x32xf32>
    tpu.vector_store %arg9[%c0_16, %c32], %14 {strides = array<i32>} : memref<2x2048xf32, #tpu.memory_space<vmem>>, vector<2x32xf32>,
    %c0_17 = arith.constant 0 : index
    %c2 = arith.constant 2 : index
    %c0_18 = arith.constant 0 : index
    %16 = vector.load %arg8[%c0_17, %c2, %c0_18] : memref<2x64x32xf32, #tpu.memory_space<vmem>>, vector<2x1x32xf32>
    %17 = vector.shape_cast %16 : vector<2x1x32xf32> to vector<2x32xf32>
    %c0_19 = arith.constant 0 : index
    %c64 = arith.constant 64 : index
    %18 = vector.load %arg9[%c0_19, %c64] : memref<2x2048xf32, #tpu.memory_space<vmem>>, vector<2x32xf32>
    tpu.vector_store %arg9[%c0_19, %c64], %17 {strides = array<i32>} : memref<2x2048xf32, #tpu.memory_space<vmem>>, vector<2x32xf32>,
    %c0_20 = arith.constant 0 : index
    %c3 = arith.constant 3 : index
    %c0_21 = arith.constant 0 : index
    %19 = vector.load %arg8[%c0_20, %c3, %c0_21] : memref<2x64x32xf32, #tpu.memory_space<vmem>>, vector<2x1x32xf32>
    %20 = vector.shape_cast %19 : vector<2x1x32xf32> to vector<2x32xf32>
    %c0_22 = arith.constant 0 : index
    %c96 = arith.constant 96 : index
    %21 = vector.load %arg9[%c0_22, %c96] : memref<2x2048xf32, #tpu.memory_space<vmem>>, vector<2x32xf32>
    tpu.vector_store %arg9[%c0_22, %c96], %20 {strides = array<i32>} : memref<2x2048xf32, #tpu.memory_space<vmem>>, vector<2x32xf32>,
    %c0_23 = arith.constant 0 : index
    %c4 = arith.constant 4 : index
    %c0_24 = arith.constant 0 : index
    %22 = vector.load %arg8[%c0_23, %c4, %c0_24] : memref<2x64x32xf32, #tpu.memory_space<vmem>>, vector<2x1x32xf32>
    %23 = vector.shape_cast %22 : vector<2x1x32xf32> to vector<2x32xf32>
    %c0_25 = arith.constant 0 : index
    %c128 = arith.constant 128 : index
    %24 = vector.load %arg9[%c0_25, %c128] : memref<2x2048xf32, #tpu.memory_space<vmem>>, vector<2x32xf32>
    tpu.vector_store %arg9[%c0_25, %c128], %23 {strides = array<i32>} : memref<2x2048xf32, #tpu.memory_space<vmem>>, vector<2x32xf32>,
    %c0_26 = arith.constant 0 : index
    %c5 = arith.constant 5 : index
    %c0_27 = arith.constant 0 : index
    %25 = vector.load %arg8[%c0_26, %c5, %c0_27] : memref<2x64x32xf32, #tpu.memory_space<vmem>>, vector<2x1x32xf32>
    %26 = vector.shape_cast %25 : vector<2x1x32xf32> to vector<2x32xf32>
    %c0_28 = arith.constant 0 : index
    %c160 = arith.constant 160 : index
    %27 = vector.load %arg9[%c0_28, %c160] : memref<2x2048xf32, #tpu.memory_space<vmem>>, vector<2x32xf32>
    tpu.vector_store %arg9[%c0_28, %c160], %26 {strides = array<i32>} : memref<2x2048xf32, #tpu.memory_space<vmem>>, vector<2x32xf32>,
    %c0_29 = arith.constant 0 : index
    %c6 = arith.constant 6 : index
    %c0_30 = arith.constant 0 : index
    %28 = vector.load %arg8[%c0_29, %c6, %c0_30] : memref<2x64x32xf32, #tpu.memory_space<vmem>>, vector<2x1x32xf32>
    %29 = vector.shape_cast %28 : vector<2x1x32xf32> to vector<2x32xf32>
    %c0_31 = arith.constant 0 : index
    %c192 = arith.constant 192 : index
    %30 = vector.load %arg9[%c0_31, %c192] : memref<2x2048xf32, #tpu.memory_space<vmem>>, vector<2x32xf32>
    tpu.vector_store %arg9[%c0_31, %c192], %29 {strides = array<i32>} : memref<2x2048xf32, #tpu.memory_space<vmem>>, vector<2x32xf32>,
    %c0_32 = arith.constant 0 : index
    %c7 = arith.constant 7 : index
    %c0_33 = arith.constant 0 : index
    %31 = vector.load %arg8[%c0_32, %c7, %c0_33] : memref<2x64x32xf32, #tpu.memory_space<vmem>>, vector<2x1x32xf32>
    %32 = vector.shape_cast %31 : vector<2x1x32xf32> to vector<2x32xf32>
    %c0_34 = arith.constant 0 : index
    %c224 = arith.constant 224 : index
    %33 = vector.load %arg9[%c0_34, %c224] : memref<2x2048xf32, #tpu.memory_space<vmem>>, vector<2x32xf32>
    tpu.vector_store %arg9[%c0_34, %c224], %32 {strides = array<i32>} : memref<2x2048xf32, #tpu.memory_space<vmem>>, vector<2x32xf32>,
    %c0_35 = arith.constant 0 : index
    %c8 = arith.constant 8 : index
    %c0_36 = arith.constant 0 : index
    %34 = vector.load %arg8[%c0_35, %c8, %c0_36] : memref<2x64x32xf32, #tpu.memory_space<vmem>>, vector<2x1x32xf32>
    %35 = vector.shape_cast %34 : vector<2x1x32xf32> to vector<2x32xf32>
    %c0_37 = arith.constant 0 : index
    %c256 = arith.constant 256 : index
    %36 = vector.load %arg9[%c0_37, %c256] : memref<2x2048xf32, #tpu.memory_space<vmem>>, vector<2x32xf32>
    tpu.vector_store %arg9[%c0_37, %c256], %35 {strides = array<i32>} : memref<2x2048xf32, #tpu.memory_space<vmem>>, vector<2x32xf32>,
    %c0_38 = arith.constant 0 : index
    %c9 = arith.constant 9 : index
    %c0_39 = arith.constant 0 : index
    %37 = vector.load %arg8[%c0_38, %c9, %c0_39] : memref<2x64x32xf32, #tpu.memory_space<vmem>>, vector<2x1x32xf32>
    %38 = vector.shape_cast %37 : vector<2x1x32xf32> to vector<2x32xf32>
    %c0_40 = arith.constant 0 : index
    %c288 = arith.constant 288 : index
    %39 = vector.load %arg9[%c0_40, %c288] : memref<2x2048xf32, #tpu.memory_space<vmem>>, vector<2x32xf32>
    tpu.vector_store %arg9[%c0_40, %c288], %38 {strides = array<i32>} : memref<2x2048xf32, #tpu.memory_space<vmem>>, vector<2x32xf32>,
    %c0_41 = arith.constant 0 : index
    %c10 = arith.constant 10 : index
    %c0_42 = arith.constant 0 : index
    %40 = vector.load %arg8[%c0_41, %c10, %c0_42] : memref<2x64x32xf32, #tpu.memory_space<vmem>>, vector<2x1x32xf32>
    %41 = vector.shape_cast %40 : vector<2x1x32xf32> to vector<2x32xf32>
    %c0_43 = arith.constant 0 : index
    %c320 = arith.constant 320 : index
    %42 = vector.load %arg9[%c0_43, %c320] : memref<2x2048xf32, #tpu.memory_space<vmem>>, vector<2x32xf32>
    tpu.vector_store %arg9[%c0_43, %c320], %41 {strides = array<i32>} : memref<2x2048xf32, #tpu.memory_space<vmem>>, vector<2x32xf32>,
    %c0_44 = arith.constant 0 : index
    %c11 = arith.constant 11 : index
    %c0_45 = arith.constant 0 : index
    %43 = vector.load %arg8[%c0_44, %c11, %c0_45] : memref<2x64x32xf32, #tpu.memory_space<vmem>>, vector<2x1x32xf32>
    %44 = vector.shape_cast %43 : vector<2x1x32xf32> to vector<2x32xf32>
    %c0_46 = arith.constant 0 : index
    %c352 = arith.constant 352 : index
    %45 = vector.load %arg9[%c0_46, %c352] : memref<2x2048xf32, #tpu.memory_space<vmem>>, vector<2x32xf32>
    tpu.vector_store %arg9[%c0_46, %c352], %44 {strides = array<i32>} : memref<2x2048xf32, #tpu.memory_space<vmem>>, vector<2x32xf32>,
    %c0_47 = arith.constant 0 : index
    %c12 = arith.constant 12 : index
    %c0_48 = arith.constant 0 : index
    %46 = vector.load %arg8[%c0_47, %c12, %c0_48] : memref<2x64x32xf32, #tpu.memory_space<vmem>>, vector<2x1x32xf32>
    %47 = vector.shape_cast %46 : vector<2x1x32xf32> to vector<2x32xf32>
    %c0_49 = arith.constant 0 : index
    %c384 = arith.constant 384 : index
    %48 = vector.load %arg9[%c0_49, %c384] : memref<2x2048xf32, #tpu.memory_space<vmem>>, vector<2x32xf32>
    tpu.vector_store %arg9[%c0_49, %c384], %47 {strides = array<i32>} : memref<2x2048xf32, #tpu.memory_space<vmem>>, vector<2x32xf32>,
    %c0_50 = arith.constant 0 : index
    %c13 = arith.constant 13 : index
    %c0_51 = arith.constant 0 : index
    %49 = vector.load %arg8[%c0_50, %c13, %c0_51] : memref<2x64x32xf32, #tpu.memory_space<vmem>>, vector<2x1x32xf32>
    %50 = vector.shape_cast %49 : vector<2x1x32xf32> to vector<2x32xf32>
    %c0_52 = arith.constant 0 : index
    %c416 = arith.constant 416 : index
    %51 = vector.load %arg9[%c0_52, %c416] : memref<2x2048xf32, #tpu.memory_space<vmem>>, vector<2x32xf32>
    tpu.vector_store %arg9[%c0_52, %c416], %50 {strides = array<i32>} : memref<2x2048xf32, #tpu.memory_space<vmem>>, vector<2x32xf32>,
    %c0_53 = arith.constant 0 : index
    %c14 = arith.constant 14 : index
    %c0_54 = arith.constant 0 : index
    %52 = vector.load %arg8[%c0_53, %c14, %c0_54] : memref<2x64x32xf32, #tpu.memory_space<vmem>>, vector<2x1x32xf32>
    %53 = vector.shape_cast %52 : vector<2x1x32xf32> to vector<2x32xf32>
    %c0_55 = arith.constant 0 : index
    %c448 = arith.constant 448 : index
    %54 = vector.load %arg9[%c0_55, %c448] : memref<2x2048xf32, #tpu.memory_space<vmem>>, vector<2x32xf32>
    tpu.vector_store %arg9[%c0_55, %c448], %53 {strides = array<i32>} : memref<2x2048xf32, #tpu.memory_space<vmem>>, vector<2x32xf32>,
    %c0_56 = arith.constant 0 : index
    %c15 = arith.constant 15 : index
    %c0_57 = arith.constant 0 : index
    %55 = vector.load %arg8[%c0_56, %c15, %c0_57] : memref<2x64x32xf32, #tpu.memory_space<vmem>>, vector<2x1x32xf32>
    %56 = vector.shape_cast %55 : vector<2x1x32xf32> to vector<2x32xf32>
    %c0_58 = arith.constant 0 : index
    %c480 = arith.constant 480 : index
    %57 = vector.load %arg9[%c0_58, %c480] : memref<2x2048xf32, #tpu.memory_space<vmem>>, vector<2x32xf32>
    tpu.vector_store %arg9[%c0_58, %c480], %56 {strides = array<i32>} : memref<2x2048xf32, #tpu.memory_space<vmem>>, vector<2x32xf32>,
    %c0_59 = arith.constant 0 : index
    %c16 = arith.constant 16 : index
    %c0_60 = arith.constant 0 : index
    %58 = vector.load %arg8[%c0_59, %c16, %c0_60] : memref<2x64x32xf32, #tpu.memory_space<vmem>>, vector<2x1x32xf32>
    %59 = vector.shape_cast %58 : vector<2x1x32xf32> to vector<2x32xf32>
    %c0_61 = arith.constant 0 : index
    %c512 = arith.constant 512 : index
    %60 = vector.load %arg9[%c0_61, %c512] : memref<2x2048xf32, #tpu.memory_space<vmem>>, vector<2x32xf32>
    tpu.vector_store %arg9[%c0_61, %c512], %59 {strides = array<i32>} : memref<2x2048xf32, #tpu.memory_space<vmem>>, vector<2x32xf32>,
    %c0_62 = arith.constant 0 : index
    %c17 = arith.constant 17 : index
    %c0_63 = arith.constant 0 : index
    %61 = vector.load %arg8[%c0_62, %c17, %c0_63] : memref<2x64x32xf32, #tpu.memory_space<vmem>>, vector<2x1x32xf32>
    %62 = vector.shape_cast %61 : vector<2x1x32xf32> to vector<2x32xf32>
    %c0_64 = arith.constant 0 : index
    %c544 = arith.constant 544 : index
    %63 = vector.load %arg9[%c0_64, %c544] : memref<2x2048xf32, #tpu.memory_space<vmem>>, vector<2x32xf32>
    tpu.vector_store %arg9[%c0_64, %c544], %62 {strides = array<i32>} : memref<2x2048xf32, #tpu.memory_space<vmem>>, vector<2x32xf32>,
    %c0_65 = arith.constant 0 : index
    %c18 = arith.constant 18 : index
    %c0_66 = arith.constant 0 : index
    %64 = vector.load %arg8[%c0_65, %c18, %c0_66] : memref<2x64x32xf32, #tpu.memory_space<vmem>>, vector<2x1x32xf32>
    %65 = vector.shape_cast %64 : vector<2x1x32xf32> to vector<2x32xf32>
    %c0_67 = arith.constant 0 : index
    %c576 = arith.constant 576 : index
    %66 = vector.load %arg9[%c0_67, %c576] : memref<2x2048xf32, #tpu.memory_space<vmem>>, vector<2x32xf32>
    tpu.vector_store %arg9[%c0_67, %c576], %65 {strides = array<i32>} : memref<2x2048xf32, #tpu.memory_space<vmem>>, vector<2x32xf32>,
    %c0_68 = arith.constant 0 : index
    %c19 = arith.constant 19 : index
    %c0_69 = arith.constant 0 : index
    %67 = vector.load %arg8[%c0_68, %c19, %c0_69] : memref<2x64x32xf32, #tpu.memory_space<vmem>>, vector<2x1x32xf32>
    %68 = vector.shape_cast %67 : vector<2x1x32xf32> to vector<2x32xf32>
    %c0_70 = arith.constant 0 : index
    %c608 = arith.constant 608 : index
    %69 = vector.load %arg9[%c0_70, %c608] : memref<2x2048xf32, #tpu.memory_space<vmem>>, vector<2x32xf32>
    tpu.vector_store %arg9[%c0_70, %c608], %68 {strides = array<i32>} : memref<2x2048xf32, #tpu.memory_space<vmem>>, vector<2x32xf32>,
    %c0_71 = arith.constant 0 : index
    %c20 = arith.constant 20 : index
    %c0_72 = arith.constant 0 : index
    %70 = vector.load %arg8[%c0_71, %c20, %c0_72] : memref<2x64x32xf32, #tpu.memory_space<vmem>>, vector<2x1x32xf32>
    %71 = vector.shape_cast %70 : vector<2x1x32xf32> to vector<2x32xf32>
    %c0_73 = arith.constant 0 : index
    %c640 = arith.constant 640 : index
    %72 = vector.load %arg9[%c0_73, %c640] : memref<2x2048xf32, #tpu.memory_space<vmem>>, vector<2x32xf32>
    tpu.vector_store %arg9[%c0_73, %c640], %71 {strides = array<i32>} : memref<2x2048xf32, #tpu.memory_space<vmem>>, vector<2x32xf32>,
    %c0_74 = arith.constant 0 : index
    %c21 = arith.constant 21 : index
    %c0_75 = arith.constant 0 : index
    %73 = vector.load %arg8[%c0_74, %c21, %c0_75] : memref<2x64x32xf32, #tpu.memory_space<vmem>>, vector<2x1x32xf32>
    %74 = vector.shape_cast %73 : vector<2x1x32xf32> to vector<2x32xf32>
    %c0_76 = arith.constant 0 : index
    %c672 = arith.constant 672 : index
    %75 = vector.load %arg9[%c0_76, %c672] : memref<2x2048xf32, #tpu.memory_space<vmem>>, vector<2x32xf32>
    tpu.vector_store %arg9[%c0_76, %c672], %74 {strides = array<i32>} : memref<2x2048xf32, #tpu.memory_space<vmem>>, vector<2x32xf32>,
    %c0_77 = arith.constant 0 : index
    %c22 = arith.constant 22 : index
    %c0_78 = arith.constant 0 : index
    %76 = vector.load %arg8[%c0_77, %c22, %c0_78] : memref<2x64x32xf32, #tpu.memory_space<vmem>>, vector<2x1x32xf32>
    %77 = vector.shape_cast %76 : vector<2x1x32xf32> to vector<2x32xf32>
    %c0_79 = arith.constant 0 : index
    %c704 = arith.constant 704 : index
    %78 = vector.load %arg9[%c0_79, %c704] : memref<2x2048xf32, #tpu.memory_space<vmem>>, vector<2x32xf32>
    tpu.vector_store %arg9[%c0_79, %c704], %77 {strides = array<i32>} : memref<2x2048xf32, #tpu.memory_space<vmem>>, vector<2x32xf32>,
    %c0_80 = arith.constant 0 : index
    %c23 = arith.constant 23 : index
    %c0_81 = arith.constant 0 : index
    %79 = vector.load %arg8[%c0_80, %c23, %c0_81] : memref<2x64x32xf32, #tpu.memory_space<vmem>>, vector<2x1x32xf32>
    %80 = vector.shape_cast %79 : vector<2x1x32xf32> to vector<2x32xf32>
    %c0_82 = arith.constant 0 : index
    %c736 = arith.constant 736 : index
    %81 = vector.load %arg9[%c0_82, %c736] : memref<2x2048xf32, #tpu.memory_space<vmem>>, vector<2x32xf32>
    tpu.vector_store %arg9[%c0_82, %c736], %80 {strides = array<i32>} : memref<2x2048xf32, #tpu.memory_space<vmem>>, vector<2x32xf32>,
    %c0_83 = arith.constant 0 : index
    %c24 = arith.constant 24 : index
    %c0_84 = arith.constant 0 : index
    %82 = vector.load %arg8[%c0_83, %c24, %c0_84] : memref<2x64x32xf32, #tpu.memory_space<vmem>>, vector<2x1x32xf32>
    %83 = vector.shape_cast %82 : vector<2x1x32xf32> to vector<2x32xf32>
    %c0_85 = arith.constant 0 : index
    %c768 = arith.constant 768 : index
    %84 = vector.load %arg9[%c0_85, %c768] : memref<2x2048xf32, #tpu.memory_space<vmem>>, vector<2x32xf32>
    tpu.vector_store %arg9[%c0_85, %c768], %83 {strides = array<i32>} : memref<2x2048xf32, #tpu.memory_space<vmem>>, vector<2x32xf32>,
    %c0_86 = arith.constant 0 : index
    %c25 = arith.constant 25 : index
    %c0_87 = arith.constant 0 : index
    %85 = vector.load %arg8[%c0_86, %c25, %c0_87] : memref<2x64x32xf32, #tpu.memory_space<vmem>>, vector<2x1x32xf32>
    %86 = vector.shape_cast %85 : vector<2x1x32xf32> to vector<2x32xf32>
    %c0_88 = arith.constant 0 : index
    %c800 = arith.constant 800 : index
    %87 = vector.load %arg9[%c0_88, %c800] : memref<2x2048xf32, #tpu.memory_space<vmem>>, vector<2x32xf32>
    tpu.vector_store %arg9[%c0_88, %c800], %86 {strides = array<i32>} : memref<2x2048xf32, #tpu.memory_space<vmem>>, vector<2x32xf32>,
    %c0_89 = arith.constant 0 : index
    %c26 = arith.constant 26 : index
    %c0_90 = arith.constant 0 : index
    %88 = vector.load %arg8[%c0_89, %c26, %c0_90] : memref<2x64x32xf32, #tpu.memory_space<vmem>>, vector<2x1x32xf32>
    %89 = vector.shape_cast %88 : vector<2x1x32xf32> to vector<2x32xf32>
    %c0_91 = arith.constant 0 : index
    %c832 = arith.constant 832 : index
    %90 = vector.load %arg9[%c0_91, %c832] : memref<2x2048xf32, #tpu.memory_space<vmem>>, vector<2x32xf32>
    tpu.vector_store %arg9[%c0_91, %c832], %89 {strides = array<i32>} : memref<2x2048xf32, #tpu.memory_space<vmem>>, vector<2x32xf32>,
    %c0_92 = arith.constant 0 : index
    %c27 = arith.constant 27 : index
    %c0_93 = arith.constant 0 : index
    %91 = vector.load %arg8[%c0_92, %c27, %c0_93] : memref<2x64x32xf32, #tpu.memory_space<vmem>>, vector<2x1x32xf32>
    %92 = vector.shape_cast %91 : vector<2x1x32xf32> to vector<2x32xf32>
    %c0_94 = arith.constant 0 : index
    %c864 = arith.constant 864 : index
    %93 = vector.load %arg9[%c0_94, %c864] : memref<2x2048xf32, #tpu.memory_space<vmem>>, vector<2x32xf32>
    tpu.vector_store %arg9[%c0_94, %c864], %92 {strides = array<i32>} : memref<2x2048xf32, #tpu.memory_space<vmem>>, vector<2x32xf32>,
    %c0_95 = arith.constant 0 : index
    %c28 = arith.constant 28 : index
    %c0_96 = arith.constant 0 : index
    %94 = vector.load %arg8[%c0_95, %c28, %c0_96] : memref<2x64x32xf32, #tpu.memory_space<vmem>>, vector<2x1x32xf32>
    %95 = vector.shape_cast %94 : vector<2x1x32xf32> to vector<2x32xf32>
    %c0_97 = arith.constant 0 : index
    %c896 = arith.constant 896 : index
    %96 = vector.load %arg9[%c0_97, %c896] : memref<2x2048xf32, #tpu.memory_space<vmem>>, vector<2x32xf32>
    tpu.vector_store %arg9[%c0_97, %c896], %95 {strides = array<i32>} : memref<2x2048xf32, #tpu.memory_space<vmem>>, vector<2x32xf32>,
    %c0_98 = arith.constant 0 : index
    %c29 = arith.constant 29 : index
    %c0_99 = arith.constant 0 : index
    %97 = vector.load %arg8[%c0_98, %c29, %c0_99] : memref<2x64x32xf32, #tpu.memory_space<vmem>>, vector<2x1x32xf32>
    %98 = vector.shape_cast %97 : vector<2x1x32xf32> to vector<2x32xf32>
    %c0_100 = arith.constant 0 : index
    %c928 = arith.constant 928 : index
    %99 = vector.load %arg9[%c0_100, %c928] : memref<2x2048xf32, #tpu.memory_space<vmem>>, vector<2x32xf32>
    tpu.vector_store %arg9[%c0_100, %c928], %98 {strides = array<i32>} : memref<2x2048xf32, #tpu.memory_space<vmem>>, vector<2x32xf32>,
    %c0_101 = arith.constant 0 : index
    %c30 = arith.constant 30 : index
    %c0_102 = arith.constant 0 : index
    %100 = vector.load %arg8[%c0_101, %c30, %c0_102] : memref<2x64x32xf32, #tpu.memory_space<vmem>>, vector<2x1x32xf32>
    %101 = vector.shape_cast %100 : vector<2x1x32xf32> to vector<2x32xf32>
    %c0_103 = arith.constant 0 : index
    %c960 = arith.constant 960 : index
    %102 = vector.load %arg9[%c0_103, %c960] : memref<2x2048xf32, #tpu.memory_space<vmem>>, vector<2x32xf32>
    tpu.vector_store %arg9[%c0_103, %c960], %101 {strides = array<i32>} : memref<2x2048xf32, #tpu.memory_space<vmem>>, vector<2x32xf32>,
    %c0_104 = arith.constant 0 : index
    %c31 = arith.constant 31 : index
    %c0_105 = arith.constant 0 : index
    %103 = vector.load %arg8[%c0_104, %c31, %c0_105] : memref<2x64x32xf32, #tpu.memory_space<vmem>>, vector<2x1x32xf32>
    %104 = vector.shape_cast %103 : vector<2x1x32xf32> to vector<2x32xf32>
    %c0_106 = arith.constant 0 : index
    %c992 = arith.constant 992 : index
    %105 = vector.load %arg9[%c0_106, %c992] : memref<2x2048xf32, #tpu.memory_space<vmem>>, vector<2x32xf32>
    tpu.vector_store %arg9[%c0_106, %c992], %104 {strides = array<i32>} : memref<2x2048xf32, #tpu.memory_space<vmem>>, vector<2x32xf32>,
    %c0_107 = arith.constant 0 : index
    %c32_108 = arith.constant 32 : index
    %c0_109 = arith.constant 0 : index
    %106 = vector.load %arg8[%c0_107, %c32_108, %c0_109] : memref<2x64x32xf32, #tpu.memory_space<vmem>>, vector<2x1x32xf32>
    %107 = vector.shape_cast %106 : vector<2x1x32xf32> to vector<2x32xf32>
    %c0_110 = arith.constant 0 : index
    %c1024 = arith.constant 1024 : index
    %108 = vector.load %arg9[%c0_110, %c1024] : memref<2x2048xf32, #tpu.memory_space<vmem>>, vector<2x32xf32>
    tpu.vector_store %arg9[%c0_110, %c1024], %107 {strides = array<i32>} : memref<2x2048xf32, #tpu.memory_space<vmem>>, vector<2x32xf32>,
    %c0_111 = arith.constant 0 : index
    %c33 = arith.constant 33 : index
    %c0_112 = arith.constant 0 : index
    %109 = vector.load %arg8[%c0_111, %c33, %c0_112] : memref<2x64x32xf32, #tpu.memory_space<vmem>>, vector<2x1x32xf32>
    %110 = vector.shape_cast %109 : vector<2x1x32xf32> to vector<2x32xf32>
    %c0_113 = arith.constant 0 : index
    %c1056 = arith.constant 1056 : index
    %111 = vector.load %arg9[%c0_113, %c1056] : memref<2x2048xf32, #tpu.memory_space<vmem>>, vector<2x32xf32>
    tpu.vector_store %arg9[%c0_113, %c1056], %110 {strides = array<i32>} : memref<2x2048xf32, #tpu.memory_space<vmem>>, vector<2x32xf32>,
    %c0_114 = arith.constant 0 : index
    %c34 = arith.constant 34 : index
    %c0_115 = arith.constant 0 : index
    %112 = vector.load %arg8[%c0_114, %c34, %c0_115] : memref<2x64x32xf32, #tpu.memory_space<vmem>>, vector<2x1x32xf32>
    %113 = vector.shape_cast %112 : vector<2x1x32xf32> to vector<2x32xf32>
    %c0_116 = arith.constant 0 : index
    %c1088 = arith.constant 1088 : index
    %114 = vector.load %arg9[%c0_116, %c1088] : memref<2x2048xf32, #tpu.memory_space<vmem>>, vector<2x32xf32>
    tpu.vector_store %arg9[%c0_116, %c1088], %113 {strides = array<i32>} : memref<2x2048xf32, #tpu.memory_space<vmem>>, vector<2x32xf32>,
    %c0_117 = arith.constant 0 : index
    %c35 = arith.constant 35 : index
    %c0_118 = arith.constant 0 : index
    %115 = vector.load %arg8[%c0_117, %c35, %c0_118] : memref<2x64x32xf32, #tpu.memory_space<vmem>>, vector<2x1x32xf32>
    %116 = vector.shape_cast %115 : vector<2x1x32xf32> to vector<2x32xf32>
    %c0_119 = arith.constant 0 : index
    %c1120 = arith.constant 1120 : index
    %117 = vector.load %arg9[%c0_119, %c1120] : memref<2x2048xf32, #tpu.memory_space<vmem>>, vector<2x32xf32>
    tpu.vector_store %arg9[%c0_119, %c1120], %116 {strides = array<i32>} : memref<2x2048xf32, #tpu.memory_space<vmem>>, vector<2x32xf32>,
    %c0_120 = arith.constant 0 : index
    %c36 = arith.constant 36 : index
    %c0_121 = arith.constant 0 : index
    %118 = vector.load %arg8[%c0_120, %c36, %c0_121] : memref<2x64x32xf32, #tpu.memory_space<vmem>>, vector<2x1x32xf32>
    %119 = vector.shape_cast %118 : vector<2x1x32xf32> to vector<2x32xf32>
    %c0_122 = arith.constant 0 : index
    %c1152 = arith.constant 1152 : index
    %120 = vector.load %arg9[%c0_122, %c1152] : memref<2x2048xf32, #tpu.memory_space<vmem>>, vector<2x32xf32>
    tpu.vector_store %arg9[%c0_122, %c1152], %119 {strides = array<i32>} : memref<2x2048xf32, #tpu.memory_space<vmem>>, vector<2x32xf32>,
    %c0_123 = arith.constant 0 : index
    %c37 = arith.constant 37 : index
    %c0_124 = arith.constant 0 : index
    %121 = vector.load %arg8[%c0_123, %c37, %c0_124] : memref<2x64x32xf32, #tpu.memory_space<vmem>>, vector<2x1x32xf32>
    %122 = vector.shape_cast %121 : vector<2x1x32xf32> to vector<2x32xf32>
    %c0_125 = arith.constant 0 : index
    %c1184 = arith.constant 1184 : index
    %123 = vector.load %arg9[%c0_125, %c1184] : memref<2x2048xf32, #tpu.memory_space<vmem>>, vector<2x32xf32>
    tpu.vector_store %arg9[%c0_125, %c1184], %122 {strides = array<i32>} : memref<2x2048xf32, #tpu.memory_space<vmem>>, vector<2x32xf32>,
    %c0_126 = arith.constant 0 : index
    %c38 = arith.constant 38 : index
    %c0_127 = arith.constant 0 : index
    %124 = vector.load %arg8[%c0_126, %c38, %c0_127] : memref<2x64x32xf32, #tpu.memory_space<vmem>>, vector<2x1x32xf32>
    %125 = vector.shape_cast %124 : vector<2x1x32xf32> to vector<2x32xf32>
    %c0_128 = arith.constant 0 : index
    %c1216 = arith.constant 1216 : index
    %126 = vector.load %arg9[%c0_128, %c1216] : memref<2x2048xf32, #tpu.memory_space<vmem>>, vector<2x32xf32>
    tpu.vector_store %arg9[%c0_128, %c1216], %125 {strides = array<i32>} : memref<2x2048xf32, #tpu.memory_space<vmem>>, vector<2x32xf32>,
    %c0_129 = arith.constant 0 : index
    %c39 = arith.constant 39 : index
    %c0_130 = arith.constant 0 : index
    %127 = vector.load %arg8[%c0_129, %c39, %c0_130] : memref<2x64x32xf32, #tpu.memory_space<vmem>>, vector<2x1x32xf32>
    %128 = vector.shape_cast %127 : vector<2x1x32xf32> to vector<2x32xf32>
    %c0_131 = arith.constant 0 : index
    %c1248 = arith.constant 1248 : index
    %129 = vector.load %arg9[%c0_131, %c1248] : memref<2x2048xf32, #tpu.memory_space<vmem>>, vector<2x32xf32>
    tpu.vector_store %arg9[%c0_131, %c1248], %128 {strides = array<i32>} : memref<2x2048xf32, #tpu.memory_space<vmem>>, vector<2x32xf32>,
    %c0_132 = arith.constant 0 : index
    %c40 = arith.constant 40 : index
    %c0_133 = arith.constant 0 : index
    %130 = vector.load %arg8[%c0_132, %c40, %c0_133] : memref<2x64x32xf32, #tpu.memory_space<vmem>>, vector<2x1x32xf32>
    %131 = vector.shape_cast %130 : vector<2x1x32xf32> to vector<2x32xf32>
    %c0_134 = arith.constant 0 : index
    %c1280 = arith.constant 1280 : index
    %132 = vector.load %arg9[%c0_134, %c1280] : memref<2x2048xf32, #tpu.memory_space<vmem>>, vector<2x32xf32>
    tpu.vector_store %arg9[%c0_134, %c1280], %131 {strides = array<i32>} : memref<2x2048xf32, #tpu.memory_space<vmem>>, vector<2x32xf32>,
    %c0_135 = arith.constant 0 : index
    %c41 = arith.constant 41 : index
    %c0_136 = arith.constant 0 : index
    %133 = vector.load %arg8[%c0_135, %c41, %c0_136] : memref<2x64x32xf32, #tpu.memory_space<vmem>>, vector<2x1x32xf32>
    %134 = vector.shape_cast %133 : vector<2x1x32xf32> to vector<2x32xf32>
    %c0_137 = arith.constant 0 : index
    %c1312 = arith.constant 1312 : index
    %135 = vector.load %arg9[%c0_137, %c1312] : memref<2x2048xf32, #tpu.memory_space<vmem>>, vector<2x32xf32>
    tpu.vector_store %arg9[%c0_137, %c1312], %134 {strides = array<i32>} : memref<2x2048xf32, #tpu.memory_space<vmem>>, vector<2x32xf32>,
    %c0_138 = arith.constant 0 : index
    %c42 = arith.constant 42 : index
    %c0_139 = arith.constant 0 : index
    %136 = vector.load %arg8[%c0_138, %c42, %c0_139] : memref<2x64x32xf32, #tpu.memory_space<vmem>>, vector<2x1x32xf32>
    %137 = vector.shape_cast %136 : vector<2x1x32xf32> to vector<2x32xf32>
    %c0_140 = arith.constant 0 : index
    %c1344 = arith.constant 1344 : index
    %138 = vector.load %arg9[%c0_140, %c1344] : memref<2x2048xf32, #tpu.memory_space<vmem>>, vector<2x32xf32>
    tpu.vector_store %arg9[%c0_140, %c1344], %137 {strides = array<i32>} : memref<2x2048xf32, #tpu.memory_space<vmem>>, vector<2x32xf32>,
    %c0_141 = arith.constant 0 : index
    %c43 = arith.constant 43 : index
    %c0_142 = arith.constant 0 : index
    %139 = vector.load %arg8[%c0_141, %c43, %c0_142] : memref<2x64x32xf32, #tpu.memory_space<vmem>>, vector<2x1x32xf32>
    %140 = vector.shape_cast %139 : vector<2x1x32xf32> to vector<2x32xf32>
    %c0_143 = arith.constant 0 : index
    %c1376 = arith.constant 1376 : index
    %141 = vector.load %arg9[%c0_143, %c1376] : memref<2x2048xf32, #tpu.memory_space<vmem>>, vector<2x32xf32>
    tpu.vector_store %arg9[%c0_143, %c1376], %140 {strides = array<i32>} : memref<2x2048xf32, #tpu.memory_space<vmem>>, vector<2x32xf32>,
    %c0_144 = arith.constant 0 : index
    %c44 = arith.constant 44 : index
    %c0_145 = arith.constant 0 : index
    %142 = vector.load %arg8[%c0_144, %c44, %c0_145] : memref<2x64x32xf32, #tpu.memory_space<vmem>>, vector<2x1x32xf32>
    %143 = vector.shape_cast %142 : vector<2x1x32xf32> to vector<2x32xf32>
    %c0_146 = arith.constant 0 : index
    %c1408 = arith.constant 1408 : index
    %144 = vector.load %arg9[%c0_146, %c1408] : memref<2x2048xf32, #tpu.memory_space<vmem>>, vector<2x32xf32>
    tpu.vector_store %arg9[%c0_146, %c1408], %143 {strides = array<i32>} : memref<2x2048xf32, #tpu.memory_space<vmem>>, vector<2x32xf32>,
    %c0_147 = arith.constant 0 : index
    %c45 = arith.constant 45 : index
    %c0_148 = arith.constant 0 : index
    %145 = vector.load %arg8[%c0_147, %c45, %c0_148] : memref<2x64x32xf32, #tpu.memory_space<vmem>>, vector<2x1x32xf32>
    %146 = vector.shape_cast %145 : vector<2x1x32xf32> to vector<2x32xf32>
    %c0_149 = arith.constant 0 : index
    %c1440 = arith.constant 1440 : index
    %147 = vector.load %arg9[%c0_149, %c1440] : memref<2x2048xf32, #tpu.memory_space<vmem>>, vector<2x32xf32>
    tpu.vector_store %arg9[%c0_149, %c1440], %146 {strides = array<i32>} : memref<2x2048xf32, #tpu.memory_space<vmem>>, vector<2x32xf32>,
    %c0_150 = arith.constant 0 : index
    %c46 = arith.constant 46 : index
    %c0_151 = arith.constant 0 : index
    %148 = vector.load %arg8[%c0_150, %c46, %c0_151] : memref<2x64x32xf32, #tpu.memory_space<vmem>>, vector<2x1x32xf32>
    %149 = vector.shape_cast %148 : vector<2x1x32xf32> to vector<2x32xf32>
    %c0_152 = arith.constant 0 : index
    %c1472 = arith.constant 1472 : index
    %150 = vector.load %arg9[%c0_152, %c1472] : memref<2x2048xf32, #tpu.memory_space<vmem>>, vector<2x32xf32>
    tpu.vector_store %arg9[%c0_152, %c1472], %149 {strides = array<i32>} : memref<2x2048xf32, #tpu.memory_space<vmem>>, vector<2x32xf32>,
    %c0_153 = arith.constant 0 : index
    %c47 = arith.constant 47 : index
    %c0_154 = arith.constant 0 : index
    %151 = vector.load %arg8[%c0_153, %c47, %c0_154] : memref<2x64x32xf32, #tpu.memory_space<vmem>>, vector<2x1x32xf32>
    %152 = vector.shape_cast %151 : vector<2x1x32xf32> to vector<2x32xf32>
    %c0_155 = arith.constant 0 : index
    %c1504 = arith.constant 1504 : index
    %153 = vector.load %arg9[%c0_155, %c1504] : memref<2x2048xf32, #tpu.memory_space<vmem>>, vector<2x32xf32>
    tpu.vector_store %arg9[%c0_155, %c1504], %152 {strides = array<i32>} : memref<2x2048xf32, #tpu.memory_space<vmem>>, vector<2x32xf32>,
    %c0_156 = arith.constant 0 : index
    %c48 = arith.constant 48 : index
    %c0_157 = arith.constant 0 : index
    %154 = vector.load %arg8[%c0_156, %c48, %c0_157] : memref<2x64x32xf32, #tpu.memory_space<vmem>>, vector<2x1x32xf32>
    %155 = vector.shape_cast %154 : vector<2x1x32xf32> to vector<2x32xf32>
    %c0_158 = arith.constant 0 : index
    %c1536 = arith.constant 1536 : index
    %156 = vector.load %arg9[%c0_158, %c1536] : memref<2x2048xf32, #tpu.memory_space<vmem>>, vector<2x32xf32>
    tpu.vector_store %arg9[%c0_158, %c1536], %155 {strides = array<i32>} : memref<2x2048xf32, #tpu.memory_space<vmem>>, vector<2x32xf32>,
    %c0_159 = arith.constant 0 : index
    %c49 = arith.constant 49 : index
    %c0_160 = arith.constant 0 : index
    %157 = vector.load %arg8[%c0_159, %c49, %c0_160] : memref<2x64x32xf32, #tpu.memory_space<vmem>>, vector<2x1x32xf32>
    %158 = vector.shape_cast %157 : vector<2x1x32xf32> to vector<2x32xf32>
    %c0_161 = arith.constant 0 : index
    %c1568 = arith.constant 1568 : index
    %159 = vector.load %arg9[%c0_161, %c1568] : memref<2x2048xf32, #tpu.memory_space<vmem>>, vector<2x32xf32>
    tpu.vector_store %arg9[%c0_161, %c1568], %158 {strides = array<i32>} : memref<2x2048xf32, #tpu.memory_space<vmem>>, vector<2x32xf32>,
    %c0_162 = arith.constant 0 : index
    %c50 = arith.constant 50 : index
    %c0_163 = arith.constant 0 : index
    %160 = vector.load %arg8[%c0_162, %c50, %c0_163] : memref<2x64x32xf32, #tpu.memory_space<vmem>>, vector<2x1x32xf32>
    %161 = vector.shape_cast %160 : vector<2x1x32xf32> to vector<2x32xf32>
    %c0_164 = arith.constant 0 : index
    %c1600 = arith.constant 1600 : index
    %162 = vector.load %arg9[%c0_164, %c1600] : memref<2x2048xf32, #tpu.memory_space<vmem>>, vector<2x32xf32>
    tpu.vector_store %arg9[%c0_164, %c1600], %161 {strides = array<i32>} : memref<2x2048xf32, #tpu.memory_space<vmem>>, vector<2x32xf32>,
    %c0_165 = arith.constant 0 : index
    %c51 = arith.constant 51 : index
    %c0_166 = arith.constant 0 : index
    %163 = vector.load %arg8[%c0_165, %c51, %c0_166] : memref<2x64x32xf32, #tpu.memory_space<vmem>>, vector<2x1x32xf32>
    %164 = vector.shape_cast %163 : vector<2x1x32xf32> to vector<2x32xf32>
    %c0_167 = arith.constant 0 : index
    %c1632 = arith.constant 1632 : index
    %165 = vector.load %arg9[%c0_167, %c1632] : memref<2x2048xf32, #tpu.memory_space<vmem>>, vector<2x32xf32>
    tpu.vector_store %arg9[%c0_167, %c1632], %164 {strides = array<i32>} : memref<2x2048xf32, #tpu.memory_space<vmem>>, vector<2x32xf32>,
    %c0_168 = arith.constant 0 : index
    %c52 = arith.constant 52 : index
    %c0_169 = arith.constant 0 : index
    %166 = vector.load %arg8[%c0_168, %c52, %c0_169] : memref<2x64x32xf32, #tpu.memory_space<vmem>>, vector<2x1x32xf32>
    %167 = vector.shape_cast %166 : vector<2x1x32xf32> to vector<2x32xf32>
    %c0_170 = arith.constant 0 : index
    %c1664 = arith.constant 1664 : index
    %168 = vector.load %arg9[%c0_170, %c1664] : memref<2x2048xf32, #tpu.memory_space<vmem>>, vector<2x32xf32>
    tpu.vector_store %arg9[%c0_170, %c1664], %167 {strides = array<i32>} : memref<2x2048xf32, #tpu.memory_space<vmem>>, vector<2x32xf32>,
    %c0_171 = arith.constant 0 : index
    %c53 = arith.constant 53 : index
    %c0_172 = arith.constant 0 : index
    %169 = vector.load %arg8[%c0_171, %c53, %c0_172] : memref<2x64x32xf32, #tpu.memory_space<vmem>>, vector<2x1x32xf32>
    %170 = vector.shape_cast %169 : vector<2x1x32xf32> to vector<2x32xf32>
    %c0_173 = arith.constant 0 : index
    %c1696 = arith.constant 1696 : index
    %171 = vector.load %arg9[%c0_173, %c1696] : memref<2x2048xf32, #tpu.memory_space<vmem>>, vector<2x32xf32>
    tpu.vector_store %arg9[%c0_173, %c1696], %170 {strides = array<i32>} : memref<2x2048xf32, #tpu.memory_space<vmem>>, vector<2x32xf32>,
    %c0_174 = arith.constant 0 : index
    %c54 = arith.constant 54 : index
    %c0_175 = arith.constant 0 : index
    %172 = vector.load %arg8[%c0_174, %c54, %c0_175] : memref<2x64x32xf32, #tpu.memory_space<vmem>>, vector<2x1x32xf32>
    %173 = vector.shape_cast %172 : vector<2x1x32xf32> to vector<2x32xf32>
    %c0_176 = arith.constant 0 : index
    %c1728 = arith.constant 1728 : index
    %174 = vector.load %arg9[%c0_176, %c1728] : memref<2x2048xf32, #tpu.memory_space<vmem>>, vector<2x32xf32>
    tpu.vector_store %arg9[%c0_176, %c1728], %173 {strides = array<i32>} : memref<2x2048xf32, #tpu.memory_space<vmem>>, vector<2x32xf32>,
    %c0_177 = arith.constant 0 : index
    %c55 = arith.constant 55 : index
    %c0_178 = arith.constant 0 : index
    %175 = vector.load %arg8[%c0_177, %c55, %c0_178] : memref<2x64x32xf32, #tpu.memory_space<vmem>>, vector<2x1x32xf32>
    %176 = vector.shape_cast %175 : vector<2x1x32xf32> to vector<2x32xf32>
    %c0_179 = arith.constant 0 : index
    %c1760 = arith.constant 1760 : index
    %177 = vector.load %arg9[%c0_179, %c1760] : memref<2x2048xf32, #tpu.memory_space<vmem>>, vector<2x32xf32>
    tpu.vector_store %arg9[%c0_179, %c1760], %176 {strides = array<i32>} : memref<2x2048xf32, #tpu.memory_space<vmem>>, vector<2x32xf32>,
    %c0_180 = arith.constant 0 : index
    %c56 = arith.constant 56 : index
    %c0_181 = arith.constant 0 : index
    %178 = vector.load %arg8[%c0_180, %c56, %c0_181] : memref<2x64x32xf32, #tpu.memory_space<vmem>>, vector<2x1x32xf32>
    %179 = vector.shape_cast %178 : vector<2x1x32xf32> to vector<2x32xf32>
    %c0_182 = arith.constant 0 : index
    %c1792 = arith.constant 1792 : index
    %180 = vector.load %arg9[%c0_182, %c1792] : memref<2x2048xf32, #tpu.memory_space<vmem>>, vector<2x32xf32>
    tpu.vector_store %arg9[%c0_182, %c1792], %179 {strides = array<i32>} : memref<2x2048xf32, #tpu.memory_space<vmem>>, vector<2x32xf32>,
    %c0_183 = arith.constant 0 : index
    %c57 = arith.constant 57 : index
    %c0_184 = arith.constant 0 : index
    %181 = vector.load %arg8[%c0_183, %c57, %c0_184] : memref<2x64x32xf32, #tpu.memory_space<vmem>>, vector<2x1x32xf32>
    %182 = vector.shape_cast %181 : vector<2x1x32xf32> to vector<2x32xf32>
    %c0_185 = arith.constant 0 : index
    %c1824 = arith.constant 1824 : index
    %183 = vector.load %arg9[%c0_185, %c1824] : memref<2x2048xf32, #tpu.memory_space<vmem>>, vector<2x32xf32>
    tpu.vector_store %arg9[%c0_185, %c1824], %182 {strides = array<i32>} : memref<2x2048xf32, #tpu.memory_space<vmem>>, vector<2x32xf32>,
    %c0_186 = arith.constant 0 : index
    %c58 = arith.constant 58 : index
    %c0_187 = arith.constant 0 : index
    %184 = vector.load %arg8[%c0_186, %c58, %c0_187] : memref<2x64x32xf32, #tpu.memory_space<vmem>>, vector<2x1x32xf32>
    %185 = vector.shape_cast %184 : vector<2x1x32xf32> to vector<2x32xf32>
    %c0_188 = arith.constant 0 : index
    %c1856 = arith.constant 1856 : index
    %186 = vector.load %arg9[%c0_188, %c1856] : memref<2x2048xf32, #tpu.memory_space<vmem>>, vector<2x32xf32>
    tpu.vector_store %arg9[%c0_188, %c1856], %185 {strides = array<i32>} : memref<2x2048xf32, #tpu.memory_space<vmem>>, vector<2x32xf32>,
    %c0_189 = arith.constant 0 : index
    %c59 = arith.constant 59 : index
    %c0_190 = arith.constant 0 : index
    %187 = vector.load %arg8[%c0_189, %c59, %c0_190] : memref<2x64x32xf32, #tpu.memory_space<vmem>>, vector<2x1x32xf32>
    %188 = vector.shape_cast %187 : vector<2x1x32xf32> to vector<2x32xf32>
    %c0_191 = arith.constant 0 : index
    %c1888 = arith.constant 1888 : index
    %189 = vector.load %arg9[%c0_191, %c1888] : memref<2x2048xf32, #tpu.memory_space<vmem>>, vector<2x32xf32>
    tpu.vector_store %arg9[%c0_191, %c1888], %188 {strides = array<i32>} : memref<2x2048xf32, #tpu.memory_space<vmem>>, vector<2x32xf32>,
    %c0_192 = arith.constant 0 : index
    %c60 = arith.constant 60 : index
    %c0_193 = arith.constant 0 : index
    %190 = vector.load %arg8[%c0_192, %c60, %c0_193] : memref<2x64x32xf32, #tpu.memory_space<vmem>>, vector<2x1x32xf32>
    %191 = vector.shape_cast %190 : vector<2x1x32xf32> to vector<2x32xf32>
    %c0_194 = arith.constant 0 : index
    %c1920 = arith.constant 1920 : index
    %192 = vector.load %arg9[%c0_194, %c1920] : memref<2x2048xf32, #tpu.memory_space<vmem>>, vector<2x32xf32>
    tpu.vector_store %arg9[%c0_194, %c1920], %191 {strides = array<i32>} : memref<2x2048xf32, #tpu.memory_space<vmem>>, vector<2x32xf32>,
    %c0_195 = arith.constant 0 : index
    %c61 = arith.constant 61 : index
    %c0_196 = arith.constant 0 : index
    %193 = vector.load %arg8[%c0_195, %c61, %c0_196] : memref<2x64x32xf32, #tpu.memory_space<vmem>>, vector<2x1x32xf32>
    %194 = vector.shape_cast %193 : vector<2x1x32xf32> to vector<2x32xf32>
    %c0_197 = arith.constant 0 : index
    %c1952 = arith.constant 1952 : index
    %195 = vector.load %arg9[%c0_197, %c1952] : memref<2x2048xf32, #tpu.memory_space<vmem>>, vector<2x32xf32>
    tpu.vector_store %arg9[%c0_197, %c1952], %194 {strides = array<i32>} : memref<2x2048xf32, #tpu.memory_space<vmem>>, vector<2x32xf32>,
    %c0_198 = arith.constant 0 : index
    %c62 = arith.constant 62 : index
    %c0_199 = arith.constant 0 : index
    %196 = vector.load %arg8[%c0_198, %c62, %c0_199] : memref<2x64x32xf32, #tpu.memory_space<vmem>>, vector<2x1x32xf32>
    %197 = vector.shape_cast %196 : vector<2x1x32xf32> to vector<2x32xf32>
    %c0_200 = arith.constant 0 : index
    %c1984 = arith.constant 1984 : index
    %198 = vector.load %arg9[%c0_200, %c1984] : memref<2x2048xf32, #tpu.memory_space<vmem>>, vector<2x32xf32>
    tpu.vector_store %arg9[%c0_200, %c1984], %197 {strides = array<i32>} : memref<2x2048xf32, #tpu.memory_space<vmem>>, vector<2x32xf32>,
    %c0_201 = arith.constant 0 : index
    %c63 = arith.constant 63 : index
    %c0_202 = arith.constant 0 : index
    %199 = vector.load %arg8[%c0_201, %c63, %c0_202] : memref<2x64x32xf32, #tpu.memory_space<vmem>>, vector<2x1x32xf32>
    %200 = vector.shape_cast %199 : vector<2x1x32xf32> to vector<2x32xf32>
    %c0_203 = arith.constant 0 : index
    %c2016 = arith.constant 2016 : index
    %201 = vector.load %arg9[%c0_203, %c2016] : memref<2x2048xf32, #tpu.memory_space<vmem>>, vector<2x32xf32>
    tpu.vector_store %arg9[%c0_203, %c2016], %200 {strides = array<i32>} : memref<2x2048xf32, #tpu.memory_space<vmem>>, vector<2x32xf32>,
    %c0_204 = arith.constant 0 : index
    %c0_205 = arith.constant 0 : index
    %202 = vector.load %arg9[%c0_204, %c0_205] : memref<2x2048xf32, #tpu.memory_space<vmem>>, vector<2x2048xf32>
    %c0_206 = arith.constant 0 : index
    %c0_207 = arith.constant 0 : index
    %203 = vector.load %arg3[%c0_206, %c0_207] : memref<2048x128xf32, #tpu.memory_space<vmem>>, vector<2048x128xf32>
    %cst_208 = arith.constant dense<0.000000e+00> : vector<2x128xf32>
    %204 = tpu.matmul %202, %203, %cst_208 {dimension_numbers = #tpu.dot_dimension_numbers<[1], [0], [0], [1], [0, 0, 1, 1], [], []>} : vector<2x2048xf32>, vector<2048x128xf32>, vector<2x128xf32> -> vector<2x128xf32>
    %c0_209 = arith.constant 0 : index
    %c0_210 = arith.constant 0 : index
    %205 = vector.load %arg4[%c0_209, %c0_210] : memref<1x128xf32, #tpu.memory_space<vmem>>, vector<1x128xf32>
    %206 = vector.broadcast %205 : vector<1x128xf32> to vector<2x128xf32>
    %207 = arith.addf %204, %206 : vector<2x128xf32>
    %cst_211 = arith.constant 0.000000e+00 : f32
    %208 = vector.broadcast %cst_211 : f32 to vector<2x128xf32>
    %209 = arith.maximumf %207, %208 : vector<2x128xf32>
    %c0_212 = arith.constant 0 : index
    %c0_213 = arith.constant 0 : index
    %210 = vector.load %arg5[%c0_212, %c0_213] : memref<128x64xf32, #tpu.memory_space<vmem>>, vector<128x64xf32>
    %cst_214 = arith.constant dense<0.000000e+00> : vector<2x64xf32>
    %211 = tpu.matmul %209, %210, %cst_214 {dimension_numbers = #tpu.dot_dimension_numbers<[1], [0], [0], [1], [0, 0, 1, 1], [], []>} : vector<2x128xf32>, vector<128x64xf32>, vector<2x64xf32> -> vector<2x64xf32>
    %c0_215 = arith.constant 0 : index
    %c0_216 = arith.constant 0 : index
    %212 = vector.load %arg6[%c0_215, %c0_216] : memref<1x64xf32, #tpu.memory_space<vmem>>, vector<1x64xf32>
    %213 = vector.broadcast %212 : vector<1x64xf32> to vector<2x64xf32>
    %214 = arith.addf %211, %213 : vector<2x64xf32>
    %cst_217 = arith.constant dense<0xFF800000> : vector<2xf32>
    %215 = vector.multi_reduction <maximumf>, %214, %cst_217 [1] : vector<2x64xf32> to vector<2xf32>
    %216 = vector.shape_cast %215 : vector<2xf32> to vector<2x1xf32>
    %217 = vector.broadcast %216 : vector<2x1xf32> to vector<2x64xf32>
    %218 = arith.subf %214, %217 : vector<2x64xf32>
    %219 = math.exp %218 : vector<2x64xf32>
    %cst_218 = arith.constant dense<0.000000e+00> : vector<2xf32>
    %220 = vector.multi_reduction <add>, %219, %cst_218 [1] : vector<2x64xf32> to vector<2xf32>
    %221 = vector.shape_cast %220 : vector<2xf32> to vector<2x1xf32>
    %222 = tpu.reciprocal %221 : vector<2x1xf32> -> vector<2x1xf32>
    %223 = vector.broadcast %222 : vector<2x1xf32> to vector<2x64xf32>
    %224 = arith.mulf %219, %223 : vector<2x64xf32>
    %c0_219 = arith.constant 0 : index
    %c0_220 = arith.constant 0 : index
    %225 = vector.load %arg7[%c0_219, %c0_220] : memref<2x64xf32, #tpu.memory_space<vmem>>, vector<2x64xf32>
    tpu.vector_store %arg7[%c0_219, %c0_220], %224 {strides = array<i32>} : memref<2x64xf32, #tpu.memory_space<vmem>>, vector<2x64xf32>,
    return
  }
}

</mosaic_0001>

<bundles_post_ra>
// kernel: cnn_forward.1
= control target key start
LH: loop header
LB: loop body
LE: loop exit
PB: predicated region body
PF: predicated region fallthrough
CT: control target
= control target key end

     0   :  { %vm59_vm0 = vcmask 588800   ;;  %s5591_s0 = inlined_call_operand.vmem [shape: f32[128,72], index: 0, kind: input, shape index: {}]   ;;  %s5592_s1 = inlined_call_operand.vmem [shape: f32[72,32], index: 1, kind: input, shape index: {}]   ;;  %s5593_s2 = inlined_call_operand.vmem [shape: f32[1,32], index: 2, kind: input, shape index: {}]   ;;  %s5594_s3 = inlined_call_operand.vmem [shape: f32[2048,128], index: 3, kind: input, shape index: {}]   ;;  %s5595_s4 = inlined_call_operand.vmem [shape: f32[1,128], index: 4, kind: input, shape index: {}]   ;;  %s5596_s5 = inlined_call_operand.vmem [shape: f32[128,64], index: 5, kind: input, shape index: {}]   ;;  %s5597_s6 = inlined_call_operand.vmem [shape: f32[1,64], index: 6, kind: input, shape index: {}]   ;;  %s5598_s7 = inlined_call_operand.hbm [shape: f32[2,64], index: 7, kind: output, shape index: {}]  }
   0x1   :  { %v43_v0 = vld [vmem:[%s5592_s1] sm:$0xff]  ;;  %v44_v1 = vld [vmem:[%s5592_s1 + $0x8] sm:$0xff]  ;;  %v45_v2 = vld [vmem:[%s5592_s1 + $0x10] sm:$0xff] }
   0x2   :  { %v3702_v3 = vpack.c.bf16 %v44_v1, %v43_v0  ;;  %v46_v4 = vld [vmem:[%s5592_s1 + $0x18] sm:$0xff]  ;;  %v47_v6 = vld [vmem:[%s5592_s1 + $0x20] sm:$0xff]  ;;  %v48_v7 = vld [vmem:[%s5592_s1 + $0x28] sm:$0xff] }
   0x3   :  { %v3706_v5 = vpack.c.bf16 %v46_v4, %v45_v2  ;;  %v27_v8 = vld [vmem:[%s5591_s0] sm:$0xff]  ;;  %v3710_v9 = vpack.c.bf16 %v48_v7, %v47_v6  ;;  %v49_v10 = vld [vmem:[%s5592_s1 + $0x30] sm:$0xff]  ;;  %v50_v11 = vld [vmem:[%s5592_s1 + $0x38] sm:$0xff] }
   0x4   :  { %3703 = vmatprep.subr.bf16.mxu0 %v3702_v3  ;;  %3643 = vmatprep.mubr.msk.f32.mxu0 %vm59_vm0, %v27_v8 }
   0x5   :  { %3705 = vmatpush3.bf16.msra.mxu0 %v3702_v3 }
   0x6   :  { %3707 = vmatprep.subr.bf16.mxu0 %v3706_v5 }
   0x9   :  { %3709 = vmatpush3.bf16.msra.mxu0 %v3706_v5 }
   0xa   :  { %12 = vsyncpa [#allocation5], 0  ;;  %3711 = vmatprep.subr.bf16.mxu0 %v3710_v9  ;;  %v3714_v12 = vpack.c.bf16 %v50_v11, %v49_v10  ;;  %v51_v13 = vld [vmem:[%s5592_s1 + $0x40] sm:$0xff]  ;;  %v28_v14 = vld [vmem:[%s5591_s0 + $0x8] sm:$0xff]  ;;  %vm269_vm1 = vcmask 261120   ;;  %vm309_vm2 = vcmask 1041409  }
   0xb   :  { %v29_v15 = vld [vmem:[%s5591_s0 + $0x10] sm:$0xff]  ;;  %v30_v16 = vld [vmem:[%s5591_s0 + $0x18] sm:$0xff]  ;;  %v31_v17 = vld [vmem:[%s5591_s0 + $0x20] sm:$0xff]  ;;  %vm311_vm3 = vcmask 1043459   ;;  %vm313_vm4 = vcmask 1045509   ;;  %vm315_vm5 = vcmask 1047559  }
   0xc   :  { %v32_v18 = vld [vmem:[%s5591_s0 + $0x28] sm:$0xff]  ;;  %v33_v19 = vld [vmem:[%s5591_s0 + $0x30] sm:$0xff]  ;;  %v34_v20 = vld [vmem:[%s5591_s0 + $0x38] sm:$0xff]  ;;  %s4038_s15 = smov 64   ;;  %s4039_s16 = smov 32   ;;  %vm318_vm6 = vcmask 254976  }
   0xd   :  { %3713 = vmatpush3.bf16.msra.mxu0 %v3710_v9  ;;  %v35_v21 = vld [vmem:[%s5591_s0 + $0x40] sm:$0xff]  ;;  %v36_v22 = vld [vmem:[%s5591_s0 + $0x48] sm:$0xff]  ;;  %v37_v23 = vld [vmem:[%s5591_s0 + $0x50] sm:$0xff]  ;;  %vm348_vm7 = vcmask 517376   ;;  %vm378_vm8 = vcmask 779776   ;;  %vm408_vm9 = vcmask 1042176  }
   0xe   :  { %3715 = vmatprep.subr.bf16.mxu0 %v3714_v12  ;;  %v38_v24 = vld [vmem:[%s5591_s0 + $0x58] sm:$0xff]  ;;  %v39_v25 = vld [vmem:[%s5591_s0 + $0x60] sm:$0xff]  ;;  %v40_v26 = vld [vmem:[%s5591_s0 + $0x68] sm:$0xff]  ;;  %vm4043_vm10 = vmmov 0   ;;  %vm3129_vm11 = vcmask 517120   ;;  %s4045_s18 = smov [#allocation4]  }
   0xf   :  { %v41_v27 = vld [vmem:[%s5591_s0 + $0x70] sm:$0xff]  ;;  %v42_v28 = vld [vmem:[%s5591_s0 + $0x78] sm:$0xff]  ;;  %v4180_v29 = vld [vmem:[%s5593_s2] ss:$0 sm:$0xff]  ;;  %s4040_s0 = smov 96   ;;  %s3148_s19 = sshll.u32 %s4045_s18, 4  ;;  %s3149_s19 = int_to_ptr.vmem [resolvable:$true] %s3148_s19 }
  0x10   :  { %v2140_v1 = vld [vmem:[%s5594_s3 + $0x80] sm:$0xff]  ;;  %v2141_v6 = vld [vmem:[%s5594_s3 + $0x88] sm:$0xff]  ;;  %p4019_p1 = scmp.lt.s32.totalorder %s3149_s19, %s3149_s19 }
  0x11   :  { %3717 = vmatpush3.bf16.msra.mxu0 %v3714_v12  ;;  %v3718_v8 = vpack.c.bf16 %v2141_v6, %v2140_v1  ;;  %v2124_v9 = vld [vmem:[%s5594_s3] sm:$0xff]  ;;  %v2125_v10 = vld [vmem:[%s5594_s3 + $0x8] sm:$0xff] }
  0x12   :  { %3641 = vmatprep.subr.mxu0 %v51_v13  ;;  %v3720_v12 = vpack.c.bf16 %v2125_v10, %v2124_v9 }
  0x13   :  { %3719 = vmatprep.subr.bf16.mxu1 %v3718_v8 }
  0x14   :  { %3721 = vmatpush3.bf16.msra.mxu1 %v3720_v12 }
  0x15   :  { %3642 = vmatpush3.msra.mxu0 %v51_v13  ;;  %v2172_v13 = vld [vmem:[%s5594_s3 + $0x180] sm:$0xff] }
  0x16   :  { %3644 = vmatmul.mubr.msk.f32.vlgmr.msra.gmra.mrb[0].mxu0 %vm59_vm0, %v28_v14 }
  0x17   :  { %3646 = vmatprep.mubr.msk.f32.mxu0 %vm59_vm0, %v29_v15 }
  0x1a   :  { %3647 = vmatmul.mubr.msk.f32.gmra.mrb[2].mxu0 %vm59_vm0, %v30_v16 }
  0x1b   :  { %3649 = vmatprep.mubr.msk.f32.mxu0 %vm59_vm0, %v31_v17 }
  0x1e   :  { %3650 = vmatmul.mubr.msk.f32.gmra.mrb[4].mxu0 %vm59_vm0, %v32_v18 }
  0x1f   :  { %3652 = vmatprep.mubr.msk.f32.mxu0 %vm59_vm0, %v33_v19 }
  0x22   :  { %3653 = vmatmul.mubr.msk.f32.gmra.mrb[6].mxu0 %vm59_vm0, %v34_v20 }
  0x23   :  { %3655 = vmatprep.mubr.msk.f32.mxu0 %vm59_vm0, %v35_v21 }
  0x26   :  { %3656 = vmatmul.mubr.msk.f32.gmra.mrb[8].mxu0 %vm59_vm0, %v36_v22 }
  0x27   :  { %3658 = vmatprep.mubr.msk.f32.mxu0 %vm59_vm0, %v37_v23 }
  0x2a   :  { %3659 = vmatmul.mubr.msk.f32.gmra.mrb[10].mxu0 %vm59_vm0, %v38_v24 }
  0x2b   :  { %3661 = vmatprep.mubr.msk.f32.mxu0 %vm59_vm0, %v39_v25 }
  0x2e   :  { %3662 = vmatmul.mubr.msk.f32.gmra.mrb[12].mxu0 %vm59_vm0, %v40_v26 }
  0x2f   :  { %3664 = vmatprep.mubr.msk.f32.mxu0 %vm59_vm0, %v41_v27  ;;  %v2173_v27 = vld [vmem:[%s5594_s3 + $0x188] sm:$0xff] }
  0x32   :  { %3665 = vmatmul.mubr.msk.f32.gmra.mrb[14].mxu0 %vm59_vm0, %v42_v28 }
  0xe9   :  { %v3645_v30 = vpop.f32.mrb[0].mxu0 }
  0xea   :  { %v180_v31 = vadd.f32 %v3645_v30, %v4180_v29  ;;  %v174_v32 = vpop.f32.mrb[1].mxu0 }
  0xeb   :  { %v175_v33 = vadd.f32 %v4180_v29, %v174_v32 }
  0xec   :  { %v254_v34 = vmax.f32 %v180_v31, 0.0 }
  0xed   :  { %v253_v35 = vmax.f32 %v175_v33, 0.0  ;;  %v3648_v36 = vpop.f32.mrb[2].mxu0 }
  0xee   :  { %271 = vst.msk [vmem:[#allocation2 + $0x8] sm:$0xff] %vm269_vm1, %v254_v34  ;;  %v190_v37 = vadd.f32 %v3648_v36, %v4180_v29  ;;  %v184_v38 = vpop.f32.mrb[3].mxu0  ;;  %v3750_v34 = vpack.c.bf16 %v2173_v27, %v2172_v13 }
  0xef   :  { %270 = vst.msk [vmem:[#allocation2] sm:$0xff] %vm269_vm1, %v253_v35  ;;  %v185_v39 = vadd.f32 %v4180_v29, %v184_v38 }
  0xf0   :  { %v256_v40 = vmax.f32 %v190_v37, 0.0  ;;  %3751 = vmatprep.subr.bf16.mxu0 %v3750_v34 }
  0xf1   :  { %v255_v41 = vmax.f32 %v185_v39, 0.0  ;;  %v3651_v42 = vpop.f32.mrb[4].mxu0 }
  0xf2   :  { %273 = vst.msk [vmem:[#allocation2 + $0x18] sm:$0xff] %vm269_vm1, %v256_v40  ;;  %v200_v43 = vadd.f32 %v3651_v42, %v4180_v29  ;;  %v194_v44 = vpop.f32.mrb[5].mxu0 }
  0xf3   :  { %272 = vst.msk [vmem:[#allocation2 + $0x10] sm:$0xff] %vm269_vm1, %v255_v41  ;;  %v195_v45 = vadd.f32 %v4180_v29, %v194_v44 }
  0xf4   :  { %v258_v46 = vmax.f32 %v200_v43, 0.0 }
  0xf5   :  { %v257_v47 = vmax.f32 %v195_v45, 0.0  ;;  %v3654_v48 = vpop.f32.mrb[6].mxu0  ;;  %v3193_v16 = vld.sshfl [vmem:[#allocation2 + $0xa] sm:$0x1 pattern:$0x76325410] }
  0xf6   :  { %275 = vst.msk [vmem:[#allocation2 + $0x28] sm:$0xff] %vm269_vm1, %v258_v46  ;;  %v210_v49 = vadd.f32 %v3654_v48, %v4180_v29  ;;  %v204_v50 = vpop.f32.mrb[7].mxu0  ;;  %v3191_v21 = vld.sshfl [vmem:[#allocation2 + $0x9] sm:$0x1 pattern:$0x76325410] }
  0xf7   :  { %274 = vst.msk [vmem:[#allocation2 + $0x20] sm:$0xff] %vm269_vm1, %v257_v47  ;;  %v205_v51 = vadd.f32 %v4180_v29, %v204_v50  ;;  %v3199_v25 = vld.sshfl [vmem:[#allocation2 + $0xd] sm:$0x1 pattern:$0x76325410] }
  0xf8   :  { %v260_v52 = vmax.f32 %v210_v49, 0.0  ;;  %v3175_v32 = vld.sshfl [vmem:[#allocation2 + $0x1] sm:$0x1 pattern:$0x76325410] }
  0xf9   :  { %v259_v53 = vmax.f32 %v205_v51, 0.0  ;;  %v3657_v54 = vpop.f32.mrb[8].mxu0  ;;  %v3201_v38 = vld.sshfl [vmem:[#allocation2 + $0xe] sm:$0x1 pattern:$0x76325410] }
  0xfa   :  { %277 = vst.msk [vmem:[#allocation2 + $0x38] sm:$0xff] %vm269_vm1, %v260_v52  ;;  %v220_v55 = vadd.f32 %v3657_v54, %v4180_v29  ;;  %v214_v56 = vpop.f32.mrb[9].mxu0  ;;  %v3183_v54 = vld.sshfl [vmem:[#allocation2 + $0x5] sm:$0x1 pattern:$0x76325410] }
  0xfb   :  { %276 = vst.msk [vmem:[#allocation2 + $0x30] sm:$0xff] %vm269_vm1, %v259_v53  ;;  %v215_v57 = vadd.f32 %v4180_v29, %v214_v56  ;;  %v3179_v12 = vld.sshfl [vmem:[#allocation2 + $0x3] sm:$0x1 pattern:$0x76325410] }
  0xfc   :  { %v262_v58 = vmax.f32 %v220_v55, 0.0 }
  0xfd   :  { %v261_v59 = vmax.f32 %v215_v57, 0.0  ;;  %v3660_v60 = vpop.f32.mrb[10].mxu0 }
  0xfe   :  { %279 = vst.msk [vmem:[#allocation2 + $0x48] sm:$0xff] %vm269_vm1, %v262_v58  ;;  %v230_v61 = vadd.f32 %v3660_v60, %v4180_v29  ;;  %v224_v62 = vpop.f32.mrb[11].mxu0  ;;  %v3177_v60 = vld.sshfl [vmem:[#allocation2 + $0x2] sm:$0x1 pattern:$0x76325410] }
  0xff   :  { %278 = vst.msk [vmem:[#allocation2 + $0x40] sm:$0xff] %vm269_vm1, %v261_v59  ;;  %v225_v63 = vadd.f32 %v4180_v29, %v224_v62  ;;  %v3185_v59 = vld.sshfl [vmem:[#allocation2 + $0x6] sm:$0x1 pattern:$0x76325410] }
 0x100   :  { %v264_v0 = vmax.f32 %v230_v61, 0.0 }
 0x101   :  { %v263_v2 = vmax.f32 %v225_v63, 0.0  ;;  %v3663_v3 = vpop.f32.mrb[12].mxu0 }
 0x102   :  { %281 = vst.msk [vmem:[#allocation2 + $0x58] sm:$0xff] %vm269_vm1, %v264_v0  ;;  %v240_v4 = vadd.f32 %v3663_v3, %v4180_v29  ;;  %v234_v5 = vpop.f32.mrb[13].mxu0 }
 0x103   :  { %280 = vst.msk [vmem:[#allocation2 + $0x50] sm:$0xff] %vm269_vm1, %v263_v2  ;;  %v235_v7 = vadd.f32 %v4180_v29, %v234_v5  ;;  %v3187_v2 = vld.sshfl [vmem:[#allocation2 + $0x7] sm:$0x1 pattern:$0x76325410] }
 0x104   :  { %v266_v11 = vmax.f32 %v240_v4, 0.0 }
 0x105   :  { %v265_v14 = vmax.f32 %v235_v7, 0.0  ;;  %v3666_v15 = vpop.f32.mrb[14].mxu0  ;;  %v3194_v17 = vld.sshfl [vmem:[#allocation2 + $0x4a] sm:$0x1 pattern:$0x76325410] }
 0x106   :  { %283 = vst.msk [vmem:[#allocation2 + $0x68] sm:$0xff] %vm269_vm1, %v266_v11  ;;  %v250_v18 = vadd.f32 %v3666_v15, %v4180_v29  ;;  %v244_v19 = vpop.f32.mrb[15].mxu0  ;;  %v600_v20 = vrot.slane %v3194_v17, 7 }
 0x107   :  { %v3192_v22 = vld.sshfl [vmem:[#allocation2 + $0x49] sm:$0x1 pattern:$0x76325410]  ;;  %282 = vst.msk [vmem:[#allocation2 + $0x60] sm:$0xff] %vm269_vm1, %v265_v14  ;;  %v245_v23 = vadd.f32 %v4180_v29, %v244_v19 }
 0x108   :  { %v571_v24 = vrot.slane %v3192_v22, 7  ;;  %v3200_v26 = vld.sshfl [vmem:[#allocation2 + $0x4d] sm:$0x1 pattern:$0x76325410]  ;;  %v268_v28 = vmax.f32 %v250_v18, 0.0  ;;  %v601_v30 = vsel %vm309_vm2, %v600_v20, %v3193_v16 }
 0x109   :  { %v685_v31 = vrot.slane %v3200_v26, 7  ;;  %v3176_v33 = vld.sshfl [vmem:[#allocation2 + $0x41] sm:$0x1 pattern:$0x76325410]  ;;  %v267_v35 = vmax.f32 %v245_v23, 0.0  ;;  %v602_v36 = vsel %vm311_vm3, %v600_v20, %v601_v30 }
 0x10a   :  { %v572_v37 = vsel %vm309_vm2, %v571_v24, %v3191_v21  ;;  %v340_v29 = vrot.slane %v3176_v33, 7  ;;  %v3202_v39 = vld.sshfl [vmem:[#allocation2 + $0x4e] sm:$0x1 pattern:$0x76325410]  ;;  %285 = vst.msk [vmem:[#allocation2 + $0x78] sm:$0xff] %vm269_vm1, %v268_v28  ;;  %v603_v40 = vsel %vm313_vm4, %v600_v20, %v602_v36 }
 0x10b   :  { %v573_v41 = vsel %vm311_vm3, %v571_v24, %v572_v37  ;;  %v686_v42 = vsel %vm309_vm2, %v685_v31, %v3199_v25  ;;  %v714_v43 = vrot.slane %v3202_v39, 7  ;;  %v3184_v44 = vld.sshfl [vmem:[#allocation2 + $0x45] sm:$0x1 pattern:$0x76325410]  ;;  %284 = vst.msk [vmem:[#allocation2 + $0x70] sm:$0xff] %vm269_vm1, %v267_v35  ;;  %v604_v45 = vsel %vm315_vm5, %v600_v20, %v603_v40 }
 0x10c   :  { %v574_v46 = vsel %vm313_vm4, %v571_v24, %v573_v41  ;;  %v687_v47 = vsel %vm311_vm3, %v685_v31, %v686_v42  ;;  %v341_v48 = vsel %vm309_vm2, %v340_v29, %v3175_v32  ;;  %v3186_v49 = vld.sshfl [vmem:[#allocation2 + $0x46] sm:$0x1 pattern:$0x76325410]  ;;  %605 = vrot.lane.b32.xlu0 %v604_v45, %s4038_s15  ;;  %v457_v58 = vrot.slane %v3184_v44, 7 }
 0x10d   :  { %v575_v50 = vsel %vm315_vm5, %v571_v24, %v574_v46  ;;  %v688_v51 = vsel %vm313_vm4, %v685_v31, %v687_v47  ;;  %v342_v52 = vsel %vm311_vm3, %v340_v29, %v341_v48  ;;  %v715_v53 = vsel %vm309_vm2, %v714_v43, %v3201_v38  ;;  %v3178_v55 = vld.sshfl [vmem:[#allocation2 + $0x42] sm:$0x1 pattern:$0x76325410]  ;;  %v2142_v48 = vld [vmem:[%s5594_s3 + $0x90] sm:$0xff] }
 0x10e   :  { %576 = vrot.lane.b32.xlu1 %v575_v50, %s4039_s16  ;;  %v343_v56 = vsel %vm313_vm4, %v340_v29, %v342_v52  ;;  %v716_v57 = vsel %vm311_vm3, %v714_v43, %v715_v53  ;;  %v3188_v61 = vld.sshfl [vmem:[#allocation2 + $0x47] sm:$0x1 pattern:$0x76325410]  ;;  %v689_v62 = vsel %vm315_vm5, %v685_v31, %v688_v51  ;;  %v486_v0 = vrot.slane %v3186_v49, 7  ;;  %v2143_v49 = vld [vmem:[%s5594_s3 + $0x98] sm:$0xff] }
 0x10f   :  { %v344_v63 = vsel %vm315_vm5, %v340_v29, %v343_v56  ;;  %v370_v1 = vrot.slane %v3178_v55, 7  ;;  %v3180_v3 = vld.sshfl [vmem:[#allocation2 + $0x43] sm:$0x1 pattern:$0x76325410]  ;;  %v717_v4 = vsel %vm313_vm4, %v714_v43, %v716_v57  ;;  %v458_v5 = vsel %vm309_vm2, %v457_v58, %v3183_v54  ;;  %v2126_v50 = vld [vmem:[%s5594_s3 + $0x10] sm:$0xff] }
 0x110   :  { %v515_v6 = vrot.slane %v3188_v61, 7  ;;  %v400_v7 = vrot.slane %v3180_v3, 7  ;;  %v3204_v8 = vld.sshfl [vmem:[#allocation2 + $0x4f] sm:$0x1 pattern:$0x76325410]  ;;  %345 = vrot.lane.b32.xlu0 %v344_v63, %s4039_s16  ;;  %v459_v9 = vsel %vm311_vm3, %v457_v58, %v458_v5  ;;  %v487_v10 = vsel %vm309_vm2, %v486_v0, %v3185_v59 }
 0x111   :  { %v371_v11 = vsel %vm309_vm2, %v370_v1, %v3177_v60  ;;  %v4258_v13 = vrot.slane %v3204_v8, 7  ;;  %v3196_v14 = vld.sshfl [vmem:[#allocation2 + $0x4b] sm:$0x1 pattern:$0x76325410]  ;;  %v460_v15 = vsel %vm313_vm4, %v457_v58, %v459_v9  ;;  %v488_v16 = vsel %vm311_vm3, %v486_v0, %v487_v10  ;;  %v2156_v42 = vld [vmem:[%s5594_s3 + $0x100] sm:$0xff] }
 0x112   :  { %690 = vrot.lane.b32.xlu1 %v689_v62, %s4039_s16  ;;  %v372_v17 = vsel %vm311_vm3, %v370_v1, %v371_v11  ;;  %v516_v18 = vsel %vm309_vm2, %v515_v6, %v3187_v2  ;;  %v3232_v19 = vld.sshfl [vmem:[#allocation2 + $0x5d] sm:$0x1 pattern:$0x76325410]  ;;  %v718_v21 = vsel %vm315_vm5, %v714_v43, %v717_v4  ;;  %v461_v22 = vsel %vm315_vm5, %v457_v58, %v460_v15  ;;  %v2157_v43 = vld [vmem:[%s5594_s3 + $0x108] sm:$0xff]  ;;  %v2174_v5 = vld [vmem:[%s5594_s3 + $0x190] sm:$0xff] }
 0x113   :  { %v3224_v20 = vld.sshfl [vmem:[#allocation2 + $0x59] sm:$0x1 pattern:$0x76325410]  ;;  %v401_v23 = vsel %vm309_vm2, %v400_v7, %v3179_v12  ;;  %v489_v25 = vsel %vm313_vm4, %v486_v0, %v488_v16  ;;  %v373_v26 = vsel %vm313_vm4, %v370_v1, %v372_v17  ;;  %v517_v27 = vsel %vm311_vm3, %v515_v6, %v516_v18  ;;  %v2158_v11 = vld [vmem:[%s5594_s3 + $0x110] sm:$0xff]  ;;  %v2145_v17 = vld [vmem:[%s5594_s3 + $0xa8] sm:$0xff] }
 0x114   :  { %v3203_v24 = vld.sshfl [vmem:[#allocation2 + $0xf] sm:$0x1 pattern:$0x76325410]  ;;  %462 = vrot.lane.b32.xlu0 %v461_v22, %s4039_s16  ;;  %v629_v30 = vrot.slane %v3196_v14, 7  ;;  %v402_v31 = vsel %vm311_vm3, %v400_v7, %v401_v23  ;;  %v4276_v34 = vrot.slane %v3232_v19, 7  ;;  %v490_v38 = vsel %vm315_vm5, %v486_v0, %v489_v25 }
 0x115   :  { %v3195_v28 = vld.sshfl [vmem:[#allocation2 + $0xb] sm:$0x1 pattern:$0x76325410]  ;;  %v744_v32 = vsel %vm309_vm2, %v4258_v13, %v3203_v24  ;;  %v4278_v35 = vrot.slane %v3224_v20, 7  ;;  %v374_v39 = vsel %vm315_vm5, %v370_v1, %v373_v26  ;;  %v518_v40 = vsel %vm313_vm4, %v515_v6, %v517_v27  ;;  %v2127_v54 = vld [vmem:[%s5594_s3 + $0x18] sm:$0xff] }
 0x116   :  { %719 = vrot.lane.b32.xlu1 %v718_v21, %s4038_s15  ;;  %v3231_v33 = vld.sshfl [vmem:[#allocation2 + $0x1d] sm:$0x1 pattern:$0x76325410]  ;;  %v630_v36 = vsel %vm309_vm2, %v629_v30, %v3195_v28  ;;  %v403_v44 = vsel %vm313_vm4, %v400_v7, %v402_v31  ;;  %v745_v45 = vsel %vm311_vm3, %v4258_v13, %v744_v32  ;;  %v519_v55 = vsel %vm315_vm5, %v515_v6, %v518_v40  ;;  %v2144_v14 = vld [vmem:[%s5594_s3 + $0xa0] sm:$0xff]  ;;  %v2129_v23 = vld [vmem:[%s5594_s3 + $0x28] sm:$0xff] }
 0x117   :  { %v3223_v37 = vld.sshfl [vmem:[#allocation2 + $0x19] sm:$0x1 pattern:$0x76325410]  ;;  %v631_v46 = vsel %vm311_vm3, %v629_v30, %v630_v36  ;;  %v1142_v47 = vsel %vm309_vm2, %v4276_v34, %v3231_v33  ;;  %v404_v59 = vsel %vm315_vm5, %v400_v7, %v403_v44  ;;  %v746_v60 = vsel %vm313_vm4, %v4258_v13, %v745_v45  ;;  %v2128_v22 = vld [vmem:[%s5594_s3 + $0x20] sm:$0xff]  ;;  %v2177_v28 = vld [vmem:[%s5594_s3 + $0x1a8] sm:$0xff] }
 0x118   :  { %v3234_v29 = vld.sshfl [vmem:[#allocation2 + $0x5e] sm:$0x1 pattern:$0x76325410]  ;;  %375 = vrot.lane.b32.xlu0 %v374_v39, %s4038_s15  ;;  %v1028_v51 = vsel %vm309_vm2, %v4278_v35, %v3223_v37  ;;  %v632_v61 = vsel %vm313_vm4, %v629_v30, %v631_v46  ;;  %v1143_v62 = vsel %vm311_vm3, %v4276_v34, %v1142_v47  ;;  %v3752_v2 = vpack.c.bf16 %v2157_v43, %v2156_v42  ;;  %v2176_v27 = vld [vmem:[%s5594_s3 + $0x1a0] sm:$0xff]  ;;  %v2146_v43 = vld [vmem:[%s5594_s3 + $0xb0] sm:$0xff] }
 0x119   :  { %v3226_v41 = vld.sshfl [vmem:[#allocation2 + $0x5a] sm:$0x1 pattern:$0x76325410]  ;;  %v4309_v52 = vrot.slane %v3234_v29, 7  ;;  %v1029_v0 = vsel %vm311_vm3, %v4278_v35, %v1028_v51  ;;  %v3722_v3 = vpack.c.bf16 %v2143_v49, %v2142_v48  ;;  %v3724_v4 = vpack.c.bf16 %v2127_v54, %v2126_v50  ;;  %v2160_v37 = vld [vmem:[%s5594_s3 + $0x120] sm:$0xff] }
 0x11a   :  { %491 = vrot.lane.b32.xlu1 %v490_v38, %s4038_s15  ;;  %v3216_v53 = vld.sshfl [vmem:[#allocation2 + $0x55] sm:$0x1 pattern:$0x76325410]  ;;  %v4315_v57 = vrot.slane %v3226_v41, 7  ;;  %v2175_v6 = vld [vmem:[%s5594_s3 + $0x198] sm:$0xff]  ;;  %3753 = vmatpush3.bf16.msra.mxu0 %v3752_v2  ;;  %v747_v18 = vsel %vm315_vm5, %v4258_v13, %v746_v60  ;;  %v633_v19 = vsel %vm315_vm5, %v629_v30, %v632_v61  ;;  %v1144_v20 = vsel %vm313_vm4, %v4276_v34, %v1143_v62 }
 0x11b   :  { %v3233_v56 = vld.sshfl [vmem:[#allocation2 + $0x1e] sm:$0x1 pattern:$0x76325410]  ;;  %v4337_v9 = vrot.slane %v3216_v53, 7  ;;  %3723 = vmatprep.subr.bf16.mxu1 %v3722_v3  ;;  %v1030_v13 = vsel %vm313_vm4, %v4278_v35, %v1029_v0  ;;  %v3754_v33 = vpack.c.bf16 %v2175_v6, %v2174_v5  ;;  %v2161_v29 = vld [vmem:[%s5594_s3 + $0x128] sm:$0xff]  ;;  %v3726_v41 = vpack.c.bf16 %v2145_v17, %v2144_v14 }
 0x11c   :  { %v3208_v58 = vld.sshfl [vmem:[#allocation2 + $0x51] sm:$0x1 pattern:$0x76325410]  ;;  %405 = vrot.lane.b32.xlu0 %v404_v59, %s4040_s0  ;;  %v1171_v7 = vsel %vm309_vm2, %v4309_v52, %v3233_v56  ;;  %v2159_v12 = vld [vmem:[%s5594_s3 + $0x118] sm:$0xff]  ;;  %3725 = vmatpush3.bf16.msra.mxu1 %v3724_v4  ;;  %v3728_v42 = vpack.c.bf16 %v2129_v23, %v2128_v22  ;;  %v1145_v46 = vsel %vm315_vm5, %v4276_v34, %v1144_v20  ;;  %v2149_v0 = vld [vmem:[%s5594_s3 + $0xc8] sm:$0xff] }
 0x11d   :  { %v3218_v63 = vld.sshfl [vmem:[#allocation2 + $0x56] sm:$0x1 pattern:$0x76325410]  ;;  %v4339_v10 = vrot.slane %v3208_v58, 7  ;;  %v1172_v24 = vsel %vm311_vm3, %v4309_v52, %v1171_v7  ;;  %v3756_v36 = vpack.c.bf16 %v2159_v12, %v2158_v11  ;;  %v2147_v44 = vld [vmem:[%s5594_s3 + $0xb8] sm:$0xff]  ;;  %v1031_v47 = vsel %vm315_vm5, %v4278_v35, %v1030_v13  ;;  %3755 = vmatprep.subr.bf16.mxu0 %v3754_v33  ;;  %3727 = vmatprep.subr.bf16.mxu1 %v3726_v41 }
 0x11e   :  { %v3225_v1 = vld.sshfl [vmem:[#allocation2 + $0x1a] sm:$0x1 pattern:$0x76325410]  ;;  %520 = vrot.lane.b32.xlu1 %v519_v55, %s4040_s0  ;;  %v4350_v16 = vrot.slane %v3218_v63, 7  ;;  %v2130_v45 = vld [vmem:[%s5594_s3 + $0x30] sm:$0xff]  ;;  %v1173_v48 = vsel %vm313_vm4, %v4309_v52, %v1172_v24  ;;  %v3758_v50 = vpack.c.bf16 %v2177_v28, %v2176_v27  ;;  %v3760_v55 = vpack.c.bf16 %v2161_v29, %v2160_v37 }
 0x11f   :  { %v1057_v8 = vsel %vm309_vm2, %v4315_v57, %v3225_v1  ;;  %v3215_v15 = vld.sshfl [vmem:[#allocation2 + $0x15] sm:$0x1 pattern:$0x76325410]  ;;  %v2131_v51 = vld [vmem:[%s5594_s3 + $0x38] sm:$0xff]  ;;  %3757 = vmatpush3.bf16.msra.mxu0 %v3756_v36  ;;  %v2148_v63 = vld [vmem:[%s5594_s3 + $0xc0] sm:$0xff]  ;;  %v1174_v1 = vsel %vm315_vm5, %v4309_v52, %v1173_v48  ;;  %v3730_v12 = vpack.c.bf16 %v2147_v44, %v2146_v43 }
 0x120   :  { %v3210_v21 = vld.sshfl [vmem:[#allocation2 + $0x52] sm:$0x1 pattern:$0x76325410]  ;;  %634 = vrot.lane.b32.xlu0 %v633_v19, %s4040_s0  ;;  %v1058_v25 = vsel %vm311_vm3, %v4315_v57, %v1057_v8  ;;  %v914_v30 = vsel %vm309_vm2, %v4337_v9, %v3215_v15  ;;  %v2179_v56 = vld [vmem:[%s5594_s3 + $0x1b8] sm:$0xff]  ;;  %3729 = vmatpush3.bf16.msra.mxu1 %v3728_v42  ;;  %v2132_v6 = vld [vmem:[%s5594_s3 + $0x40] sm:$0xff]  ;;  %v3732_v14 = vpack.c.bf16 %v2131_v51, %v2130_v45 }
 0x121   :  { %v3207_v26 = vld.sshfl [vmem:[#allocation2 + $0x11] sm:$0x1 pattern:$0x76325410]  ;;  %v4392_v39 = vrot.slane %v3210_v21, 7  ;;  %v1059_v34 = vsel %vm313_vm4, %v4315_v57, %v1058_v25  ;;  %v915_v35 = vsel %vm311_vm3, %v4337_v9, %v914_v30  ;;  %v2163_v62 = vld [vmem:[%s5594_s3 + $0x138] sm:$0xff]  ;;  %3759 = vmatprep.subr.bf16.mxu0 %v3758_v50  ;;  %3731 = vmatprep.subr.bf16.mxu1 %v3730_v12  ;;  %v3734_v33 = vpack.c.bf16 %v2149_v0, %v2148_v63 }
 0x122   :  { %748 = vrot.lane.b32.xlu1 %v747_v18, %s4040_s0  ;;  %v800_v31 = vsel %vm309_vm2, %v4339_v10, %v3207_v26  ;;  %v3217_v32 = vld.sshfl [vmem:[#allocation2 + $0x16] sm:$0x1 pattern:$0x76325410]  ;;  %v2133_v7 = vld [vmem:[%s5594_s3 + $0x48] sm:$0xff]  ;;  %v1060_v52 = vsel %vm315_vm5, %v4315_v57, %v1059_v34  ;;  %v916_v8 = vsel %vm313_vm4, %v4337_v9, %v915_v35  ;;  %v2180_v15 = vld [vmem:[%s5594_s3 + $0x1c0] sm:$0xff] }
 0x123   :  { %v943_v38 = vsel %vm309_vm2, %v4350_v16, %v3217_v32  ;;  %v3220_v40 = vld.sshfl [vmem:[#allocation2 + $0x57] sm:$0x1 pattern:$0x76325410]  ;;  %v801_v59 = vsel %vm311_vm3, %v4339_v10, %v800_v31  ;;  %v2181_v17 = vld [vmem:[%s5594_s3 + $0x1c8] sm:$0xff]  ;;  %3761 = vmatpush3.bf16.msra.mxu0 %v3760_v55  ;;  %v2164_v21 = vld [vmem:[%s5594_s3 + $0x140] sm:$0xff]  ;;  %v917_v36 = vsel %vm315_vm5, %v4337_v9, %v916_v8 }
 0x124   :  { %v3212_v49 = vld.sshfl [vmem:[#allocation2 + $0x53] sm:$0x1 pattern:$0x76325410]  ;;  %1032 = vrot.lane.b32.xlu0 %v1031_v47, %s4039_s16  ;;  %v944_v60 = vsel %vm311_vm3, %v4350_v16, %v943_v38  ;;  %v4431_v61 = vrot.slane %v3220_v40, 7  ;;  %v802_v18 = vsel %vm313_vm4, %v4339_v10, %v801_v59  ;;  %v2165_v22 = vld [vmem:[%s5594_s3 + $0x148] sm:$0xff]  ;;  %3733 = vmatpush3.bf16.msra.mxu1 %v3732_v14  ;;  %v3736_v40 = vpack.c.bf16 %v2133_v7, %v2132_v6 }
 0x125   :  { %v2178_v53 = vld [vmem:[%s5594_s3 + $0x1b0] sm:$0xff]  ;;  %v4446_v4 = vrot.slane %v3212_v49, 7  ;;  %v3236_v5 = vld.sshfl [vmem:[#allocation2 + $0x5f] sm:$0x1 pattern:$0x76325410]  ;;  %v945_v57 = vsel %vm313_vm4, %v4350_v16, %v944_v60  ;;  %v803_v37 = vsel %vm315_vm5, %v4339_v10, %v802_v18  ;;  %v3766_v41 = vpack.c.bf16 %v2181_v17, %v2180_v15  ;;  %3735 = vmatprep.subr.bf16.mxu1 %v3734_v33 }
 0x126   :  { %v3209_v54 = vld.sshfl [vmem:[#allocation2 + $0x12] sm:$0x1 pattern:$0x76325410]  ;;  %1146 = vrot.lane.b32.xlu1 %v1145_v46, %s4039_s16  ;;  %v3762_v20 = vpack.c.bf16 %v2179_v56, %v2178_v53  ;;  %v2151_v27 = vld [vmem:[%s5594_s3 + $0xd8] sm:$0xff]  ;;  %v4488_v30 = vrot.slane %v3236_v5, 7  ;;  %v3768_v44 = vpack.c.bf16 %v2165_v22, %v2164_v21 }
 0x127   :  { %v2162_v58 = vld [vmem:[%s5594_s3 + $0x130] sm:$0xff]  ;;  %v829_v2 = vsel %vm309_vm2, %v4392_v39, %v3209_v54  ;;  %v3228_v11 = vld.sshfl [vmem:[#allocation2 + $0x5b] sm:$0x1 pattern:$0x76325410]  ;;  %v2152_v34 = vld [vmem:[%s5594_s3 + $0xe0] sm:$0xff] }
 0x128   :  { %v3219_v3 = vld.sshfl [vmem:[#allocation2 + $0x17] sm:$0x1 pattern:$0x76325410]  ;;  %1061 = vrot.lane.b32.xlu0 %v1060_v52, %s4038_s15  ;;  %v830_v23 = vsel %vm311_vm3, %v4392_v39, %v829_v2  ;;  %v3764_v25 = vpack.c.bf16 %v2163_v62, %v2162_v58  ;;  %v4490_v31 = vrot.slane %v3228_v11, 7  ;;  %3763 = vmatprep.subr.bf16.mxu0 %v3762_v20  ;;  %v2135_v43 = vld [vmem:[%s5594_s3 + $0x58] sm:$0xff]  ;;  %v946_v62 = vsel %vm315_vm5, %v4350_v16, %v945_v57 }
 0x129   :  { %v3211_v19 = vld.sshfl [vmem:[#allocation2 + $0x13] sm:$0x1 pattern:$0x76325410]  ;;  %v972_v13 = vsel %vm309_vm2, %v4431_v61, %v3219_v3  ;;  %v831_v9 = vsel %vm313_vm4, %v4392_v39, %v830_v23  ;;  %v2183_v46 = vld [vmem:[%s5594_s3 + $0x1d8] sm:$0xff]  ;;  %v2153_v35 = vld [vmem:[%s5594_s3 + $0xe8] sm:$0xff]  ;;  %3737 = vmatpush3.bf16.msra.mxu1 %v3736_v40 }
 0x12a   :  { %1175 = vrot.lane.b32.xlu1 %v1174_v1, %s4038_s15  ;;  %v3264_v24 = vld.sshfl [vmem:[#allocation2 + $0x6d] sm:$0x1 pattern:$0x76325410]  ;;  %v2150_v26 = vld [vmem:[%s5594_s3 + $0xd0] sm:$0xff]  ;;  %v858_v28 = vsel %vm309_vm2, %v4446_v4, %v3211_v19  ;;  %v973_v10 = vsel %vm311_vm3, %v4431_v61, %v972_v13  ;;  %3765 = vmatpush3.bf16.msra.mxu0 %v3764_v25  ;;  %v2167_v53 = vld [vmem:[%s5594_s3 + $0x158] sm:$0xff]  ;;  %v832_v63 = vsel %vm315_vm5, %v4392_v39, %v831_v9 }
 0x12b   :  { %v3256_v32 = vld.sshfl [vmem:[#allocation2 + $0x69] sm:$0x1 pattern:$0x76325410]  ;;  %v2134_v42 = vld [vmem:[%s5594_s3 + $0x50] sm:$0xff]  ;;  %v859_v48 = vsel %vm311_vm3, %v4446_v4, %v858_v28  ;;  %v4519_v49 = vrot.slane %v3264_v24, 7  ;;  %v3738_v51 = vpack.c.bf16 %v2151_v27, %v2150_v26  ;;  %3767 = vmatprep.subr.bf16.mxu0 %v3766_v41  ;;  %v974_v0 = vsel %vm313_vm4, %v4431_v61, %v973_v10 }
 0x12c   :  { %v3235_v29 = vld.sshfl [vmem:[#allocation2 + $0x1f] sm:$0x1 pattern:$0x76325410]  ;;  %804 = vrot.lane.b32.xlu0 %v803_v37, %s4039_s16  ;;  %v2182_v45 = vld [vmem:[%s5594_s3 + $0x1d0] sm:$0xff]  ;;  %v4521_v50 = vrot.slane %v3256_v32, 7  ;;  %v3740_v58 = vpack.c.bf16 %v2135_v43, %v2134_v42  ;;  %v860_v16 = vsel %vm313_vm4, %v4446_v4, %v859_v48  ;;  %v3742_v7 = vpack.c.bf16 %v2153_v35, %v2152_v34 }
 0x12d   :  { %v3227_v38 = vld.sshfl [vmem:[#allocation2 + $0x1b] sm:$0x1 pattern:$0x76325410]  ;;  %v2166_v47 = vld [vmem:[%s5594_s3 + $0x150] sm:$0xff]  ;;  %v1200_v54 = vsel %vm309_vm2, %v4488_v30, %v3235_v29  ;;  %v2136_v59 = vld [vmem:[%s5594_s3 + $0x60] sm:$0xff]  ;;  %3739 = vmatprep.subr.bf16.mxu1 %v3738_v51  ;;  %v3770_v2 = vpack.c.bf16 %v2183_v46, %v2182_v45  ;;  %v975_v13 = vsel %vm315_vm5, %v4431_v61, %v974_v0  ;;  %v861_v24 = vsel %vm315_vm5, %v4446_v4, %v860_v16 }
 0x12e   :  { %918 = vrot.lane.b32.xlu1 %v917_v36, %s4039_s16  ;;  %v1086_v55 = vsel %vm309_vm2, %v4490_v31, %v3227_v38  ;;  %v3266_v56 = vld.sshfl [vmem:[#allocation2 + $0x6e] sm:$0x1 pattern:$0x76325410]  ;;  %v2184_v3 = vld [vmem:[%s5594_s3 + $0x1e0] sm:$0xff]  ;;  %3769 = vmatpush3.bf16.msra.mxu0 %v3768_v44  ;;  %v3772_v6 = vpack.c.bf16 %v2167_v53, %v2166_v47  ;;  %v2154_v52 = vld [vmem:[%s5594_s3 + $0xf0] sm:$0xff]  ;;  %v1201_v11 = vsel %vm311_vm3, %v4488_v30, %v1200_v54 }
 0x12f   :  { %v2137_v60 = vld [vmem:[%s5594_s3 + $0x68] sm:$0xff]  ;;  %v2155_v8 = vld [vmem:[%s5594_s3 + $0xf8] sm:$0xff]  ;;  %v1087_v12 = vsel %vm311_vm3, %v4490_v31, %v1086_v55  ;;  %3771 = vmatprep.subr.bf16.mxu0 %v3770_v2  ;;  %v2168_v17 = vld [vmem:[%s5594_s3 + $0x160] sm:$0xff]  ;;  %v4576_v57 = vrot.slane %v3266_v56, 7  ;;  %3741 = vmatpush3.bf16.msra.mxu1 %v3740_v58  ;;  %v1202_v61 = vsel %vm313_vm4, %v4488_v30, %v1201_v11 }
 0x130   :  { %v3258_v1 = vld.sshfl [vmem:[#allocation2 + $0x6a] sm:$0x1 pattern:$0x76325410]  ;;  %833 = vrot.lane.b32.xlu0 %v832_v63, %s4038_s15  ;;  %v3744_v20 = vpack.c.bf16 %v2137_v60, %v2136_v59  ;;  %v2186_v22 = vld [vmem:[%s5594_s3 + $0x1f0] sm:$0xff]  ;;  %v2187_v23 = vld [vmem:[%s5594_s3 + $0x1f8] sm:$0xff]  ;;  %3743 = vmatprep.subr.bf16.mxu1 %v3742_v7  ;;  %v3746_v28 = vpack.c.bf16 %v2155_v8, %v2154_v52  ;;  %v1088_v4 = vsel %vm313_vm4, %v4490_v31, %v1087_v12 }
 0x131   :  { %v2185_v5 = vld [vmem:[%s5594_s3 + $0x1e8] sm:$0xff]  ;;  %v4578_v19 = vrot.slane %v3258_v1, 7  ;;  %v3240_v27 = vld.sshfl [vmem:[#allocation2 + $0x61] sm:$0x1 pattern:$0x76325410]  ;;  %v3778_v40 = vpack.c.bf16 %v2187_v23, %v2186_v22  ;;  %v1203_v47 = vsel %vm315_vm5, %v4488_v30, %v1202_v61  ;;  %v1089_v48 = vsel %vm315_vm5, %v4490_v31, %v1088_v4 }
 0x132   :  { %v3255_v39 = vld.sshfl [vmem:[#allocation2 + $0x29] sm:$0x1 pattern:$0x76325410]  ;;  %947 = vrot.lane.b32.xlu1 %v946_v62, %s4038_s15  ;;  %v3774_v21 = vpack.c.bf16 %v2185_v5, %v2184_v3  ;;  %v2138_v32 = vld [vmem:[%s5594_s3 + $0x70] sm:$0xff]  ;;  %v2139_v33 = vld [vmem:[%s5594_s3 + $0x78] sm:$0xff]  ;;  %3773 = vmatpush3.bf16.msra.mxu0 %v3772_v6 }
 0x133   :  { %v3263_v14 = vld.sshfl [vmem:[#allocation2 + $0x2d] sm:$0x1 pattern:$0x76325410]  ;;  %v1484_v15 = vsel %vm309_vm2, %v4521_v50, %v3255_v39  ;;  %v2170_v29 = vld [vmem:[%s5594_s3 + $0x170] sm:$0xff]  ;;  %v2171_v41 = vld [vmem:[%s5594_s3 + $0x178] sm:$0xff]  ;;  %3745 = vmatpush3.bf16.msra.mxu1 %v3744_v20  ;;  %v3748_v46 = vpack.c.bf16 %v2139_v33, %v2138_v32 }
 0x134   :  { %v2169_v18 = vld [vmem:[%s5594_s3 + $0x168] sm:$0xff]  ;;  %v1598_v25 = vsel %vm309_vm2, %v4519_v49, %v3263_v14  ;;  %862 = vrot.lane.b32.xlu0 %v861_v24, %s4040_s0  ;;  %v3248_v36 = vld.sshfl [vmem:[#allocation2 + $0x65] sm:$0x1 pattern:$0x76325410]  ;;  %v1485_v38 = vsel %vm311_vm3, %v4521_v50, %v1484_v15  ;;  %3775 = vmatprep.subr.bf16.mxu0 %v3774_v21  ;;  %v4622_v45 = vrot.slane %v3240_v27, 7  ;;  %v3780_v30 = vpack.c.bf16 %v2171_v41, %v2170_v29 }
 0x135   :  { %v3257_v26 = vld.sshfl [vmem:[#allocation2 + $0x2a] sm:$0x1 pattern:$0x76325410]  ;;  %v3776_v37 = vpack.c.bf16 %v2169_v18, %v2168_v17  ;;  %v2204_v42 = vld [vmem:[%s5594_s3 + $0x280] sm:$0xff]  ;;  %v1599_v9 = vsel %vm311_vm3, %v4519_v49, %v1598_v25  ;;  %v1369_v53 = vrot.slane %v3248_v36, 7  ;;  %3747 = vmatprep.subr.bf16.mxu1 %v3746_v28  ;;  %v1486_v54 = vsel %vm313_vm4, %v4521_v50, %v1485_v38 }
 0x136   :  { %976 = vrot.lane.b32.xlu1 %v975_v13, %s4040_s0  ;;  %v2205_v43 = vld [vmem:[%s5594_s3 + $0x288] sm:$0xff]  ;;  %v1513_v44 = vsel %vm309_vm2, %v4578_v19, %v3257_v26  ;;  %v3242_v34 = vld.sshfl [vmem:[#allocation2 + $0x62] sm:$0x1 pattern:$0x76325410]  ;;  %v1600_v58 = vsel %vm313_vm4, %v4519_v49, %v1599_v9  ;;  %v1487_v3 = vsel %vm315_vm5, %v4521_v50, %v1486_v54 }
 0x137   :  { %v3265_v10 = vld.sshfl [vmem:[#allocation2 + $0x2e] sm:$0x1 pattern:$0x76325410]  ;;  %v2236_v35 = vld [vmem:[%s5594_s3 + $0x380] sm:$0xff]  ;;  %3777 = vmatpush3.bf16.msra.mxu0 %v3776_v37  ;;  %v3782_v56 = vpack.c.bf16 %v2205_v43, %v2204_v42  ;;  %v1514_v59 = vsel %vm311_vm3, %v4578_v19, %v1513_v44  ;;  %v1284_v1 = vrot.slane %v3242_v34, 7  ;;  %3749 = vmatpush3.bf16.msra.mxu1 %v3748_v46  ;;  %v1601_v6 = vsel %vm315_vm5, %v4519_v49, %v1600_v58 }
 0x138   :  { %v1627_v51 = vsel %vm309_vm2, %v4576_v57, %v3265_v10  ;;  %1090 = vrot.lane.b32.xlu0 %v1089_v48, %s4040_s0  ;;  %v3250_v55 = vld.sshfl [vmem:[#allocation2 + $0x66] sm:$0x1 pattern:$0x76325410]  ;;  %v2237_v31 = vld [vmem:[%s5594_s3 + $0x388] sm:$0xff]  ;;  %3779 = vmatprep.subr.bf16.mxu0 %v3778_v40  ;;  %v1515_v7 = vsel %vm313_vm4, %v4578_v19, %v1514_v59 }
 0x139   :  { %v3239_v60 = vld.sshfl [vmem:[#allocation2 + $0x21] sm:$0x1 pattern:$0x76325410]  ;;  %v1628_v62 = vsel %vm311_vm3, %v4576_v57, %v1627_v51  ;;  %v3814_v2 = vpack.c.bf16 %v2237_v31, %v2236_v35  ;;  %v1398_v16 = vrot.slane %v3250_v55, 7  ;;  %3783 = vmatprep.subr.bf16.mxu1 %v3782_v56  ;;  %v1516_v17 = vsel %vm315_vm5, %v4578_v19, %v1515_v7 }
 0x13a   :  { %1204 = vrot.lane.b32.xlu1 %v1203_v47, %s4040_s0  ;;  %v3247_v63 = vld.sshfl [vmem:[#allocation2 + $0x25] sm:$0x1 pattern:$0x76325410]  ;;  %v1256_v0 = vsel %vm309_vm2, %v4622_v45, %v3239_v60  ;;  %v1629_v50 = vsel %vm313_vm4, %v4576_v57, %v1628_v62 }
 0x13b   :  { %v1370_v5 = vsel %vm309_vm2, %v1369_v53, %v3247_v63  ;;  %v3244_v39 = vld.sshfl [vmem:[#allocation2 + $0x63] sm:$0x1 pattern:$0x76325410]  ;;  %3781 = vmatpush3.bf16.msra.mxu0 %v3780_v30  ;;  %v1257_v8 = vsel %vm311_vm3, %v4622_v45, %v1256_v0  ;;  %v1630_v22 = vsel %vm315_vm5, %v4576_v57, %v1629_v50 }
 0x13c   :  { %1488 = vrot.lane.b32.xlu0 %v1487_v3, %s4039_s16  ;;  %v3252_v52 = vld.sshfl [vmem:[#allocation2 + $0x67] sm:$0x1 pattern:$0x76325410]  ;;  %3815 = vmatprep.subr.bf16.mxu0 %v3814_v2  ;;  %v1371_v12 = vsel %vm311_vm3, %v1369_v53, %v1370_v5  ;;  %v1313_v15 = vrot.slane %v3244_v39, 7  ;;  %v1258_v23 = vsel %vm313_vm4, %v4622_v45, %v1257_v8 }
 0x13d   :  { %v3241_v11 = vld.sshfl [vmem:[#allocation2 + $0x22] sm:$0x1 pattern:$0x76325410]  ;;  %v1427_v20 = vrot.slane %v3252_v52, 7  ;;  %v1372_v24 = vsel %vm313_vm4, %v1369_v53, %v1371_v12  ;;  %v1259_v57 = vsel %vm315_vm5, %v4622_v45, %v1258_v23 }
 0x13e   :  { %1602 = vrot.lane.b32.xlu1 %v1601_v6, %s4039_s16  ;;  %v3249_v49 = vld.sshfl [vmem:[#allocation2 + $0x26] sm:$0x1 pattern:$0x76325410]  ;;  %v1285_v14 = vsel %vm309_vm2, %v1284_v1, %v3241_v11  ;;  %v1373_v36 = vsel %vm315_vm5, %v1369_v53, %v1372_v24 }
 0x13f   :  { %v1399_v18 = vsel %vm309_vm2, %v1398_v16, %v3249_v49  ;;  %v3260_v21 = vld.sshfl [vmem:[#allocation2 + $0x6b] sm:$0x1 pattern:$0x76325410]  ;;  %v1286_v25 = vsel %vm311_vm3, %v1284_v1, %v1285_v14 }
 0x140   :  { %1517 = vrot.lane.b32.xlu0 %v1516_v17, %s4038_s15  ;;  %v3268_v13 = vld.sshfl [vmem:[#allocation2 + $0x6f] sm:$0x1 pattern:$0x76325410]  ;;  %v1400_v26 = vsel %vm311_vm3, %v1398_v16, %v1399_v18  ;;  %v1541_v32 = vrot.slane %v3260_v21, 7  ;;  %v1287_v37 = vsel %vm313_vm4, %v1284_v1, %v1286_v25 }
 0x141   :  { %v3243_v19 = vld.sshfl [vmem:[#allocation2 + $0x23] sm:$0x1 pattern:$0x76325410]  ;;  %v1655_v61 = vrot.slane %v3268_v13, 7  ;;  %v1401_v40 = vsel %vm313_vm4, %v1398_v16, %v1400_v26  ;;  %v1288_v45 = vsel %vm315_vm5, %v1284_v1, %v1287_v37 }
 0x142   :  { %1631 = vrot.lane.b32.xlu1 %v1630_v22, %s4038_s15  ;;  %v3251_v27 = vld.sshfl [vmem:[#allocation2 + $0x27] sm:$0x1 pattern:$0x76325410]  ;;  %v1314_v28 = vsel %vm309_vm2, %v1313_v15, %v3243_v19  ;;  %v1402_v53 = vsel %vm315_vm5, %v1398_v16, %v1401_v40 }
 0x143   :  { %v1428_v33 = vsel %vm309_vm2, %v1427_v20, %v3251_v27  ;;  %v3288_v4 = vld.sshfl [vmem:[#allocation2 + $0x79] sm:$0x1 pattern:$0x76325410]  ;;  %v1315_v41 = vsel %vm311_vm3, %v1313_v15, %v1314_v28 }
 0x144   :  { %1260 = vrot.lane.b32.xlu0 %v1259_v57, %s4039_s16  ;;  %v3267_v29 = vld.sshfl [vmem:[#allocation2 + $0x2f] sm:$0x1 pattern:$0x76325410]  ;;  %v1429_v43 = vsel %vm311_vm3, %v1427_v20, %v1428_v33  ;;  %v1939_v10 = vrot.slane %v3288_v4, 7  ;;  %v1316_v34 = vsel %vm313_vm4, %v1313_v15, %v1315_v41 }
 0x145   :  { %v3296_v38 = vld.sshfl [vmem:[#allocation2 + $0x7d] sm:$0x1 pattern:$0x76325410]  ;;  %v1656_v46 = vsel %vm309_vm2, %v1655_v61, %v3267_v29  ;;  %v1430_v54 = vsel %vm313_vm4, %v1427_v20, %v1429_v43  ;;  %v1317_v60 = vsel %vm315_vm5, %v1313_v15, %v1316_v34 }
 0x146   :  { %1374 = vrot.lane.b32.xlu1 %v1373_v36, %s4039_s16  ;;  %v3259_v42 = vld.sshfl [vmem:[#allocation2 + $0x2b] sm:$0x1 pattern:$0x76325410]  ;;  %v2053_v47 = vrot.slane %v3296_v38, 7  ;;  %v1657_v56 = vsel %vm311_vm3, %v1655_v61, %v1656_v46  ;;  %v1431_v1 = vsel %vm315_vm5, %v1427_v20, %v1430_v54 }
 0x147   :  { %v1542_v9 = vsel %vm309_vm2, %v1541_v32, %v3259_v42  ;;  %v3298_v44 = vld.sshfl [vmem:[#allocation2 + $0x7e] sm:$0x1 pattern:$0x76325410]  ;;  %v1658_v6 = vsel %vm313_vm4, %v1655_v61, %v1657_v56 }
 0x148   :  { %v3287_v48 = vld.sshfl [vmem:[#allocation2 + $0x39] sm:$0x1 pattern:$0x76325410]  ;;  %1289 = vrot.lane.b32.xlu0 %v1288_v45, %s4038_s15  ;;  %v1543_v55 = vsel %vm311_vm3, %v1541_v32, %v1542_v9  ;;  %v2082_v63 = vrot.slane %v3298_v44, 7  ;;  %v1659_v18 = vsel %vm315_vm5, %v1655_v61, %v1658_v6 }
 0x149   :  { %v3290_v51 = vld.sshfl [vmem:[#allocation2 + $0x7a] sm:$0x1 pattern:$0x76325410]  ;;  %v1940_v58 = vsel %vm309_vm2, %v1939_v10, %v3287_v48  ;;  %v1544_v2 = vsel %vm313_vm4, %v1541_v32, %v1543_v55 }
 0x14a   :  { %v3280_v35 = vld.sshfl [vmem:[#allocation2 + $0x75] sm:$0x1 pattern:$0x76325410]  ;;  %1403 = vrot.lane.b32.xlu1 %v1402_v53, %s4038_s15  ;;  %v1968_v59 = vrot.slane %v3290_v51, 7  ;;  %v1941_v7 = vsel %vm311_vm3, %v1939_v10, %v1940_v58  ;;  %v1545_v49 = vsel %vm315_vm5, %v1541_v32, %v1544_v2 }
 0x14b   :  { %v3272_v30 = vld.sshfl [vmem:[#allocation2 + $0x71] sm:$0x1 pattern:$0x76325410]  ;;  %v1825_v16 = vrot.slane %v3280_v35, 7  ;;  %v1942_v20 = vsel %vm313_vm4, %v1939_v10, %v1941_v7 }
 0x14c   :  { %v3295_v31 = vld.sshfl [vmem:[#allocation2 + $0x3d] sm:$0x1 pattern:$0x76325410]  ;;  %1318 = vrot.lane.b32.xlu0 %v1317_v60, %s4040_s0  ;;  %v1711_v39 = vrot.slane %v3272_v30, 7  ;;  %v1943_v28 = vsel %vm315_vm5, %v1939_v10, %v1942_v20 }
 0x14d   :  { %v2054_v62 = vsel %vm309_vm2, %v2053_v47, %v3295_v31  ;;  %v3282_v0 = vld.sshfl [vmem:[#allocation2 + $0x76] sm:$0x1 pattern:$0x76325410] }
 0x14e   :  { %v3297_v3 = vld.sshfl [vmem:[#allocation2 + $0x3e] sm:$0x1 pattern:$0x76325410]  ;;  %1432 = vrot.lane.b32.xlu1 %v1431_v1, %s4040_s0  ;;  %v2055_v50 = vsel %vm311_vm3, %v2053_v47, %v2054_v62  ;;  %v1854_v12 = vrot.slane %v3282_v0, 7 }
 0x14f   :  { %v3289_v5 = vld.sshfl [vmem:[#allocation2 + $0x3a] sm:$0x1 pattern:$0x76325410]  ;;  %v2083_v14 = vsel %vm309_vm2, %v2082_v63, %v3297_v3  ;;  %v2056_v13 = vsel %vm313_vm4, %v2053_v47, %v2055_v50 }
 0x150   :  { %v3274_v52 = vld.sshfl [vmem:[#allocation2 + $0x72] sm:$0x1 pattern:$0x76325410]  ;;  %v1969_v8 = vsel %vm309_vm2, %v1968_v59, %v3289_v5  ;;  %1546 = vrot.lane.b32.xlu0 %v1545_v49, %s4040_s0  ;;  %v2084_v19 = vsel %vm311_vm3, %v2082_v63, %v2083_v14  ;;  %v2057_v4 = vsel %vm315_vm5, %v2053_v47, %v2056_v13 }
 0x151   :  { %v3279_v11 = vld.sshfl [vmem:[#allocation2 + $0x35] sm:$0x1 pattern:$0x76325410]  ;;  %v1740_v17 = vrot.slane %v3274_v52, 7  ;;  %v1970_v24 = vsel %vm311_vm3, %v1968_v59, %v1969_v8  ;;  %v2085_v37 = vsel %vm313_vm4, %v2082_v63, %v2084_v19 }
 0x152   :  { %v3271_v15 = vld.sshfl [vmem:[#allocation2 + $0x31] sm:$0x1 pattern:$0x76325410]  ;;  %v1826_v21 = vsel %vm309_vm2, %v1825_v16, %v3279_v11  ;;  %1660 = vrot.lane.b32.xlu1 %v1659_v18, %s4040_s0  ;;  %v1971_v36 = vsel %vm313_vm4, %v1968_v59, %v1970_v24  ;;  %v2086_v48 = vsel %vm315_vm5, %v2082_v63, %v2085_v37 }
 0x153   :  { %v1712_v22 = vsel %vm309_vm2, %v1711_v39, %v3271_v15  ;;  %v3281_v23 = vld.sshfl [vmem:[#allocation2 + $0x36] sm:$0x1 pattern:$0x76325410]  ;;  %v1827_v32 = vsel %vm311_vm3, %v1825_v16, %v1826_v21  ;;  %v1972_v45 = vsel %vm315_vm5, %v1968_v59, %v1971_v36 }
 0x154   :  { %v3273_v25 = vld.sshfl [vmem:[#allocation2 + $0x32] sm:$0x1 pattern:$0x76325410]  ;;  %v1855_v26 = vsel %vm309_vm2, %v1854_v12, %v3281_v23  ;;  %v1713_v57 = vsel %vm311_vm3, %v1711_v39, %v1712_v22  ;;  %1944 = vrot.lane.b32.xlu0 %v1943_v28, %s4039_s16  ;;  %v1828_v40 = vsel %vm313_vm4, %v1825_v16, %v1827_v32 }
 0x155   :  { %v3284_v27 = vld.sshfl [vmem:[#allocation2 + $0x77] sm:$0x1 pattern:$0x76325410]  ;;  %v1741_v33 = vsel %vm309_vm2, %v1740_v17, %v3273_v25  ;;  %v1856_v29 = vsel %vm311_vm3, %v1854_v12, %v1855_v26  ;;  %v1714_v41 = vsel %vm313_vm4, %v1711_v39, %v1713_v57  ;;  %v1829_v35 = vsel %vm315_vm5, %v1825_v16, %v1828_v40 }
 0x156   :  { %v3276_v61 = vld.sshfl [vmem:[#allocation2 + $0x73] sm:$0x1 pattern:$0x76325410]  ;;  %2058 = vrot.lane.b32.xlu1 %v2057_v4, %s4039_s16  ;;  %v4729_v38 = vrot.slane %v3284_v27, 7  ;;  %v1742_v42 = vsel %vm311_vm3, %v1740_v17, %v1741_v33  ;;  %v1857_v51 = vsel %vm313_vm4, %v1854_v12, %v1856_v29  ;;  %v1715_v54 = vsel %vm315_vm5, %v1711_v39, %v1714_v41 }
 0x157   :  { %v3283_v43 = vld.sshfl [vmem:[#allocation2 + $0x37] sm:$0x1 pattern:$0x76325410]  ;;  %v4734_v9 = vrot.slane %v3276_v61, 7  ;;  %v1743_v55 = vsel %vm313_vm4, %v1740_v17, %v1742_v42  ;;  %v1858_v63 = vsel %vm315_vm5, %v1854_v12, %v1857_v51 }
 0x158   :  { %v3300_v10 = vld.sshfl [vmem:[#allocation2 + $0x7f] sm:$0x1 pattern:$0x76325410]  ;;  %1973 = vrot.lane.b32.xlu0 %v1972_v45, %s4038_s15  ;;  %v1884_v30 = vsel %vm309_vm2, %v4729_v38, %v3283_v43  ;;  %v1744_v16 = vsel %vm315_vm5, %v1740_v17, %v1743_v55 }
 0x159   :  { %v3292_v44 = vld.sshfl [vmem:[#allocation2 + $0x7b] sm:$0x1 pattern:$0x76325410]  ;;  %v4752_v0 = vrot.slane %v3300_v10, 7  ;;  %v1885_v39 = vsel %vm311_vm3, %v4729_v38, %v1884_v30 }
 0x15a   :  { %v3275_v46 = vld.sshfl [vmem:[#allocation2 + $0x33] sm:$0x1 pattern:$0x76325410]  ;;  %2087 = vrot.lane.b32.xlu1 %v2086_v48, %s4038_s15  ;;  %v4748_v58 = vrot.slane %v3292_v44, 7  ;;  %v1886_v22 = vsel %vm313_vm4, %v4729_v38, %v1885_v39 }
 0x15b   :  { %v3190_v47 = vld.sshfl [vmem:[#allocation2 + $0x48] sm:$0x1 pattern:$0x76325410]  ;;  %v1770_v31 = vsel %vm309_vm2, %v4734_v9, %v3275_v46  ;;  %v1887_v41 = vsel %vm315_vm5, %v4729_v38, %v1886_v22 }
 0x15c   :  { %v3189_v53 = vld.sshfl [vmem:[#allocation2 + $0x8] sm:$0x1 pattern:$0x76325410]  ;;  %v544_v34 = vrot.slane %v3190_v47, 7  ;;  %1716 = vrot.lane.b32.xlu0 %v1715_v54, %s4039_s16  ;;  %v1771_v8 = vsel %vm311_vm3, %v4734_v9, %v1770_v31 }
 0x15d   :  { %v3198_v56 = vld.sshfl [vmem:[#allocation2 + $0x4c] sm:$0x1 pattern:$0x76325410]  ;;  %v1772_v19 = vsel %vm313_vm4, %v4734_v9, %v1771_v8 }
 0x15e   :  { %v545_v59 = vsel %vm309_vm2, %v544_v34, %v3189_v53  ;;  %v658_v60 = vrot.slane %v3198_v56, 7  ;;  %v3174_v62 = vld.sshfl [vmem:[#allocation2 + $0x40] sm:$0x1 pattern:$0x76325410]  ;;  %1830 = vrot.lane.b32.xlu1 %v1829_v35, %s4039_s16  ;;  %v1773_v42 = vsel %vm315_vm5, %v4734_v9, %v1772_v19 }
 0x15f   :  { %v3291_v1 = vld.sshfl [vmem:[#allocation2 + $0x3b] sm:$0x1 pattern:$0x76325410]  ;;  %v546_v2 = vsel %vm311_vm3, %v544_v34, %v545_v59  ;;  %v308_v5 = vrot.slane %v3174_v62, 7 }
 0x160   :  { %v3197_v3 = vld.sshfl [vmem:[#allocation2 + $0xc] sm:$0x1 pattern:$0x76325410]  ;;  %v547_v7 = vsel %vm313_vm4, %v544_v34, %v546_v2  ;;  %v1998_v15 = vsel %vm309_vm2, %v4748_v58, %v3291_v1  ;;  %1745 = vrot.lane.b32.xlu0 %v1744_v16, %s4038_s15 }
 0x161   :  { %v3299_v6 = vld.sshfl [vmem:[#allocation2 + $0x3f] sm:$0x1 pattern:$0x76325410]  ;;  %v659_v52 = vsel %vm309_vm2, %v658_v60, %v3197_v3  ;;  %v548_v11 = vsel %vm315_vm5, %v544_v34, %v547_v7  ;;  %v1999_v57 = vsel %vm311_vm3, %v4748_v58, %v1998_v15 }
 0x162   :  { %v3173_v50 = vld.sshfl [vmem:[#allocation2] sm:$0x1 pattern:$0x76325410]  ;;  %v660_v12 = vsel %vm311_vm3, %v658_v60, %v659_v52  ;;  %550 = vst.msk [vmem:[#allocation3 + $0x4] sm:$0x3] %vm318_vm6, %v548_v11  ;;  %v2112_v23 = vsel %vm309_vm2, %v4752_v0, %v3299_v6  ;;  %1859 = vrot.lane.b32.xlu1 %v1858_v63, %s4038_s15  ;;  %v2000_v45 = vsel %vm313_vm4, %v4748_v58, %v1999_v57 }
 0x163   :  { %v310_v49 = vsel %vm309_vm2, %v308_v5, %v3173_v50  ;;  %v3182_v14 = vld.sshfl [vmem:[#allocation2 + $0x44] sm:$0x1 pattern:$0x76325410]  ;;  %v661_v17 = vsel %vm313_vm4, %v658_v60, %v660_v12  ;;  %v2113_v4 = vsel %vm311_vm3, %v4752_v0, %v2112_v23  ;;  %v2001_v56 = vsel %vm315_vm5, %v4748_v58, %v2000_v45 }
 0x164   :  { %v312_v18 = vsel %vm311_vm3, %v308_v5, %v310_v49  ;;  %v3181_v20 = vld.sshfl [vmem:[#allocation2 + $0x4] sm:$0x1 pattern:$0x76325410]  ;;  %v430_v21 = vrot.slane %v3182_v14, 7  ;;  %v662_v13 = vsel %vm315_vm5, %v658_v60, %v661_v17  ;;  %1774 = vrot.lane.b32.xlu0 %v1773_v42, %s4040_s0  ;;  %v2114_v9 = vsel %vm313_vm4, %v4752_v0, %v2113_v4 }
 0x165   :  { %v314_v24 = vsel %vm313_vm4, %v308_v5, %v312_v18  ;;  %v3230_v25 = vld.sshfl [vmem:[#allocation2 + $0x5c] sm:$0x1 pattern:$0x76325410]  ;;  %664 = vst.msk [vmem:[#allocation3 + $0x6] sm:$0x3] %vm318_vm6, %v662_v13  ;;  %v2115_v62 = vsel %vm315_vm5, %v4752_v0, %v2114_v9 }
 0x166   :  { %v316_v26 = vsel %vm315_vm5, %v308_v5, %v314_v24  ;;  %v431_v27 = vsel %vm309_vm2, %v430_v21, %v3181_v20  ;;  %v3229_v28 = vld.sshfl [vmem:[#allocation2 + $0x1c] sm:$0x1 pattern:$0x76325410]  ;;  %v1114_v32 = vrot.slane %v3230_v25, 7  ;;  %1888 = vrot.lane.b32.xlu1 %v1887_v41, %s4040_s0 }
 0x167   :  { %319 = vst.msk [vmem:[#allocation3] sm:$0x3] %vm318_vm6, %v316_v26  ;;  %v432_v33 = vsel %vm311_vm3, %v430_v21, %v431_v27  ;;  %v3222_v61 = vld.sshfl [vmem:[#allocation2 + $0x58] sm:$0x1 pattern:$0x76325410] }
 0x168   :  { %v433_v36 = vsel %vm313_vm4, %v430_v21, %v432_v33  ;;  %v1115_v37 = vsel %vm309_vm2, %v1114_v32, %v3229_v28  ;;  %v3221_v29 = vld.sshfl [vmem:[#allocation2 + $0x18] sm:$0x1 pattern:$0x76325410]  ;;  %v1000_v40 = vrot.slane %v3222_v61, 7  ;;  %2002 = vrot.lane.b32.xlu0 %v2001_v56, %s4040_s0 }
 0x169   :  { %v434_v43 = vsel %vm315_vm5, %v430_v21, %v433_v36  ;;  %v1116_v10 = vsel %vm311_vm3, %v1114_v32, %v1115_v37  ;;  %v3214_v44 = vld.sshfl [vmem:[#allocation2 + $0x54] sm:$0x1 pattern:$0x76325410] }
 0x16a   :  { %436 = vst.msk [vmem:[#allocation3 + $0x2] sm:$0x3] %vm318_vm6, %v434_v43  ;;  %v1117_v46 = vsel %vm313_vm4, %v1114_v32, %v1116_v10  ;;  %v1001_v47 = vsel %vm309_vm2, %v1000_v40, %v3221_v29  ;;  %v3213_v38 = vld.sshfl [vmem:[#allocation2 + $0x14] sm:$0x1 pattern:$0x76325410]  ;;  %2116 = vrot.lane.b32.xlu1 %v2115_v62, %s4040_s0 }
 0x16b   :  { %v886_v48 = vrot.slane %v3214_v44, 7  ;;  %v1118_v51 = vsel %vm315_vm5, %v1114_v32, %v1117_v46  ;;  %v1002_v53 = vsel %vm311_vm3, %v1000_v40, %v1001_v47  ;;  %v3206_v34 = vld.sshfl [vmem:[#allocation2 + $0x50] sm:$0x1 pattern:$0x76325410] }
 0x16c   :  { %1120 = vst.msk [vmem:[#allocation3 + $0xe] sm:$0x3] %vm318_vm6, %v1118_v51  ;;  %v1003_v35 = vsel %vm313_vm4, %v1000_v40, %v1002_v53  ;;  %v3205_v55 = vld.sshfl [vmem:[#allocation2 + $0x10] sm:$0x1 pattern:$0x76325410] }
 0x16d   :  { %v887_v54 = vsel %vm309_vm2, %v886_v48, %v3213_v38  ;;  %v772_v30 = vrot.slane %v3206_v34, 7  ;;  %v1004_v31 = vsel %vm315_vm5, %v1000_v40, %v1003_v35  ;;  %v3262_v60 = vld.sshfl [vmem:[#allocation2 + $0x6c] sm:$0x1 pattern:$0x76325410] }
 0x16e   :  { %v888_v59 = vsel %vm311_vm3, %v886_v48, %v887_v54  ;;  %1006 = vst.msk [vmem:[#allocation3 + $0xc] sm:$0x3] %vm318_vm6, %v1004_v31  ;;  %v3261_v2 = vld.sshfl [vmem:[#allocation2 + $0x2c] sm:$0x1 pattern:$0x76325410] }
 0x16f   :  { %v889_v63 = vsel %vm313_vm4, %v886_v48, %v888_v59  ;;  %v773_v1 = vsel %vm309_vm2, %v772_v30, %v3205_v55  ;;  %v1570_v3 = vrot.slane %v3262_v60, 7  ;;  %v3254_v16 = vld.sshfl [vmem:[#allocation2 + $0x68] sm:$0x1 pattern:$0x76325410] }
 0x170   :  { %v890_v58 = vsel %vm315_vm5, %v886_v48, %v889_v63  ;;  %v774_v5 = vsel %vm311_vm3, %v772_v30, %v773_v1  ;;  %v3253_v6 = vld.sshfl [vmem:[#allocation2 + $0x28] sm:$0x1 pattern:$0x76325410]  ;;  %v1456_v7 = vrot.slane %v3254_v16, 7 }
 0x171   :  { %892 = vst.msk [vmem:[#allocation3 + $0xa] sm:$0x3] %vm318_vm6, %v890_v58  ;;  %v775_v0 = vsel %vm313_vm4, %v772_v30, %v774_v5  ;;  %v1571_v39 = vsel %vm309_vm2, %v1570_v3, %v3261_v2  ;;  %v3246_v8 = vld.sshfl [vmem:[#allocation2 + $0x64] sm:$0x1 pattern:$0x76325410] }
 0x172   :  { %v776_v52 = vsel %vm315_vm5, %v772_v30, %v775_v0  ;;  %v1572_v50 = vsel %vm311_vm3, %v1570_v3, %v1571_v39  ;;  %v1457_v12 = vsel %vm309_vm2, %v1456_v7, %v3253_v6  ;;  %v3245_v49 = vld.sshfl [vmem:[#allocation2 + $0x24] sm:$0x1 pattern:$0x76325410]  ;;  %v1342_v14 = vrot.slane %v3246_v8, 7 }
 0x173   :  { %778 = vst.msk [vmem:[#allocation3 + $0x8] sm:$0x3] %vm318_vm6, %v776_v52  ;;  %v1573_v11 = vsel %vm313_vm4, %v1570_v3, %v1572_v50  ;;  %v1458_v17 = vsel %vm311_vm3, %v1456_v7, %v1457_v12  ;;  %v3238_v18 = vld.sshfl [vmem:[#allocation2 + $0x60] sm:$0x1 pattern:$0x76325410]  ;;  %v2395_v6 = vlaneseq }
 0x174   :  { %v1574_v15 = vsel %vm315_vm5, %v1570_v3, %v1573_v11  ;;  %v1459_v20 = vsel %vm313_vm4, %v1456_v7, %v1458_v17  ;;  %v1343_v21 = vsel %vm309_vm2, %v1342_v14, %v3245_v49  ;;  %v3237_v22 = vld.sshfl [vmem:[#allocation2 + $0x20] sm:$0x1 pattern:$0x76325410]  ;;  %v1228_v23 = vrot.slane %v3238_v18, 7 }
 0x175   :  { %1576 = vst.msk [vmem:[#allocation3 + $0x16] sm:$0x3] %vm318_vm6, %v1574_v15  ;;  %v1460_v13 = vsel %vm315_vm5, %v1456_v7, %v1459_v20  ;;  %v1344_v24 = vsel %vm311_vm3, %v1342_v14, %v1343_v21  ;;  %v3294_v25 = vld.sshfl [vmem:[#allocation2 + $0x7c] sm:$0x1 pattern:$0x76325410] }
 0x176   :  { %1462 = vst.msk [vmem:[#allocation3 + $0x14] sm:$0x3] %vm318_vm6, %v1460_v13  ;;  %v1345_v19 = vsel %vm313_vm4, %v1342_v14, %v1344_v24  ;;  %v1229_v26 = vsel %vm309_vm2, %v1228_v23, %v3237_v22  ;;  %v3293_v27 = vld.sshfl [vmem:[#allocation2 + $0x3c] sm:$0x1 pattern:$0x76325410] }
 0x177   :  { %v2026_v28 = vrot.slane %v3294_v25, 7  ;;  %v1346_v32 = vsel %vm315_vm5, %v1342_v14, %v1345_v19  ;;  %v1230_v57 = vsel %vm311_vm3, %v1228_v23, %v1229_v26  ;;  %v3286_v33 = vld.sshfl [vmem:[#allocation2 + $0x78] sm:$0x1 pattern:$0x76325410]  ;;  %v2396_v8 = vshrl.u32 %v2395_v6, 7 }
 0x178   :  { %1348 = vst.msk [vmem:[#allocation3 + $0x12] sm:$0x3] %vm318_vm6, %v1346_v32  ;;  %v1231_v61 = vsel %vm313_vm4, %v1228_v23, %v1230_v57  ;;  %v1912_v36 = vrot.slane %v3286_v33, 7  ;;  %v4041_v0 = vmov 1983009808   ;;  %v2188_v18 = vld [vmem:[%s5594_s3 + $0x200] sm:$0xff] }
 0x179   :  { %v2027_v4 = vsel %vm309_vm2, %v2026_v28, %v3293_v27  ;;  %v1232_v37 = vsel %vm315_vm5, %v1228_v23, %v1231_v61  ;;  %v3285_v40 = vld.sshfl [vmem:[#allocation2 + $0x38] sm:$0x1 pattern:$0x76325410]  ;;  %v2393_v39 = vunpack.c.l.s4 %v4041_v0  ;;  %v2189_v20 = vld [vmem:[%s5594_s3 + $0x208] sm:$0xff]  ;;  %v2206_v23 = vld [vmem:[%s5594_s3 + $0x290] sm:$0xff] }
 0x17a   :  { %v2028_v29 = vsel %vm311_vm3, %v2026_v28, %v2027_v4  ;;  %1234 = vst.msk [vmem:[#allocation3 + $0x10] sm:$0x3] %vm318_vm6, %v1232_v37  ;;  %v1913_v42 = vsel %vm309_vm2, %v1912_v36, %v3285_v40  ;;  %v3278_v43 = vld.sshfl [vmem:[#allocation2 + $0x74] sm:$0x1 pattern:$0x76325410]  ;;  %v3784_v27 = vpack.c.bf16 %v2189_v20, %v2188_v18 }
 0x17b   :  { %v2029_v41 = vsel %vm313_vm4, %v2026_v28, %v2028_v29  ;;  %v1914_v44 = vsel %vm311_vm3, %v1912_v36, %v1913_v42  ;;  %v3277_v45 = vld.sshfl [vmem:[#allocation2 + $0x34] sm:$0x1 pattern:$0x76325410]  ;;  %v1798_v46 = vrot.slane %v3278_v43, 7  ;;  %v2394_v50 = vunpack.c.0.s8 %v2393_v39  ;;  %v2207_v13 = vld [vmem:[%s5594_s3 + $0x298] sm:$0xff] }
 0x17c   :  { %v2030_v10 = vsel %vm315_vm5, %v2026_v28, %v2029_v41  ;;  %v1915_v47 = vsel %vm313_vm4, %v1912_v36, %v1914_v44  ;;  %v3270_v38 = vld.sshfl [vmem:[#allocation2 + $0x70] sm:$0x1 pattern:$0x76325410]  ;;  %v2220_v24 = vld [vmem:[%s5594_s3 + $0x300] sm:$0xff]  ;;  %v2221_v25 = vld [vmem:[%s5594_s3 + $0x308] sm:$0xff]  ;;  %v3786_v61 = vpack.c.bf16 %v2207_v13, %v2206_v23 }
 0x17d   :  { %2032 = vst.msk [vmem:[#allocation3 + $0x1e] sm:$0x3] %vm318_vm6, %v2030_v10  ;;  %v1916_v48 = vsel %vm315_vm5, %v1912_v36, %v1915_v47  ;;  %v1799_v9 = vsel %vm309_vm2, %v1798_v46, %v3277_v45  ;;  %v1684_v51 = vrot.slane %v3270_v38, 7  ;;  %v4884_v49 = vsub.s32 %v2394_v50, %v2396_v8  ;;  %v2238_v32 = vld [vmem:[%s5594_s3 + $0x390] sm:$0xff]  ;;  %v2239_v57 = vld [vmem:[%s5594_s3 + $0x398] sm:$0xff]  ;;  %v2208_v40 = vld [vmem:[%s5594_s3 + $0x2a0] sm:$0xff] }
 0x17e   :  { %1918 = vst.msk [vmem:[#allocation3 + $0x1c] sm:$0x3] %vm318_vm6, %v1916_v48  ;;  %v1800_v53 = vsel %vm311_vm3, %v1798_v46, %v1799_v9  ;;  %v3269_v34 = vld.sshfl [vmem:[#allocation2 + $0x30] sm:$0x1 pattern:$0x76325410]  ;;  %v606_v59 = vpop.permute.xlu0 %605  ;;  %v3816_v29 = vpack.c.bf16 %v2221_v25, %v2220_v24  ;;  %v3818_v42 = vpack.c.bf16 %v2239_v57, %v2238_v32 }
 0x17f   :  { %v1801_v35 = vsel %vm313_vm4, %v1798_v46, %v1800_v53  ;;  %v1685_v54 = vsel %vm309_vm2, %v1684_v51, %v3269_v34  ;;  %v2190_v4 = vld [vmem:[%s5594_s3 + $0x210] sm:$0xff]  ;;  %v2191_v36 = vld [vmem:[%s5594_s3 + $0x218] sm:$0xff]  ;;  %v2209_v41 = vld [vmem:[%s5594_s3 + $0x2a8] sm:$0xff] }
 0x180   :  { %v1802_v55 = vsel %vm315_vm5, %v1798_v46, %v1801_v35  ;;  %v1686_v30 = vsel %vm311_vm3, %v1684_v51, %v1685_v54  ;;  %v577_v60 = vpop.permute.xlu1 %576  ;;  %v2222_v43 = vld [vmem:[%s5594_s3 + $0x310] sm:$0xff]  ;;  %v2223_v10 = vld [vmem:[%s5594_s3 + $0x318] sm:$0xff]  ;;  %v3788_v45 = vpack.c.bf16 %v2191_v36, %v2190_v4  ;;  %v2240_v46 = vld [vmem:[%s5594_s3 + $0x3a0] sm:$0xff]  ;;  %v3790_v48 = vpack.c.bf16 %v2209_v41, %v2208_v40 }
 0x181   :  { %1804 = vst.msk [vmem:[#allocation3 + $0x1a] sm:$0x3] %vm318_vm6, %v1802_v55  ;;  %v1687_v56 = vsel %vm313_vm4, %v1684_v51, %v1686_v30  ;;  %v2241_v47 = vld [vmem:[%s5594_s3 + $0x3a8] sm:$0xff]  ;;  %v2192_v9 = vld [vmem:[%s5594_s3 + $0x220] sm:$0xff]  ;;  %v3820_v53 = vpack.c.bf16 %v2223_v10, %v2222_v43  ;;  %v2210_v34 = vld [vmem:[%s5594_s3 + $0x2b0] sm:$0xff] }
 0x182   :  { %v1688_v31 = vsel %vm315_vm5, %v1684_v51, %v1687_v56  ;;  %579 = vst.msk [vmem:[#allocation3 + $0x4] sm:$0x3] %vm348_vm7, %v577_v60  ;;  %v346_v62 = vpop.permute.xlu0 %345  ;;  %v2193_v51 = vld [vmem:[%s5594_s3 + $0x228] sm:$0xff]  ;;  %v2211_v35 = vld [vmem:[%s5594_s3 + $0x2b8] sm:$0xff]  ;;  %v3822_v54 = vpack.c.bf16 %v2241_v47, %v2240_v46  ;;  %v2224_v55 = vld [vmem:[%s5594_s3 + $0x320] sm:$0xff] }
 0x183   :  { %1690 = vst.msk [vmem:[#allocation3 + $0x18] sm:$0x3] %vm318_vm6, %v1688_v31  ;;  %v2225_v30 = vld [vmem:[%s5594_s3 + $0x328] sm:$0xff]  ;;  %v3792_v31 = vpack.c.bf16 %v2193_v51, %v2192_v9  ;;  %v2243_v60 = vld [vmem:[%s5594_s3 + $0x3b8] sm:$0xff]  ;;  %v2226_v0 = vld [vmem:[%s5594_s3 + $0x330] sm:$0xff] }
 0x184   :  { %608 = vst.msk [vmem:[#allocation3 + $0x4] sm:$0x3] %vm378_vm8, %v606_v59  ;;  %v691_v63 = vpop.permute.xlu1 %690  ;;  %v2242_v59 = vld [vmem:[%s5594_s3 + $0x3b0] sm:$0xff]  ;;  %v2227_v39 = vld [vmem:[%s5594_s3 + $0x338] sm:$0xff]  ;;  %v2245_v50 = vld [vmem:[%s5594_s3 + $0x3c8] sm:$0xff] }
 0x185   :  { %349 = vst.msk [vmem:[#allocation3] sm:$0x3] %vm348_vm7, %v346_v62  ;;  %693 = vst.msk [vmem:[#allocation3 + $0x6] sm:$0x3] %vm348_vm7, %v691_v63  ;;  %v3794_v63 = vpack.c.bf16 %v2211_v35, %v2210_v34  ;;  %v2215_v18 = vld [vmem:[%s5594_s3 + $0x2d8] sm:$0xff]  ;;  %v2246_v24 = vld [vmem:[%s5594_s3 + $0x3d0] sm:$0xff] }
 0x186   :  { %v463_v1 = vpop.permute.xlu0 %462  ;;  %v2247_v25 = vld [vmem:[%s5594_s3 + $0x3d8] sm:$0xff]  ;;  %v2216_v57 = vld [vmem:[%s5594_s3 + $0x2e0] sm:$0xff]  ;;  %v2230_v4 = vld [vmem:[%s5594_s3 + $0x350] sm:$0xff] }
 0x187   :  { %465 = vst.msk [vmem:[#allocation3 + $0x2] sm:$0x3] %vm348_vm7, %v463_v1  ;;  %v2194_v1 = vld [vmem:[%s5594_s3 + $0x230] sm:$0xff]  ;;  %v2231_v36 = vld [vmem:[%s5594_s3 + $0x358] sm:$0xff]  ;;  %v2248_v40 = vld [vmem:[%s5594_s3 + $0x3e0] sm:$0xff] }
 0x188   :  { %v720_v2 = vpop.permute.xlu1 %719  ;;  %v2249_v41 = vld [vmem:[%s5594_s3 + $0x3e8] sm:$0xff]  ;;  %v3836_v46 = vpack.c.bf16 %v2231_v36, %v2230_v4  ;;  %v2219_v9 = vld [vmem:[%s5594_s3 + $0x2f8] sm:$0xff] }
 0x189   :  { %722 = vst.msk [vmem:[#allocation3 + $0x6] sm:$0x3] %vm378_vm8, %v720_v2  ;;  %v2195_v2 = vld [vmem:[%s5594_s3 + $0x238] sm:$0xff]  ;;  %v3838_v51 = vpack.c.bf16 %v2249_v41, %v2248_v40  ;;  %v2233_v34 = vld [vmem:[%s5594_s3 + $0x368] sm:$0xff] }
 0x18a   :  { %v376_v3 = vpop.permute.xlu0 %375  ;;  %v2287_v4 = vld [vmem:[%s5594_s3 + $0x518] sm:$0xff]  ;;  %v2305_v40 = vld [vmem:[%s5594_s3 + $0x5a8] sm:$0xff] }
 0x18b   :  { %379 = vst.msk [vmem:[#allocation3] sm:$0x3] %vm378_vm8, %v376_v3  ;;  %v3824_v3 = vpack.c.bf16 %v2225_v30, %v2224_v55 }
 0x18c   :  { %v492_v58 = vpop.permute.xlu1 %491 }
 0x18d   :  { %494 = vst.msk [vmem:[#allocation3 + $0x2] sm:$0x3] %vm378_vm8, %v492_v58  ;;  %v2212_v58 = vld [vmem:[%s5594_s3 + $0x2c0] sm:$0xff] }
 0x18e   :  { %v406_v5 = vpop.permute.xlu0 %405 }
 0x18f   :  { %409 = vst.msk [vmem:[#allocation3] sm:$0x3] %vm408_vm9, %v406_v5  ;;  %v2213_v5 = vld [vmem:[%s5594_s3 + $0x2c8] sm:$0xff] }
 0x190   :  { %v521_v16 = vpop.permute.xlu1 %520 }
 0x191   :  { %523 = vst.msk [vmem:[#allocation3 + $0x2] sm:$0x3] %vm408_vm9, %v521_v16  ;;  %v3826_v16 = vpack.c.bf16 %v2243_v60, %v2242_v59 }
 0x192   :  { %v635_v7 = vpop.permute.xlu0 %634 }
 0x193   :  { %637 = vst.msk [vmem:[#allocation3 + $0x4] sm:$0x3] %vm408_vm9, %v635_v7  ;;  %v3796_v7 = vpack.c.bf16 %v2195_v2, %v2194_v1 }
 0x194   :  { %v749_v52 = vpop.permute.xlu1 %748 }
 0x195   :  { %751 = vst.msk [vmem:[#allocation3 + $0x6] sm:$0x3] %vm408_vm9, %v749_v52  ;;  %v2244_v52 = vld [vmem:[%s5594_s3 + $0x3c0] sm:$0xff] }
 0x196   :  { %v1033_v11 = vpop.permute.xlu0 %1032  ;;  %v3830_v20 = vpack.c.bf16 %v2245_v50, %v2244_v52  ;;  %v2301_v52 = vld [vmem:[%s5594_s3 + $0x588] sm:$0xff] }
 0x197   :  { %1035 = vst.msk [vmem:[#allocation3 + $0xc] sm:$0x3] %vm348_vm7, %v1033_v11  ;;  %v3798_v11 = vpack.c.bf16 %v2213_v5, %v2212_v58  ;;  %v2269_v58 = vld [vmem:[%s5594_s3 + $0x488] sm:$0xff] }
 0x198   :  { %v1147_v12 = vpop.permute.xlu1 %1146 }
 0x199   :  { %1149 = vst.msk [vmem:[#allocation3 + $0xe] sm:$0x3] %vm348_vm7, %v1147_v12  ;;  %v2196_v12 = vld [vmem:[%s5594_s3 + $0x240] sm:$0xff] }
 0x19a   :  { %v1062_v14 = vpop.permute.xlu0 %1061 }
 0x19b   :  { %1064 = vst.msk [vmem:[#allocation3 + $0xc] sm:$0x3] %vm378_vm8, %v1062_v14  ;;  %v2197_v14 = vld [vmem:[%s5594_s3 + $0x248] sm:$0xff] }
 0x19c   :  { %v1176_v15 = vpop.permute.xlu1 %1175  ;;  %v2120_v17 = vld [vmem:[#allocation3] sm:$0xff]  ;;  %v3800_v13 = vpack.c.bf16 %v2197_v14, %v2196_v12  ;;  %v2253_v12 = vld [vmem:[%s5594_s3 + $0x408] sm:$0xff] }
 0x19d   :  { %1178 = vst.msk [vmem:[#allocation3 + $0xe] sm:$0x3] %vm378_vm8, %v1176_v15  ;;  %v2391_v21 = vcombine.high %v2120_v17, %v2120_v17  ;;  %v2398_v22 = vrot.slane %v2120_v17, %v4884_v49  ;;  %v3828_v15 = vpack.c.bf16 %v2227_v39, %v2226_v0  ;;  %v2214_v17 = vld [vmem:[%s5594_s3 + $0x2d0] sm:$0xff]  ;;  %v2235_v0 = vld [vmem:[%s5594_s3 + $0x378] sm:$0xff] }
 0x19e   :  { %v805_v19 = vpop.permute.xlu0 %804 }
 0x19f   :  { %v2406_v26 = vcombine.high %v2398_v22, %v2398_v22  ;;  %v2405_v28 = vrot.slane %v2391_v21, %v4884_v49  ;;  %807 = vst.msk [vmem:[#allocation3 + $0x8] sm:$0x3] %vm348_vm7, %v805_v19  ;;  %v2228_v21 = vld [vmem:[%s5594_s3 + $0x340] sm:$0xff] }
 0x1a0   :  { %v919_v33 = vpop.permute.xlu1 %918 }
 0x1a1   :  { %921 = vst.msk [vmem:[#allocation3 + $0xa] sm:$0x3] %vm348_vm7, %v919_v33  ;;  %2539 = vmatprep.mubr.f32.mxu1 %v2406_v26  ;;  %v2407_v37 = vcombine.high %v2405_v28, %v2405_v28  ;;  %v3802_v26 = vpack.c.bf16 %v2215_v18, %v2214_v17  ;;  %v2217_v33 = vld [vmem:[%s5594_s3 + $0x2e8] sm:$0xff]  ;;  %v2271_v17 = vld [vmem:[%s5594_s3 + $0x498] sm:$0xff] }
 0x1a2   :  { %2540 = vmatmul.mubr.f32.vlgmr.msra.gmra.mrb[0].mxu1 %v2398_v22  ;;  %v834_v44 = vpop.permute.xlu0 %833  ;;  %v2229_v22 = vld [vmem:[%s5594_s3 + $0x348] sm:$0xff]  ;;  %v3806_v43 = vpack.c.bf16 %v2217_v33, %v2216_v57 }
 0x1a3   :  { %3785 = vmatpush3.bf16.msra.mxu1 %v3784_v27  ;;  %2609 = vmatprep.mubr.f32.mxu0 %v2407_v37  ;;  %836 = vst.msk [vmem:[#allocation3 + $0x8] sm:$0x3] %vm378_vm8, %v834_v44  ;;  %v2198_v27 = vld [vmem:[%s5594_s3 + $0x250] sm:$0xff]  ;;  %v3832_v32 = vpack.c.bf16 %v2229_v22, %v2228_v21  ;;  %v2200_v44 = vld [vmem:[%s5594_s3 + $0x260] sm:$0xff]  ;;  %v2285_v21 = vld [vmem:[%s5594_s3 + $0x508] sm:$0xff] }
 0x1a4   :  { %v948_v38 = vpop.permute.xlu1 %947  ;;  %2610 = vmatmul.mubr.f32.vlgmr.msra.gmra.mrb[16].mxu0 %v2405_v28  ;;  %3787 = vmatprep.subr.bf16.mxu1 %v3786_v61  ;;  %v2199_v28 = vld [vmem:[%s5594_s3 + $0x258] sm:$0xff]  ;;  %v3834_v61 = vpack.c.bf16 %v2247_v25, %v2246_v24  ;;  %v2273_v57 = vld [vmem:[%s5594_s3 + $0x4a8] sm:$0xff] }
 0x1a5   :  { %950 = vst.msk [vmem:[#allocation3 + $0xa] sm:$0x3] %vm378_vm8, %v948_v38  ;;  %3817 = vmatpush3.bf16.msra.mxu0 %v3816_v29  ;;  %v3804_v29 = vpack.c.bf16 %v2199_v28, %v2198_v27  ;;  %v2303_v24 = vld [vmem:[%s5594_s3 + $0x598] sm:$0xff] }
 0x1a6   :  { %3819 = vmatprep.subr.bf16.mxu0 %v3818_v42  ;;  %v863_v56 = vpop.permute.xlu0 %862  ;;  %v2255_v27 = vld [vmem:[%s5594_s3 + $0x418] sm:$0xff] }
 0x1a7   :  { %3789 = vmatpush3.bf16.msra.mxu1 %v3788_v45  ;;  %865 = vst.msk [vmem:[#allocation3 + $0x8] sm:$0x3] %vm408_vm9, %v863_v56  ;;  %v2201_v45 = vld [vmem:[%s5594_s3 + $0x268] sm:$0xff]  ;;  %v2250_v56 = vld [vmem:[%s5594_s3 + $0x3f0] sm:$0xff] }
 0x1a8   :  { %v977_v62 = vpop.permute.xlu1 %976  ;;  %3791 = vmatprep.subr.bf16.mxu1 %v3790_v48  ;;  %v2218_v48 = vld [vmem:[%s5594_s3 + $0x2f0] sm:$0xff]  ;;  %v3808_v55 = vpack.c.bf16 %v2201_v45, %v2200_v44 }
 0x1a9   :  { %979 = vst.msk [vmem:[#allocation3 + $0xa] sm:$0x3] %vm408_vm9, %v977_v62  ;;  %3821 = vmatpush3.bf16.msra.mxu0 %v3820_v53  ;;  %v2232_v53 = vld [vmem:[%s5594_s3 + $0x360] sm:$0xff]  ;;  %v3810_v60 = vpack.c.bf16 %v2219_v9, %v2218_v48  ;;  %v2202_v62 = vld [vmem:[%s5594_s3 + $0x270] sm:$0xff]  ;;  %v2289_v48 = vld [vmem:[%s5594_s3 + $0x528] sm:$0xff] }
 0x1aa   :  { %3823 = vmatprep.subr.bf16.mxu0 %v3822_v54  ;;  %v1091_v6 = vpop.permute.xlu0 %1090  ;;  %v3840_v2 = vpack.c.bf16 %v2233_v34, %v2232_v53  ;;  %v2274_v45 = vld [vmem:[%s5594_s3 + $0x4b0] sm:$0xff]  ;;  %v2307_v34 = vld [vmem:[%s5594_s3 + $0x5b8] sm:$0xff] }
 0x1ab   :  { %3793 = vmatpush3.bf16.msra.mxu1 %v3792_v31  ;;  %1093 = vst.msk [vmem:[#allocation3 + $0xc] sm:$0x3] %vm408_vm9, %v1091_v6  ;;  %v2251_v31 = vld [vmem:[%s5594_s3 + $0x3f8] sm:$0xff]  ;;  %v2306_v53 = vld [vmem:[%s5594_s3 + $0x5b0] sm:$0xff] }
 0x1ac   :  { %v1205_v8 = vpop.permute.xlu1 %1204  ;;  %3795 = vmatprep.subr.bf16.mxu1 %v3794_v63  ;;  %v2203_v63 = vld [vmem:[%s5594_s3 + $0x278] sm:$0xff]  ;;  %v3842_v5 = vpack.c.bf16 %v2251_v31, %v2250_v56  ;;  %v2276_v31 = vld [vmem:[%s5594_s3 + $0x4c0] sm:$0xff] }
 0x1ad   :  { %1207 = vst.msk [vmem:[#allocation3 + $0xe] sm:$0x3] %vm408_vm9, %v1205_v8  ;;  %3825 = vmatpush3.bf16.msra.mxu0 %v3824_v3  ;;  %v2268_v3 = vld [vmem:[%s5594_s3 + $0x480] sm:$0xff]  ;;  %v3812_v6 = vpack.c.bf16 %v2203_v63, %v2202_v62  ;;  %v2290_v62 = vld [vmem:[%s5594_s3 + $0x530] sm:$0xff]  ;;  %v2291_v63 = vld [vmem:[%s5594_s3 + $0x538] sm:$0xff] }
 0x1ae   :  { %3827 = vmatprep.subr.bf16.mxu0 %v3826_v16  ;;  %v1489_v23 = vpop.permute.xlu0 %1488  ;;  %v2234_v16 = vld [vmem:[%s5594_s3 + $0x370] sm:$0xff]  ;;  %v3846_v8 = vpack.c.bf16 %v2269_v58, %v2268_v3  ;;  %v2308_v3 = vld [vmem:[%s5594_s3 + $0x5c0] sm:$0xff]  ;;  %v2309_v58 = vld [vmem:[%s5594_s3 + $0x5c8] sm:$0xff] }
 0x1af   :  { %3797 = vmatpush3.bf16.msra.mxu1 %v3796_v7  ;;  %1491 = vst.msk [vmem:[#allocation3 + $0x14] sm:$0x3] %vm348_vm7, %v1489_v23  ;;  %v2300_v7 = vld [vmem:[%s5594_s3 + $0x580] sm:$0xff]  ;;  %v3844_v14 = vpack.c.bf16 %v2235_v0, %v2234_v16 }
 0x1b0   :  { %v1603_v19 = vpop.permute.xlu1 %1602  ;;  %3799 = vmatprep.subr.bf16.mxu1 %v3798_v11  ;;  %v2252_v11 = vld [vmem:[%s5594_s3 + $0x400] sm:$0xff]  ;;  %v3878_v18 = vpack.c.bf16 %v2301_v52, %v2300_v7  ;;  %v3892_v7 = vpack.c.bf16 %v2291_v63, %v2290_v62  ;;  %v2299_v62 = vld [vmem:[%s5594_s3 + $0x578] sm:$0xff] }
 0x1b1   :  { %1605 = vst.msk [vmem:[#allocation3 + $0x16] sm:$0x3] %vm348_vm7, %v1603_v19  ;;  %3829 = vmatpush3.bf16.msra.mxu0 %v3828_v15  ;;  %v2270_v15 = vld [vmem:[%s5594_s3 + $0x490] sm:$0xff]  ;;  %v3848_v23 = vpack.c.bf16 %v2253_v12, %v2252_v11  ;;  %v2279_v11 = vld [vmem:[%s5594_s3 + $0x4d8] sm:$0xff]  ;;  %v3894_v12 = vpack.c.bf16 %v2309_v58, %v2308_v3  ;;  %v2365_v3 = vld [vmem:[%s5594_s3 + $0x788] sm:$0xff] }
 0x1b2   :  { %3831 = vmatprep.subr.bf16.mxu0 %v3830_v20  ;;  %v1518_v37 = vpop.permute.xlu0 %1517  ;;  %v2284_v20 = vld [vmem:[%s5594_s3 + $0x500] sm:$0xff]  ;;  %v3850_v19 = vpack.c.bf16 %v2271_v17, %v2270_v15  ;;  %v2293_v15 = vld [vmem:[%s5594_s3 + $0x548] sm:$0xff] }
 0x1b3   :  { %3801 = vmatpush3.bf16.msra.mxu1 %v3800_v13  ;;  %1520 = vst.msk [vmem:[#allocation3 + $0x14] sm:$0x3] %vm378_vm8, %v1518_v37  ;;  %v2302_v13 = vld [vmem:[%s5594_s3 + $0x590] sm:$0xff]  ;;  %v3880_v28 = vpack.c.bf16 %v2285_v21, %v2284_v20 }
 0x1b4   :  { %v1632_v42 = vpop.permute.xlu1 %1631  ;;  %3803 = vmatprep.subr.bf16.mxu1 %v3802_v26  ;;  %v2121_v10 = vld [vmem:[#allocation3 + $0x8] sm:$0xff]  ;;  %v2254_v26 = vld [vmem:[%s5594_s3 + $0x410] sm:$0xff]  ;;  %v3882_v33 = vpack.c.bf16 %v2303_v24, %v2302_v13 }
 0x1b5   :  { %1634 = vst.msk [vmem:[#allocation3 + $0x16] sm:$0x3] %vm378_vm8, %v1632_v42  ;;  %3833 = vmatpush3.bf16.msra.mxu0 %v3832_v32  ;;  %v5053_v47 = vrot.slane %v2121_v10, %v4884_v49  ;;  %v2408_v38 = vcombine.high %v2121_v10, %v2121_v10  ;;  %v2272_v32 = vld [vmem:[%s5594_s3 + $0x4a0] sm:$0xff]  ;;  %v3852_v37 = vpack.c.bf16 %v2255_v27, %v2254_v26  ;;  %v2257_v10 = vld [vmem:[%s5594_s3 + $0x428] sm:$0xff] }
 0x1b6   :  { %3835 = vmatprep.subr.bf16.mxu0 %v3834_v61  ;;  %v1261_v35 = vpop.permute.xlu0 %1260  ;;  %v2286_v61 = vld [vmem:[%s5594_s3 + $0x510] sm:$0xff]  ;;  %v3854_v42 = vpack.c.bf16 %v2273_v57, %v2272_v32  ;;  %v2281_v32 = vld [vmem:[%s5594_s3 + $0x4e8] sm:$0xff] }
 0x1b7   :  { %3805 = vmatpush3.bf16.msra.mxu1 %v3804_v29  ;;  %v2423_v54 = vcombine.high %v5053_v47, %v5053_v47  ;;  %v5070_v30 = vrot.slane %v2408_v38, %v4884_v49  ;;  %1263 = vst.msk [vmem:[#allocation3 + $0x10] sm:$0x3] %vm348_vm7, %v1261_v35  ;;  %v2304_v29 = vld [vmem:[%s5594_s3 + $0x5a0] sm:$0xff]  ;;  %v3884_v44 = vpack.c.bf16 %v2287_v4, %v2286_v61  ;;  %v2295_v61 = vld [vmem:[%s5594_s3 + $0x558] sm:$0xff] }
 0x1b8   :  { %v1375_v59 = vpop.permute.xlu1 %1374  ;;  %3807 = vmatprep.subr.bf16.mxu1 %v3806_v43  ;;  %v2256_v43 = vld [vmem:[%s5594_s3 + $0x420] sm:$0xff] }
 0x1b9   :  { %1377 = vst.msk [vmem:[#allocation3 + $0x12] sm:$0x3] %vm348_vm7, %v1375_v59  ;;  %3837 = vmatpush3.bf16.msra.mxu0 %v3836_v46  ;;  %2679 = vmatprep.mubr.f32.mxu1 %v2423_v54  ;;  %v2424_v1 = vcombine.high %v5070_v30, %v5070_v30  ;;  %v2275_v46 = vld [vmem:[%s5594_s3 + $0x4b8] sm:$0xff]  ;;  %v2288_v38 = vld [vmem:[%s5594_s3 + $0x520] sm:$0xff]  ;;  %v2277_v59 = vld [vmem:[%s5594_s3 + $0x4c8] sm:$0xff] }
 0x1ba   :  { %3839 = vmatprep.subr.bf16.mxu0 %v3838_v51  ;;  %v1290_v39 = vpop.permute.xlu0 %1289  ;;  %v3856_v51 = vpack.c.bf16 %v2257_v10, %v2256_v43  ;;  %v3858_v54 = vpack.c.bf16 %v2275_v46, %v2274_v45  ;;  %v3888_v56 = vpack.c.bf16 %v2289_v48, %v2288_v38  ;;  %v3862_v16 = vpack.c.bf16 %v2277_v59, %v2276_v31  ;;  %v2265_v43 = vld [vmem:[%s5594_s3 + $0x468] sm:$0xff]  ;;  %v2283_v45 = vld [vmem:[%s5594_s3 + $0x4f8] sm:$0xff] }
 0x1bb   :  { %3809 = vmatpush3.bf16.msra.mxu1 %v3808_v55  ;;  %2749 = vmatprep.mubr.f32.mxu0 %v2424_v1  ;;  %1292 = vst.msk [vmem:[#allocation3 + $0x10] sm:$0x3] %vm378_vm8, %v1290_v39  ;;  %v2258_v55 = vld [vmem:[%s5594_s3 + $0x430] sm:$0xff]  ;;  %v2260_v39 = vld [vmem:[%s5594_s3 + $0x440] sm:$0xff]  ;;  %v2297_v38 = vld [vmem:[%s5594_s3 + $0x568] sm:$0xff] }
 0x1bc   :  { %v1404_v50 = vpop.permute.xlu1 %1403  ;;  %3811 = vmatprep.subr.bf16.mxu1 %v3810_v60  ;;  %v3890_v60 = vpack.c.bf16 %v2307_v34, %v2306_v53  ;;  %v2315_v53 = vld [vmem:[%s5594_s3 + $0x5f8] sm:$0xff]  ;;  %v2333_v31 = vld [vmem:[%s5594_s3 + $0x688] sm:$0xff] }
 0x1bd   :  { %1406 = vst.msk [vmem:[#allocation3 + $0x12] sm:$0x3] %vm378_vm8, %v1404_v50  ;;  %3841 = vmatpush3.bf16.msra.mxu0 %v3840_v2 }
 0x1be   :  { %3843 = vmatprep.subr.bf16.mxu0 %v3842_v5  ;;  %v1319_v22 = vpop.permute.xlu0 %1318 }
 0x1bf   :  { %3813 = vmatpush3.bf16.msra.mxu1 %v3812_v6  ;;  %1321 = vst.msk [vmem:[#allocation3 + $0x10] sm:$0x3] %vm408_vm9, %v1319_v22  ;;  %v2261_v6 = vld [vmem:[%s5594_s3 + $0x448] sm:$0xff]  ;;  %v2310_v22 = vld [vmem:[%s5594_s3 + $0x5d0] sm:$0xff] }
 0x1c0   :  { %v1433_v25 = vpop.permute.xlu1 %1432  ;;  %3847 = vmatprep.subr.bf16.mxu1 %v3846_v8  ;;  %v2278_v8 = vld [vmem:[%s5594_s3 + $0x4d0] sm:$0xff]  ;;  %v3864_v20 = vpack.c.bf16 %v2261_v6, %v2260_v39 }
 0x1c1   :  { %1435 = vst.msk [vmem:[#allocation3 + $0x12] sm:$0x3] %vm408_vm9, %v1433_v25  ;;  %3845 = vmatpush3.bf16.msra.mxu0 %v3844_v14  ;;  %v2292_v14 = vld [vmem:[%s5594_s3 + $0x540] sm:$0xff]  ;;  %v3866_v24 = vpack.c.bf16 %v2279_v11, %v2278_v8  ;;  %v2262_v25 = vld [vmem:[%s5594_s3 + $0x450] sm:$0xff]  ;;  %v2349_v11 = vld [vmem:[%s5594_s3 + $0x708] sm:$0xff] }
 0x1c2   :  { %2680 = vmatmul.mubr.f32.vlgmr.msra.gmra.mrb[2].mxu1 %v5053_v47  ;;  %3879 = vmatprep.subr.bf16.mxu0 %v3878_v18  ;;  %v1547_v36 = vpop.permute.xlu0 %1546  ;;  %v3886_v47 = vpack.c.bf16 %v2305_v40, %v2304_v29  ;;  %v3896_v27 = vpack.c.bf16 %v2293_v15, %v2292_v14  ;;  %v2313_v29 = vld [vmem:[%s5594_s3 + $0x5e8] sm:$0xff]  ;;  %v2334_v6 = vld [vmem:[%s5594_s3 + $0x690] sm:$0xff]  ;;  %v2348_v8 = vld [vmem:[%s5594_s3 + $0x700] sm:$0xff] }
 0x1c3   :  { %3849 = vmatpush3.bf16.msra.mxu1 %v3848_v23  ;;  %1549 = vst.msk [vmem:[#allocation3 + $0x14] sm:$0x3] %vm408_vm9, %v1547_v36  ;;  %v2311_v23 = vld [vmem:[%s5594_s3 + $0x5d8] sm:$0xff]  ;;  %v2366_v14 = vld [vmem:[%s5594_s3 + $0x790] sm:$0xff] }
 0x1c4   :  { %2750 = vmatmul.mubr.f32.vlgmr.msra.gmra.mrb[18].mxu0 %v5070_v30  ;;  %v1661_v41 = vpop.permute.xlu1 %1660  ;;  %3851 = vmatprep.subr.bf16.mxu1 %v3850_v19  ;;  %v2259_v30 = vld [vmem:[%s5594_s3 + $0x438] sm:$0xff]  ;;  %v3898_v57 = vpack.c.bf16 %v2311_v23, %v2310_v22  ;;  %v3944_v22 = vpack.c.bf16 %v2349_v11, %v2348_v8  ;;  %v2336_v23 = vld [vmem:[%s5594_s3 + $0x6a0] sm:$0xff]  ;;  %v2345_v8 = vld [vmem:[%s5594_s3 + $0x6e8] sm:$0xff] }
 0x1c5   :  { %1663 = vst.msk [vmem:[#allocation3 + $0x16] sm:$0x3] %vm408_vm9, %v1661_v41  ;;  %3881 = vmatpush3.bf16.msra.mxu0 %v3880_v28  ;;  %v3860_v2 = vpack.c.bf16 %v2259_v30, %v2258_v55  ;;  %v2263_v19 = vld [vmem:[%s5594_s3 + $0x458] sm:$0xff]  ;;  %v2280_v28 = vld [vmem:[%s5594_s3 + $0x4e0] sm:$0xff] }
 0x1c6   :  { %3883 = vmatprep.subr.bf16.mxu0 %v3882_v33  ;;  %v1945_v9 = vpop.permute.xlu0 %1944  ;;  %v2294_v33 = vld [vmem:[%s5594_s3 + $0x550] sm:$0xff]  ;;  %v3868_v36 = vpack.c.bf16 %v2263_v19, %v2262_v25  ;;  %v3870_v41 = vpack.c.bf16 %v2281_v32, %v2280_v28  ;;  %v2267_v55 = vld [vmem:[%s5594_s3 + $0x478] sm:$0xff] }
 0x1c7   :  { %3853 = vmatpush3.bf16.msra.mxu1 %v3852_v37  ;;  %1947 = vst.msk [vmem:[#allocation3 + $0x1c] sm:$0x3] %vm348_vm7, %v1945_v9  ;;  %v2312_v37 = vld [vmem:[%s5594_s3 + $0x5e0] sm:$0xff]  ;;  %v3900_v10 = vpack.c.bf16 %v2295_v61, %v2294_v33  ;;  %v2367_v15 = vld [vmem:[%s5594_s3 + $0x798] sm:$0xff]  ;;  %v2350_v25 = vld [vmem:[%s5594_s3 + $0x710] sm:$0xff] }
 0x1c8   :  { %v2059_v35 = vpop.permute.xlu1 %2058  ;;  %3855 = vmatprep.subr.bf16.mxu1 %v3854_v42  ;;  %v2264_v42 = vld [vmem:[%s5594_s3 + $0x460] sm:$0xff]  ;;  %v3902_v46 = vpack.c.bf16 %v2313_v29, %v2312_v37  ;;  %v2351_v19 = vld [vmem:[%s5594_s3 + $0x718] sm:$0xff]  ;;  %v2321_v33 = vld [vmem:[%s5594_s3 + $0x628] sm:$0xff] }
 0x1c9   :  { %2061 = vst.msk [vmem:[#allocation3 + $0x1e] sm:$0x3] %vm348_vm7, %v2059_v35  ;;  %3885 = vmatpush3.bf16.msra.mxu0 %v3884_v44  ;;  %v2282_v44 = vld [vmem:[%s5594_s3 + $0x4f0] sm:$0xff]  ;;  %v3872_v9 = vpack.c.bf16 %v2265_v43, %v2264_v42  ;;  %v3948_v61 = vpack.c.bf16 %v2351_v19, %v2350_v25  ;;  %v2339_v37 = vld [vmem:[%s5594_s3 + $0x6b8] sm:$0xff] }
 0x1ca   :  { %3887 = vmatprep.subr.bf16.mxu0 %v3886_v47  ;;  %v1974_v1 = vpop.permute.xlu0 %1973  ;;  %v2296_v47 = vld [vmem:[%s5594_s3 + $0x560] sm:$0xff]  ;;  %v3874_v35 = vpack.c.bf16 %v2283_v45, %v2282_v44  ;;  %v2370_v44 = vld [vmem:[%s5594_s3 + $0x7b0] sm:$0xff]  ;;  %v2371_v45 = vld [vmem:[%s5594_s3 + $0x7b8] sm:$0xff] }
 0x1cb   :  { %3857 = vmatpush3.bf16.msra.mxu1 %v3856_v51  ;;  %1976 = vst.msk [vmem:[#allocation3 + $0x1c] sm:$0x3] %vm378_vm8, %v1974_v1  ;;  %v2314_v51 = vld [vmem:[%s5594_s3 + $0x5f0] sm:$0xff]  ;;  %v3904_v30 = vpack.c.bf16 %v2297_v38, %v2296_v47  ;;  %v2323_v38 = vld [vmem:[%s5594_s3 + $0x638] sm:$0xff] }
 0x1cc   :  { %v2088_v5 = vpop.permute.xlu1 %2087  ;;  %3859 = vmatprep.subr.bf16.mxu1 %v3858_v54  ;;  %v2122_v0 = vld [vmem:[#allocation3 + $0x10] sm:$0xff]  ;;  %v3906_v59 = vpack.c.bf16 %v2315_v53, %v2314_v51  ;;  %v2341_v51 = vld [vmem:[%s5594_s3 + $0x6c8] sm:$0xff]  ;;  %v3954_v53 = vpack.c.bf16 %v2371_v45, %v2370_v44  ;;  %v2347_v25 = vld [vmem:[%s5594_s3 + $0x6f8] sm:$0xff]  ;;  %v4042_v45 = vmov 0.0|0.0  }
 0x1cd   :  { %2090 = vst.msk [vmem:[#allocation3 + $0x1e] sm:$0x3] %vm378_vm8, %v2088_v5  ;;  %3889 = vmatpush3.bf16.msra.mxu0 %v3888_v56  ;;  %v5221_v52 = vrot.slane %v2122_v0, %v4884_v49  ;;  %v2425_v50 = vcombine.high %v2122_v0, %v2122_v0  ;;  %v2266_v54 = vld [vmem:[%s5594_s3 + $0x470] sm:$0xff]  ;;  %v2332_v56 = vld [vmem:[%s5594_s3 + $0x680] sm:$0xff]  ;;  %v2317_v0 = vld [vmem:[%s5594_s3 + $0x608] sm:$0xff] }
 0x1ce   :  { %3891 = vmatprep.subr.bf16.mxu0 %v3890_v60  ;;  %v1717_v17 = vpop.permute.xlu0 %1716  ;;  %v2298_v60 = vld [vmem:[%s5594_s3 + $0x570] sm:$0xff]  ;;  %v3876_v1 = vpack.c.bf16 %v2267_v55, %v2266_v54  ;;  %v3910_v5 = vpack.c.bf16 %v2333_v31, %v2332_v56  ;;  %v2372_v55 = vld [vmem:[%s5594_s3 + $0x7c0] sm:$0xff] }
 0x1cf   :  { %3861 = vmatpush3.bf16.msra.mxu1 %v3860_v2  ;;  %v2440_v18 = vcombine.high %v5221_v52, %v5221_v52  ;;  %v5238_v21 = vrot.slane %v2425_v50, %v4884_v49  ;;  %1719 = vst.msk [vmem:[#allocation3 + $0x18] sm:$0x3] %vm348_vm7, %v1717_v17  ;;  %v2364_v2 = vld [vmem:[%s5594_s3 + $0x780] sm:$0xff]  ;;  %v3908_v39 = vpack.c.bf16 %v2299_v62, %v2298_v60  ;;  %v2322_v47 = vld [vmem:[%s5594_s3 + $0x630] sm:$0xff] }
 0x1d0   :  { %v1831_v13 = vpop.permute.xlu1 %1830  ;;  %3863 = vmatprep.subr.bf16.mxu1 %v3862_v16  ;;  %v2316_v16 = vld [vmem:[%s5594_s3 + $0x600] sm:$0xff]  ;;  %v3942_v50 = vpack.c.bf16 %v2365_v3, %v2364_v2  ;;  %v3924_v54 = vpack.c.bf16 %v2323_v38, %v2322_v47  ;;  %v2342_v62 = vld [vmem:[%s5594_s3 + $0x6d0] sm:$0xff]  ;;  %v2357_v3 = vld [vmem:[%s5594_s3 + $0x748] sm:$0xff] }
 0x1d1   :  { %1833 = vst.msk [vmem:[#allocation3 + $0x1a] sm:$0x3] %vm348_vm7, %v1831_v13  ;;  %3893 = vmatpush3.bf16.msra.mxu0 %v3892_v7  ;;  %2819 = vmatprep.mubr.f32.mxu1 %v2440_v18  ;;  %v2441_v26 = vcombine.high %v5238_v21, %v5238_v21  ;;  %v2335_v7 = vld [vmem:[%s5594_s3 + $0x698] sm:$0xff]  ;;  %v2318_v18 = vld [vmem:[%s5594_s3 + $0x610] sm:$0xff]  ;;  %v2337_v13 = vld [vmem:[%s5594_s3 + $0x6a8] sm:$0xff] }
 0x1d2   :  { %3895 = vmatprep.subr.bf16.mxu0 %v3894_v12  ;;  %v1746_v4 = vpop.permute.xlu0 %1745  ;;  %v3912_v12 = vpack.c.bf16 %v2317_v0, %v2316_v16  ;;  %v3914_v17 = vpack.c.bf16 %v2335_v7, %v2334_v6  ;;  %v3918_v28 = vpack.c.bf16 %v2337_v13, %v2336_v23  ;;  %v2324_v31 = vld [vmem:[%s5594_s3 + $0x640] sm:$0xff]  ;;  %v2375_v16 = vld [vmem:[%s5594_s3 + $0x7d8] sm:$0xff]  ;;  %v2329_v23 = vld [vmem:[%s5594_s3 + $0x668] sm:$0xff] }
 0x1d3   :  { %3865 = vmatpush3.bf16.msra.mxu1 %v3864_v20  ;;  %2889 = vmatprep.mubr.f32.mxu0 %v2441_v26  ;;  %1748 = vst.msk [vmem:[#allocation3 + $0x18] sm:$0x3] %vm378_vm8, %v1746_v4  ;;  %v2319_v20 = vld [vmem:[%s5594_s3 + $0x618] sm:$0xff]  ;;  %v2356_v2 = vld [vmem:[%s5594_s3 + $0x740] sm:$0xff]  ;;  %v3038_v44 = vld [vmem:[%s5596_s5 + $0x10] sm:$0xff] }
 0x1d4   :  { %v1860_v40 = vpop.permute.xlu1 %1859  ;;  %3867 = vmatprep.subr.bf16.mxu1 %v3866_v24  ;;  %v3946_v24 = vpack.c.bf16 %v2367_v15, %v2366_v14  ;;  %v3916_v26 = vpack.c.bf16 %v2319_v20, %v2318_v18  ;;  %v2327_v6 = vld [vmem:[%s5594_s3 + $0x658] sm:$0xff]  ;;  %v3960_v7 = vpack.c.bf16 %v2357_v3, %v2356_v2  ;;  %v2377_v18 = vld [vmem:[%s5594_s3 + $0x7e8] sm:$0xff]  ;;  %v3040_v47 = vld [vmem:[%s5596_s5 + $0x20] sm:$0xff] }
 0x1d5   :  { %1862 = vst.msk [vmem:[#allocation3 + $0x1a] sm:$0x3] %vm378_vm8, %v1860_v40  ;;  %3897 = vmatpush3.bf16.msra.mxu0 %v3896_v27  ;;  %v2368_v27 = vld [vmem:[%s5594_s3 + $0x7a0] sm:$0xff]  ;;  %v2359_v14 = vld [vmem:[%s5594_s3 + $0x758] sm:$0xff]  ;;  %v3041_v38 = vld [vmem:[%s5596_s5 + $0x28] sm:$0xff] }
 0x1d6   :  { %3899 = vmatprep.subr.bf16.mxu0 %v3898_v57  ;;  %v1775_v48 = vpop.permute.xlu0 %1774  ;;  %v2320_v57 = vld [vmem:[%s5594_s3 + $0x620] sm:$0xff] }
 0x1d7   :  { %3869 = vmatpush3.bf16.msra.mxu1 %v3868_v36  ;;  %1777 = vst.msk [vmem:[#allocation3 + $0x18] sm:$0x3] %vm408_vm9, %v1775_v48  ;;  %v2352_v40 = vld [vmem:[%s5594_s3 + $0x720] sm:$0xff]  ;;  %v3920_v43 = vpack.c.bf16 %v2321_v33, %v2320_v57  ;;  %v2330_v33 = vld [vmem:[%s5594_s3 + $0x670] sm:$0xff] }
 0x1d8   :  { %v1889_v34 = vpop.permute.xlu1 %1888  ;;  %3871 = vmatprep.subr.bf16.mxu1 %v3870_v41  ;;  %v2353_v41 = vld [vmem:[%s5594_s3 + $0x728] sm:$0xff]  ;;  %v3301_v3 = vld [vmem:[%s5595_s4] ss:$0 sm:$0xff] }
 0x1d9   :  { %1891 = vst.msk [vmem:[#allocation3 + $0x1a] sm:$0x3] %vm408_vm9, %v1889_v34  ;;  %3901 = vmatpush3.bf16.msra.mxu0 %v3900_v10  ;;  %v3952_v48 = vpack.c.bf16 %v2353_v41, %v2352_v40  ;;  %v2354_v34 = vld [vmem:[%s5594_s3 + $0x730] sm:$0xff] }
 0x1da   :  { %3903 = vmatprep.subr.bf16.mxu0 %v3902_v46  ;;  %v2003_v63 = vpop.permute.xlu0 %2002 }
 0x1db   :  { %3873 = vmatpush3.bf16.msra.mxu1 %v3872_v9  ;;  %2005 = vst.msk [vmem:[#allocation3 + $0x1c] sm:$0x3] %vm408_vm9, %v2003_v63  ;;  %v2340_v9 = vld [vmem:[%s5594_s3 + $0x6c0] sm:$0xff]  ;;  %v2343_v63 = vld [vmem:[%s5594_s3 + $0x6d8] sm:$0xff] }
 0x1dc   :  { %v2117_v58 = vpop.permute.xlu1 %2116  ;;  %3875 = vmatprep.subr.bf16.mxu1 %v3874_v35  ;;  %v2355_v35 = vld [vmem:[%s5594_s3 + $0x738] sm:$0xff]  ;;  %v3926_v56 = vpack.c.bf16 %v2341_v51, %v2340_v9  ;;  %v3930_v0 = vpack.c.bf16 %v2343_v63, %v2342_v62  ;;  %v4044_v63 = vmov 0.0  }
 0x1dd   :  { %2119 = vst.msk [vmem:[#allocation3 + $0x1e] sm:$0x3] %vm408_vm9, %v2117_v58  ;;  %3905 = vmatpush3.bf16.msra.mxu0 %v3904_v30  ;;  %v2373_v30 = vld [vmem:[%s5594_s3 + $0x7c8] sm:$0xff]  ;;  %v3956_v60 = vpack.c.bf16 %v2355_v35, %v2354_v34  ;;  %v3043_v9 = vld [vmem:[%s5596_s5 + $0x38] sm:$0xff] }
 0x1de   :  { %3907 = vmatprep.subr.bf16.mxu0 %v3906_v59  ;;  %v2325_v59 = vld [vmem:[%s5594_s3 + $0x648] sm:$0xff]  ;;  %v3051_v62 = vld [vmem:[%s5596_s5 + $0x78] sm:$0xff] }
 0x1df   :  { %3877 = vmatpush3.bf16.msra.mxu1 %v3876_v1  ;;  %v3958_v1 = vpack.c.bf16 %v2373_v30, %v2372_v55  ;;  %v3928_v58 = vpack.c.bf16 %v2325_v59, %v2324_v31  ;;  %v3045_v34 = vld [vmem:[%s5596_s5 + $0x48] sm:$0xff]  ;;  %v3047_v55 = vld [vmem:[%s5596_s5 + $0x58] sm:$0xff]  ;;  %v3050_v59 = vld [vmem:[%s5596_s5 + $0x70] sm:$0xff] }
 0x1e0   :  { %3911 = vmatprep.subr.bf16.mxu1 %v3910_v5  ;;  %v2374_v5 = vld [vmem:[%s5594_s3 + $0x7d0] sm:$0xff]  ;;  %v3049_v31 = vld [vmem:[%s5596_s5 + $0x68] sm:$0xff] }
 0x1e1   :  { %3909 = vmatpush3.bf16.msra.mxu0 %v3908_v39  ;;  %v2326_v39 = vld [vmem:[%s5594_s3 + $0x650] sm:$0xff]  ;;  %v3962_v11 = vpack.c.bf16 %v2375_v16, %v2374_v5 }
 0x1e2   :  { %2820 = vmatmul.mubr.f32.vlgmr.msra.gmra.mrb[4].mxu1 %v5221_v52  ;;  %3943 = vmatprep.subr.bf16.mxu0 %v3942_v50  ;;  %v2369_v52 = vld [vmem:[%s5594_s3 + $0x7a8] sm:$0xff]  ;;  %v2344_v50 = vld [vmem:[%s5594_s3 + $0x6e0] sm:$0xff]  ;;  %v3932_v15 = vpack.c.bf16 %v2327_v6, %v2326_v39 }
 0x1e3   :  { %3913 = vmatpush3.bf16.msra.mxu1 %v3912_v12  ;;  %v3950_v29 = vpack.c.bf16 %v2369_v52, %v2368_v27  ;;  %v2358_v12 = vld [vmem:[%s5594_s3 + $0x750] sm:$0xff]  ;;  %v3934_v20 = vpack.c.bf16 %v2345_v8, %v2344_v50  ;;  %v2361_v27 = vld [vmem:[%s5594_s3 + $0x768] sm:$0xff] }
 0x1e4   :  { %2890 = vmatmul.mubr.f32.vlgmr.msra.gmra.mrb[20].mxu0 %v5238_v21  ;;  %3915 = vmatprep.subr.bf16.mxu1 %v3914_v17  ;;  %v2123_v32 = vld [vmem:[#allocation3 + $0x18] sm:$0xff]  ;;  %v2338_v21 = vld [vmem:[%s5594_s3 + $0x6b0] sm:$0xff]  ;;  %v2376_v17 = vld [vmem:[%s5594_s3 + $0x7e0] sm:$0xff]  ;;  %v3964_v13 = vpack.c.bf16 %v2359_v14, %v2358_v12 }
 0x1e5   :  { %3945 = vmatpush3.bf16.msra.mxu0 %v3944_v22  ;;  %v5385_v4 = vrot.slane %v2123_v32, %v4884_v49  ;;  %v2442_v36 = vcombine.high %v2123_v32, %v2123_v32  ;;  %v3922_v46 = vpack.c.bf16 %v2339_v37, %v2338_v21  ;;  %v2328_v22 = vld [vmem:[%s5594_s3 + $0x660] sm:$0xff]  ;;  %v3966_v19 = vpack.c.bf16 %v2377_v18, %v2376_v17  ;;  %v2379_v32 = vld [vmem:[%s5594_s3 + $0x7f8] sm:$0xff]  ;;  %v2362_v37 = vld [vmem:[%s5594_s3 + $0x770] sm:$0xff] }
 0x1e6   :  { %3947 = vmatprep.subr.bf16.mxu0 %v3946_v24  ;;  %v2346_v24 = vld [vmem:[%s5594_s3 + $0x6f0] sm:$0xff]  ;;  %v3936_v52 = vpack.c.bf16 %v2329_v23, %v2328_v22 }
 0x1e7   :  { %3917 = vmatpush3.bf16.msra.mxu1 %v3916_v26  ;;  %v2457_v42 = vcombine.high %v5385_v4, %v5385_v4  ;;  %v5402_v10 = vrot.slane %v2442_v36, %v4884_v49  ;;  %v2360_v26 = vld [vmem:[%s5594_s3 + $0x760] sm:$0xff]  ;;  %v3938_v57 = vpack.c.bf16 %v2347_v25, %v2346_v24 }
 0x1e8   :  { %3919 = vmatprep.subr.bf16.mxu1 %v3918_v28  ;;  %v2378_v28 = vld [vmem:[%s5594_s3 + $0x7f0] sm:$0xff]  ;;  %v3968_v36 = vpack.c.bf16 %v2361_v27, %v2360_v26 }
 0x1e9   :  { %3949 = vmatpush3.bf16.msra.mxu0 %v3948_v61  ;;  %2959 = vmatprep.mubr.f32.mxu1 %v2457_v42  ;;  %v2458_v49 = vcombine.high %v5402_v10, %v5402_v10  ;;  %v2331_v61 = vld [vmem:[%s5594_s3 + $0x678] sm:$0xff]  ;;  %v3970_v21 = vpack.c.bf16 %v2379_v32, %v2378_v28  ;;  %v3036_v42 = vld [vmem:[%s5596_s5] sm:$0xff] }
 0x1ea   :  { %3951 = vmatprep.subr.bf16.mxu0 %v3950_v29  ;;  %v2363_v29 = vld [vmem:[%s5594_s3 + $0x778] sm:$0xff]  ;;  %v3940_v40 = vpack.c.bf16 %v2331_v61, %v2330_v33 }
 0x1eb   :  { %3921 = vmatpush3.bf16.msra.mxu1 %v3920_v43  ;;  %3029 = vmatprep.mubr.f32.mxu0 %v2458_v49  ;;  %v3972_v41 = vpack.c.bf16 %v2363_v29, %v2362_v37  ;;  %v3037_v43 = vld [vmem:[%s5596_s5 + $0x8] sm:$0xff]  ;;  %v3981_v49 = vpack.c.bf16 %v3041_v38, %v3040_v47  ;;  %v3302_v37 = vld [vmem:[%s5597_s6] ss:$0 sm:$0xff]  ;;  %s4014_s6 = scalar_lea.vmem %s3149_s19, 32 }
 0x1ec   :  { %3923 = vmatprep.subr.bf16.mxu1 %v3922_v46  ;;  %v3975_v46 = vpack.c.bf16 %v3037_v43, %v3036_v42  ;;  %p4015_p0 = scmp.ne.s32.totalorder %s3149_s19, %s4014_s6  ;;  %p4020_p2 = scmp.lt.s32.totalorder %s4014_s6, %s4014_s6 }
 0x1ed   :  { %3953 = vmatpush3.bf16.msra.mxu0 %v3952_v48  ;;  %v3042_v48 = vld [vmem:[%s5596_s5 + $0x30] sm:$0xff] }
 0x1ee   :  { %3955 = vmatprep.subr.bf16.mxu0 %v3954_v53  ;;  %v3984_v51 = vpack.c.bf16 %v3043_v9, %v3042_v48  ;;  %v3044_v53 = vld [vmem:[%s5596_s5 + $0x40] sm:$0xff]  ;;  %p4021_p3 = por %p4020_p2, %p4019_p1 }
 0x1ef   :  { %3925 = vmatpush3.bf16.msra.mxu1 %v3924_v54  ;;  %v3987_v35 = vpack.c.bf16 %v3045_v34, %v3044_v53  ;;  %v3046_v54 = vld [vmem:[%s5596_s5 + $0x50] sm:$0xff] }
 0x1f0   :  { %3927 = vmatprep.subr.bf16.mxu1 %v3926_v56  ;;  %v3990_v30 = vpack.c.bf16 %v3047_v55, %v3046_v54  ;;  %v3048_v56 = vld [vmem:[%s5596_s5 + $0x60] sm:$0xff]  ;;  %p4022_p4 = pnand %p4021_p3, %p4015_p0 }
 0x1f1   :  { %3957 = vmatpush3.bf16.msra.mxu0 %v3956_v60  ;;  %v3993_v60 = vpack.c.bf16 %v3049_v31, %v3048_v56 }
 0x1f2   :  { %3959 = vmatprep.subr.bf16.mxu0 %v3958_v1  ;;  %v3996_v1 = vpack.c.bf16 %v3051_v62, %v3050_v59 }
 0x1f3   :  { %3929 = vmatpush3.bf16.msra.mxu1 %v3928_v58 }
 0x1f4   :  { %3931 = vmatprep.subr.bf16.mxu1 %v3930_v0 }
 0x1f5   :  { %3961 = vmatpush3.bf16.msra.mxu0 %v3960_v7 }
 0x1f6   :  { %3963 = vmatprep.subr.bf16.mxu0 %v3962_v11 }
 0x1f7   :  { %3933 = vmatpush3.bf16.msra.mxu1 %v3932_v15 }
 0x1f8   :  { %3935 = vmatprep.subr.bf16.mxu1 %v3934_v20 }
 0x1f9   :  { %3965 = vmatpush3.bf16.msra.mxu0 %v3964_v13 }
 0x1fa   :  { %3967 = vmatprep.subr.bf16.mxu0 %v3966_v19 }
 0x1fb   :  { %3937 = vmatpush3.bf16.msra.mxu1 %v3936_v52 }
 0x1fc   :  { %3939 = vmatprep.subr.bf16.mxu1 %v3938_v57 }
 0x1fd   :  { %3969 = vmatpush3.bf16.msra.mxu0 %v3968_v36 }
 0x1fe   :  { %3971 = vmatprep.subr.bf16.mxu0 %v3970_v21 }
 0x1ff   :  { %3941 = vmatpush3.bf16.msra.mxu1 %v3940_v40 }
 0x200   :  { %3974 = vmatprep.subr.bf16.mxu1 %v4042_v45 }
 0x201   :  { %3973 = vmatpush3.bf16.msra.mxu0 %v3972_v41 }
 0x202   :  { %2960 = vmatmul.mubr.f32.vlgmr.msra.gmra.mrb[6].mxu1 %v5385_v4  ;;  %v3039_v4 = vld [vmem:[%s5596_s5 + $0x18] sm:$0xff] }
 0x203   :  { %3976 = vmatpush3.bf16.msra.mxu1 %v3975_v46  ;;  %3699 = vmatprep.mubr.msk.f32.mxu1 %vm4043_vm10, %v4044_v63 }
 0x204   :  { %3030 = vmatmul.mubr.f32.vlgmr.msra.gmra.mrb[22].mxu0 %v5402_v10  ;;  %v3978_v10 = vpack.c.bf16 %v3039_v4, %v3038_v44  ;;  %3977 = vmatprep.subr.bf16.mxu1 %v4042_v45 }
 0x207   :  { %3979 = vmatpush3.bf16.msra.mxu1 %v3978_v10 }
 0x208   :  { %3980 = vmatprep.subr.bf16.mxu1 %v4042_v45 }
 0x20b   :  { %3982 = vmatpush3.bf16.msra.mxu1 %v3981_v49 }
 0x20c   :  { %3983 = vmatprep.subr.bf16.mxu1 %v4042_v45 }
 0x20f   :  { %3985 = vmatpush3.bf16.msra.mxu1 %v3984_v51 }
 0x210   :  { %3986 = vmatprep.subr.bf16.mxu1 %v4042_v45 }
 0x213   :  { %3988 = vmatpush3.bf16.msra.mxu1 %v3987_v35 }
 0x214   :  { %3989 = vmatprep.subr.bf16.mxu1 %v4042_v45 }
 0x217   :  { %3991 = vmatpush3.bf16.msra.mxu1 %v3990_v30 }
 0x218   :  { %3992 = vmatprep.subr.bf16.mxu1 %v4042_v45 }
 0x21b   :  { %3994 = vmatpush3.bf16.msra.mxu1 %v3993_v60 }
 0x21c   :  { %3995 = vmatprep.subr.bf16.mxu1 %v4042_v45 }
 0x21f   :  { %3997 = vmatpush3.bf16.msra.mxu1 %v3996_v1 }
 0x275   :  { %v3360_v2 = vpop.f32.mrb[0].mxu1 }
 0x276   :  { %v3361_v58 = vpop.f32.mrb[1].mxu1 }
 0x277   :  { %v3362_v5 = vadd.f32 %v3361_v58, %v3360_v2  ;;  %v3395_v16 = vpop.f32.mrb[16].mxu0 }
 0x278   :  { %v3396_v0 = vpop.f32.mrb[17].mxu0 }
 0x279   :  { %v2542_v39 = vadd.f32 %v3362_v5, %v3301_v3  ;;  %v3397_v6 = vadd.f32 %v3396_v0, %v3395_v16 }
 0x27b   :  { %v2612_v7 = vadd.f32 %v3397_v6, %v2542_v39 }
 0x295   :  { %v3430_v50 = vpop.f32.mrb[2].mxu1 }
 0x296   :  { %v3431_v8 = vpop.f32.mrb[3].mxu1 }
 0x297   :  { %v3432_v11 = vadd.f32 %v3431_v8, %v3430_v50  ;;  %v3465_v12 = vpop.f32.mrb[18].mxu0 }
 0x298   :  { %v3466_v14 = vpop.f32.mrb[19].mxu0 }
 0x299   :  { %v2682_v15 = vadd.f32 %v3432_v11, %v2612_v7  ;;  %v3467_v17 = vadd.f32 %v3466_v14, %v3465_v12 }
 0x29b   :  { %v2752_v18 = vadd.f32 %v3467_v17, %v2682_v15 }
 0x2b5   :  { %v3500_v20 = vpop.f32.mrb[4].mxu1 }
 0x2b6   :  { %v3501_v22 = vpop.f32.mrb[5].mxu1 }
 0x2b7   :  { %v3502_v23 = vadd.f32 %v3501_v22, %v3500_v20  ;;  %v3535_v13 = vpop.f32.mrb[20].mxu0 }
 0x2b8   :  { %v3536_v24 = vpop.f32.mrb[21].mxu0 }
 0x2b9   :  { %v2822_v25 = vadd.f32 %v3502_v23, %v2752_v18  ;;  %v3537_v19 = vadd.f32 %v3536_v24, %v3535_v13 }
 0x2bb   :  { %v2892_v26 = vadd.f32 %v3537_v19, %v2822_v25 }
 0x2d5   :  { %v3570_v27 = vpop.f32.mrb[6].mxu1 }
 0x2d6   :  { %v3571_v52 = vpop.f32.mrb[7].mxu1 }
 0x2d7   :  { %v3572_v28 = vadd.f32 %v3571_v52, %v3570_v27  ;;  %v3605_v32 = vpop.f32.mrb[22].mxu0 }
 0x2d8   :  { %v3606_v57 = vpop.f32.mrb[23].mxu0 }
 0x2d9   :  { %v2962_v33 = vadd.f32 %v3572_v28, %v2892_v26  ;;  %v3607_v61 = vadd.f32 %v3606_v57, %v3605_v32 }
 0x2db   :  { %v3032_v36 = vadd.f32 %v3607_v61, %v2962_v33 }
 0x2dd   :  { %v3035_v21 = vmax.f32 %v3032_v36, 0.0 }
 0x2df   :  { %3700 = vmatmul.mubr.f32.vlgmr.msra.gmra.mrb[8].mxu1 %v3035_v21 }
 0x3b2   :  { %v3125_v29 = vpop.f32.mrb[8].mxu1 }
 0x3b3   :  { %v3126_v40 = vadd.f32 %v3302_v37, %v3125_v29  ;;  %v3701_v41 = vpop.f32.mrb[9].mxu1 }
 0x3b5   :  { %v3130_v42 = vsel %vm3129_vm11, %v3126_v40, -inf }
 0x3b6   :  { %3131 = vmax.xlane.f32.xlu0 %v3130_v42 }
 0x443   :  { %v3132_v43 = vpop.xlane.xlu0 %3131 }
 0x444   :  { %v3133_v44 = vsub.f32 %v3126_v40, %v3132_v43 }
 0x446   :  { %v3134_v45 = vmul.f32 1.442695, %v3133_v44 }
 0x448   :  { %4010 = vpow2.f32 %v3134_v45 }
 0x452   :  { %v4011_v46 = vpop.eup %4010 }
 0x453   :  { %v3136_v4 = vsel %vm3129_vm11, %v4011_v46, 0.0 }
 0x454   :  { %3137 = vadd.xlane.f32.xlu1 %v3136_v4 }
 0x4e1   :  { %v3138_v10 = vpop.xlane.xlu1 %3137 }
 0x4e2   :  { %4012 = vrcp.f32 %v3138_v10 }
 0x4ec   :  { %v4013_v47 = vpop.eup %4012 }
 0x4ed   :  { %v3140_v38 = vmul.f32 %v4013_v47, %v4011_v46 }
 0x4ef   :  { %3141 = vst.msk [vmem:[#allocation4] sm:$0x3] %vm3129_vm11, %v3140_v38 }
 0x4f0   :  { %4025 = shalt.err (!%p4022_p4)
}
 0x4f1   :  { %s4026_s22 = scalar_lea.hbm %s5598_s7, 32 }
 0x4f2   :  { %p4027_p5 = scmp.ne.s32.totalorder %s5598_s7, %s4026_s22  ;;  %p4030_p6 = scmp.lt.u32.totalorder %s4026_s22, %s5598_s7 }
 0x4f4   :  { %p4032_p7 = pnand %p4030_p6, %p4027_p5 }
 0x4f6   :  { %4035 = shalt.err (!%p4032_p7)
}
 0x4f7   :  { %3151 = dma.vmem_to_hbm [thread:$0]  %s3149_s19, 32, %s5598_s7, [#allocation5]  }
 0x4f8   :  { %4036 = dma.done.wait [#allocation5], 32  }
 0x4f9   :  { %4037 = vsyncadd [#allocation5], 4294967264 }
 0x4fa   :  { %3155 = vsyncpa [#allocation5], 1 }

</bundles_post_ra>
